<compile_context>
chip_gen: v5e
topology: v5e:2x2
jax: 0.10.0
libtpu: 0.0.40
codegen_flags: <defaults>
</compile_context>

<pallas_src>
from functools import partial

import jax
import jax.numpy as jnp
from jax.experimental import pallas as pl
from jax.experimental.pallas import tpu as pltpu


_PALLAS_MIN_MACS = 1 << 22   # below this, XLA's fused dot wins (launch overhead dominates)
_MAX_SINGLE_K = 2048         # largest reduction dim we load as a single K block


# ---------------------------------------------------------------------------
# Fused Linear + bias + LeakyReLU kernel (2-D grid, single K block, no scratch)
# ---------------------------------------------------------------------------
def _linear_bias_leaky_relu_kernel(x_ref, w_ref, b_ref, o_ref, *, negative_slope):
    # bf16 MXU operands, f32 accumulation; epilogue stays f32 (v5e-safe).
    x = x_ref[...].astype(jnp.bfloat16)
    y = jnp.dot(x, w_ref[...], preferred_element_type=jnp.float32)
    y = y + b_ref[...]                       # (tm, tn) + (1, tn) broadcast
    o_ref[...] = jnp.where(y >= 0.0, y, negative_slope * y)


def _linear_leaky_relu_pallas(x, w, b, *, negative_slope):
    M, K = x.shape
    _, N = w.shape
    w_bf = w.astype(jnp.bfloat16)            # tiny; cast once (CSE'd under jit)
    b2 = b.astype(jnp.float32).reshape(1, N)

    # Full-extent blocks when the dim is small (always legal); otherwise
    # MXU-friendly tiles with a ragged last tile handled by Pallas masking.
    tm = M if M <= 512 else 512
    tn = N if N <= 512 else 256
    grid = (pl.cdiv(M, tm), pl.cdiv(N, tn))

    return pl.pallas_call(
        partial(_linear_bias_leaky_relu_kernel, negative_slope=negative_slope),
        out_shape=jax.ShapeDtypeStruct((M, N), jnp.float32),
        grid=grid,
        in_specs=[
            pl.BlockSpec((tm, K), lambda i, j: (i, 0)),   # activation tile (f32 in HBM)
            pl.BlockSpec((K, tn), lambda i, j: (0, j)),   # weight tile (bf16)
            pl.BlockSpec((1, tn), lambda i, j: (0, j)),   # bias tile (f32)
        ],
        out_specs=pl.BlockSpec((tm, tn), lambda i, j: (i, j)),
        compiler_params=pltpu.CompilerParams(
            dimension_semantics=("parallel", "parallel"),
            vmem_limit_bytes=32 * 1024 * 1024,
        ),
    )(x, w_bf, b2)


def linear_leaky_relu(x, w, b, *, negative_slope=0.01, force_pallas=False):
    """leaky_relu(x @ w + b).  x: [M, K], w: [K, N], b: [N].

    Routes to the Pallas MXU kernel only when the GEMM is big enough to pay
    for a pallas_call; otherwise XLA's fused dot is faster (perf review).
    """
    M, K = x.shape
    Kw, N = w.shape
    assert K == Kw and b.shape == (N,)
    if M == 0:  # spec's empty-edge case: edge_features.reshape([0, e_dim])
        return jnp.zeros((0, N), jnp.float32)

    big_enough = (M * K * N) >= _PALLAS_MIN_MACS
    if (force_pallas or big_enough) and K <= _MAX_SINGLE_K:
        return _linear_leaky_relu_pallas(x, w, b, negative_slope=negative_slope)

    # TODO(synk): for K > _MAX_SINGLE_K a 3-D (i, j, k) grid accumulating
    # directly into the f32 o_ref would be used; AMPNN's feature widths never
    # reach that regime, so defer to XLA here.
    y = jnp.dot(x.astype(jnp.float32), w.astype(jnp.float32)) + b.astype(jnp.float32)
    return jnp.where(y >= 0.0, y, negative_slope * y)


# ---------------------------------------------------------------------------
# AMPNN forward (default path: position_encoder=None, use_pos=False)
# ---------------------------------------------------------------------------
def ampnn_forward(params, node_features, edge_features, us, vs,
                  matrix_mask_tuple=None):
    assert edge_features.shape[0] == us.shape[0] == vs.shape[0]
    e_dim = params["FC_E_w"].shape[0]
    if edge_features.shape[0] == 0:
        edge_features = edge_features.reshape((0, e_dim))

    # Default path of the spec: pos_features = None, uv_pos_features = None.
    node_h = linear_leaky_relu(node_features, params["FC_N_w"], params["FC_N_b"])
    edge_h = linear_leaky_relu(edge_features, params["FC_E_w"], params["FC_E_b"])

    # Edge-endpoint gathers from the layer loop (node_features[us] / [vs]).
    # Left in plain JAX: a few-KB row gather fused by XLA beats a dedicated
    # pallas_call whose launch overhead dominates.
    u_feat = jnp.take(node_h, us, axis=0)
    v_feat = jnp.take(node_h, vs, axis=0)

    # TODO(synk): per-layer Ms[i]/Us[i] message passing and the final R readout
    # are not translatable: their module definitions are absent from the spec.
    return node_h, edge_h, u_feat, v_feat


if __name__ == "__main__":
    key = jax.random.PRNGKey(0)
    k1, k2, k3, k4, k5, k6, k7, k8, k9 = jax.random.split(key, 9)

    # ---- 1) AMPNN-scale graph (small shapes => size-gated XLA path) ----
    n_nodes, n_edges = 16, 24
    n_dim, e_dim = 32, 16
    h_dim, he_dim = 32, 32

    node_features = jax.random.normal(k1, (n_nodes, n_dim), jnp.float32)
    edge_features = jax.random.normal(k2, (n_edges, e_dim), jnp.float32)
    us = jax.random.randint(k3, (n_edges,), 0, n_nodes)
    vs = jax.random.randint(k4, (n_edges,), 0, n_nodes)

    params = {
        # stored as [in, out] (torch Linear keeps [out, in]; forward is x @ W.T)
        "FC_N_w": jax.random.normal(k5, (n_dim, h_dim), jnp.float32) * 0.1,
        "FC_N_b": jax.random.normal(k6, (h_dim,), jnp.float32) * 0.1,
        "FC_E_w": jax.random.normal(k7, (e_dim, he_dim), jnp.float32) * 0.1,
        "FC_E_b": jax.random.normal(k8, (he_dim,), jnp.float32) * 0.1,
    }

    node_h, edge_h, u_feat, v_feat = ampnn_forward(
        params, node_features, edge_features, us, vs, None)
    jax.block_until_ready((node_h, edge_h, u_feat, v_feat))

    def ref_lin_f32(x, w, b):
        y = jnp.dot(x, w, precision=jax.lax.Precision.HIGHEST) + b
        return jnp.where(y >= 0.0, y, 0.01 * y)

    ref_n = ref_lin_f32(node_features, params["FC_N_w"], params["FC_N_b"])
    ref_e = ref_lin_f32(edge_features, params["FC_E_w"], params["FC_E_b"])
    assert node_h.shape == (n_nodes, h_dim) and node_h.dtype == jnp.float32
    assert edge_h.shape == (n_edges, he_dim) and edge_h.dtype == jnp.float32
    assert u_feat.shape == (n_edges, h_dim) and v_feat.shape == (n_edges, h_dim)
    assert bool(jnp.allclose(node_h, ref_n, rtol=5e-3, atol=5e-3))
    assert bool(jnp.allclose(edge_h, ref_e, rtol=5e-3, atol=5e-3))
    assert bool(jnp.allclose(u_feat, jnp.take(ref_n, us, axis=0),
                             rtol=5e-3, atol=5e-3))

    # ---- 2) Exercise the Pallas MXU kernel at a gate-passing shape ----
    # Ragged M tile (grid_m = 2), full-extent N block, single K block.
    M, K, N = 777, 256, 384
    kx, kw, kb = jax.random.split(k9, 3)
    x_big = jax.random.normal(kx, (M, K), jnp.float32)
    w_big = jax.random.normal(kw, (K, N), jnp.float32) * 0.1
    b_big = jax.random.normal(kb, (N,), jnp.float32) * 0.1

    out_big = linear_leaky_relu(x_big, w_big, b_big, force_pallas=True)
    jax.block_until_ready(out_big)

    # Reference with the kernel's bf16-operand / f32-accumulate numerics.
    yb = jnp.dot(x_big.astype(jnp.bfloat16), w_big.astype(jnp.bfloat16),
                 preferred_element_type=jnp.float32) + b_big
    ref_big = jnp.where(yb >= 0.0, yb, 0.01 * yb)
    assert out_big.shape == (M, N) and out_big.dtype == jnp.float32
    assert bool(jnp.allclose(out_big, ref_big, rtol=2e-3, atol=2e-3))
    # Loose sanity check against full-f32 math (bounds bf16 operand error).
    assert bool(jnp.allclose(out_big, ref_lin_f32(x_big, w_big, b_big),
                             rtol=1e-1, atol=1e-1))

    print("KERNEL_OK")
</pallas_src>

<mosaic_0001>
module attributes {stable_mosaic.version = 11 : i64} {
  func.func @_linear_bias_leaky_relu_kernel(%arg0: i32, %arg1: i32, %arg2: memref<512x256xf32, #tpu.memory_space<vmem>>, %arg3: memref<256x384xbf16, #tpu.memory_space<vmem>>, %arg4: memref<1x384xf32, #tpu.memory_space<vmem>>, %arg5: memref<512x384xf32, #tpu.memory_space<vmem>>) attributes {dimension_semantics = [#tpu.dimension_semantics<parallel>, #tpu.dimension_semantics<parallel>], iteration_bounds = array<i64: 2, 1>, scalar_prefetch = 0 : i64, scratch_operands = 0 : i64, tpu.core_type = #tpu.core_type<tc>, window_params = [{transform_indices = @transform_0, window_bounds = array<i64: 512, 256>}, {transform_indices = @transform_1, window_bounds = array<i64: 256, 384>}, {transform_indices = @transform_2, window_bounds = array<i64: 1, 384>}, {transform_indices = @transform_3, window_bounds = array<i64: 512, 384>}]} {
    %c0 = arith.constant 0 : index
    %c0_0 = arith.constant 0 : index
    %0 = vector.load %arg2[%c0, %c0_0] : memref<512x256xf32, #tpu.memory_space<vmem>>, vector<512x256xf32>
    %1 = arith.truncf %0 : vector<512x256xf32> to vector<512x256xbf16>
    %c0_1 = arith.constant 0 : index
    %c0_2 = arith.constant 0 : index
    %2 = vector.load %arg3[%c0_1, %c0_2] : memref<256x384xbf16, #tpu.memory_space<vmem>>, vector<256x384xbf16>
    %cst = arith.constant dense<0.000000e+00> : vector<512x384xf32>
    %3 = tpu.matmul %1, %2, %cst {dimension_numbers = #tpu.dot_dimension_numbers<[1], [0], [0], [1], [0, 0, 1, 1], [], []>} : vector<512x256xbf16>, vector<256x384xbf16>, vector<512x384xf32> -> vector<512x384xf32>
    %c0_3 = arith.constant 0 : index
    %c0_4 = arith.constant 0 : index
    %4 = vector.load %arg4[%c0_3, %c0_4] : memref<1x384xf32, #tpu.memory_space<vmem>>, vector<1x384xf32>
    %5 = vector.broadcast %4 : vector<1x384xf32> to vector<512x384xf32>
    %6 = arith.addf %3, %5 : vector<512x384xf32>
    %cst_5 = arith.constant 0.000000e+00 : f32
    %7 = vector.broadcast %cst_5 : f32 to vector<512x384xf32>
    %8 = arith.cmpf oge, %6, %7 : vector<512x384xf32>
    %cst_6 = arith.constant 0.00999999977 : f32
    %9 = vector.broadcast %cst_6 : f32 to vector<512x384xf32>
    %10 = arith.mulf %9, %6 : vector<512x384xf32>
    %11 = arith.select %8, %6, %10 : vector<512x384xi1>, vector<512x384xf32>
    %c0_7 = arith.constant 0 : index
    %c0_8 = arith.constant 0 : index
    %12 = vector.load %arg5[%c0_7, %c0_8] : memref<512x384xf32, #tpu.memory_space<vmem>>, vector<512x384xf32>
    tpu.vector_store %arg5[%c0_7, %c0_8], %11 {strides = array<i32>} : memref<512x384xf32, #tpu.memory_space<vmem>>, vector<512x384xf32>,
    return
  }
  func.func @transform_0(%arg0: i32, %arg1: i32) -> (i32, i32) {
    %c0_i32 = arith.constant 0 : i32
    %c0_i32_0 = arith.constant 0 : i32
    return %arg0, %c0_i32 : i32, i32
  }
  func.func @transform_1(%arg0: i32, %arg1: i32) -> (i32, i32) {
    %c0_i32 = arith.constant 0 : i32
    %c0_i32_0 = arith.constant 0 : i32
    return %c0_i32, %arg1 : i32, i32
  }
  func.func @transform_2(%arg0: i32, %arg1: i32) -> (i32, i32) {
    %c0_i32 = arith.constant 0 : i32
    %c0_i32_0 = arith.constant 0 : i32
    return %c0_i32, %arg1 : i32, i32
  }
  func.func @transform_3(%arg0: i32, %arg1: i32) -> (i32, i32) {
    %c0_i32 = arith.constant 0 : i32
    return %arg0, %arg1 : i32, i32
  }
}

</mosaic_0001>

<bundles_post_ra>
// kernel: tpu_custom_call.1
= control target key start
LH: loop header
LB: loop body
LE: loop exit
PB: predicated region body
PF: predicated region fallthrough
CT: control target
= control target key end

     0   :  { %8 = vsyncpa [#allocation3], 0  ;;  %s4365_s0 = inlined_call_operand.hbm [shape: f32[777,256], index: 0, kind: input, shape index: {}]   ;;  %s4366_s1 = inlined_call_operand.hbm [shape: bf16[256,384], index: 1, kind: input, shape index: {}]   ;;  %s4367_s2 = inlined_call_operand.hbm [shape: f32[1,384], index: 2, kind: input, shape index: {}]   ;;  %s4368_s3 = inlined_call_operand.hbm [shape: f32[777,384], index: 3, kind: output, shape index: {}]  }
   0x1   :  { %10 = vsyncpa [#allocation3 + $0x1], 0 }
   0x2   :  { %11 = vsyncpa [#allocation6], 0 }
   0x3   :  { %12 = vsyncpa [#allocation4], 0 }
   0x4   :  { %14 = vsyncpa [#allocation4 + $0x1], 0  ;;  %s3311_s12 = smov 0   ;;  %s3313_s13 = smov 0  }
   0x5   :  { %s3315_s14 = smov 0   ;;  %s3317_s15 = smov 0  }
   0x6   :  { %s3319_s16 = smov 0   ;;  %s3321_s17 = smov 0  }
   0x7 LB: > { %s2711_s18 = sadd.s32 4294967295, %s3279_s17   ;;  %s2712_s19 = sadd.s32 4294967294, %s3279_s17   ;;  %s3279_s17 = sphi %s3321_s17, %s20_s17   ;;  %s3275_s16 = sphi %s3319_s16, %s4461_s16   ;;  %s3271_s15 = sphi %s3317_s15, %s4460_s15   ;;  %s3267_s14 = sphi %s3315_s14, %s4459_s14   ;;  %s3263_s13 = sphi %s3313_s13, %s4458_s13   ;;  %s3259_s12 = sphi %s3311_s12, %s4457_s12  }
   0x8   : > { %s32_s20 = sadd.s32 1, %s3275_s16  ;;  %s39_s21 = sadd.s32 1, %s3267_s14 }
   0x9   : > { %p34_p0 = scmp.ge.s32.totalorder %s32_s20, 2  ;;  %p46_p1 = scmp.ne.s32.totalorder %s3267_s14, %s3263_s13 }
   0xa   : > { %p47_p2 = scmp.eq.s32.totalorder %s3279_s17, 0  ;;  %p52_p3 = scmp.ne.s32.totalorder %s3263_s13, %s3259_s12 }
   0xb   : > { %s4463_s20 = smov (%p34_p0, %s32_s20), 0  ;;  %p3356_p5 = scmp.eq.s32.totalorder %s2711_s18, 0 }
   0xc   : > { %p3352_p4 = por %p47_p2, %p46_p1  ;;  %s36_s24 = ssub.s32 %s3275_s16, %s4463_s20 }
   0xd   : > { %p130_p6 = scmp.eq.s32.totalorder %s2711_s18, 1  ;;  %p37_p7 = scmp.eq.s32.totalorder %s36_s24, 0 }
   0xe   : > { %p3364_p8 = por %p3356_p5, %p52_p3  ;;  %p136_p10 = scmp.eq.s32.totalorder %s2712_s19, 1 }
   0xf   : > { %p3368_p9 = por %p130_p6, %p46_p1  ;;  %p2713_p12 = scmp.ge.s32.totalorder %s3279_s17, 1 }
  0x10   : > { %s3373_s27 = scalar_select %p37_p7, %s3267_s14, %s39_s21  }
  0x11   : > { %p3375_p11 = por %p136_p10, %p52_p3  ;;  %p143_p13 = scmp.lt.s32.totalorder %s3279_s17, 3 }
  0x12   : > { %s157_s4 = sshll.u32 %s4366_s1, 4  ;;  %s3281_s6 = smov [#allocation5]   ;;  %s158_s4 = int_to_ptr.hbm [resolvable:$true] %s157_s4 }
  0x13   : > { %p3384_p0 = pnand %p2713_p12, %p143_p13  ;;  %s159_s7 = sshll.u32 %s3281_s6, 4  ;;  %s160_s7 = int_to_ptr.vmem [resolvable:$true] %s159_s7 }
  0x14   : > { %s174_s10 = sshll.u32 %s4367_s2, 4  ;;  %s3282_s11 = smov [#allocation7]   ;;  %s175_s10 = int_to_ptr.hbm [resolvable:$true] %s174_s10 }
  0x15   : > { %p3010_p1 = pneg %p3384_p0  ;;  %s176_s18 = sshll.u32 %s3282_s11, 4  ;;  %s177_s18 = int_to_ptr.vmem [resolvable:$true] %s176_s18 }
  0x16   : > { %s3283_s19 = smov 192   ;;  %s3284_s21 = smov 12  }
  0x17   : > { %p3011_p2 = pnand %p3010_p1, %p3356_p5  ;;  %p4369_p3 = scmp.ge.s32.totalorder %s3279_s17, 2 }
  0x19   : > { %3013 = dma.hbm_to_vmem [thread:$0]  (!%p3011_p2), %s158_s4, 6144, %s160_s7, [#allocation6], %s3283_s19, %s3283_s19, %s3284_s21  }
  0x1a   : > { %3016 = dma.hbm_to_vmem [thread:$0]  (!%p3011_p2), %s175_s10, 48, %s177_s18, [#allocation6]  }
  0x1b   : > { %183 = sbr.rel (%p4369_p3) target bundleno = 69 (0x45), region = 24 }
  0x20   : > { %186 = sbr.rel (!%p3352_p4) target bundleno = 69 (0x45), region = 28  ;;  %s187_s24 = sand.u32 (%p3352_p4), 1, %s3267_s14  }
  0x21   : > { %s2718_s29 = sshll.u32 (%p3352_p4), %s3275_s16, 6  ;;  %s2717_s30 = sshll.u32 (%p3352_p4), %s187_s24, 10 }
  0x22   : > { %s193_s6 = ssub.s32 (%p3352_p4), 98, %s2718_s29  ;;  %s3405_s9 = scalar_lea.sflag (%p3352_p4), [#allocation3], %s187_s24 }
  0x23   : > { %p194_p6 = scmp.lt.s32.totalorder (%p3352_p4), %s193_s6, 64  ;;  %s191_s10 = scalar_lea.vmem (%p3352_p4), [#allocation2], %s2717_s30 }
  0x25   : > { %s4465_s6 = smov (!%p194_p6, %s193_s6), 64 }
  0x26   : > { %s2931_s4 = sshll.u32 %s4465_s6, 4 }
  0x27   : > { %s198_s7 = ssub.s32 1024, %s2931_s4 }
  0x28   : > { %s199_s8 = sshll.u32 %s198_s7, 4 }
  0x29   : > { %200 = vsyncadd %s3405_s9, %s199_s8  ;;  %p3408_p4 = scmp.ne.s32.totalorder %s2931_s4, 0  ;;  %s2933_s11 = sshll.u32 %s3275_s16, 10 }
  0x2a   : > { %s204_s21 = scalar_lea.hbm %s4365_s0, %s2933_s11  ;;  %s3416_s29 = sshll.u32 %s191_s10, 4  ;;  %s209_s29 = int_to_ptr.vmem [resolvable:$true] %s3416_s29 }
  0x2b   : > { %s206_s24 = sshll.u32 %s204_s21, 4  ;;  %s4370_s30 = sshll.u32 %s4465_s6, 8  ;;  %s3419_s24 = int_to_ptr.hbm [resolvable:$true] %s206_s24 }
  0x2c   : > { %s3143_s7 = sshra.s32 %s3419_s24, 4  ;;  %s3145_s4 = sshrl.u32 %s4370_s30, 4  ;;  %s3144_s7 = int_to_ptr.hbm [resolvable:$true] %s3143_s7 }
  0x2d   : > { %s3150_s8 = scalar_lea.hbm %s3144_s7, %s3145_s4  ;;  %s3154_s10 = scalar_lea.hbm %s4365_s0, 1568 }
  0x2e   : > { %p3151_p7 = scmp.ne.s32.totalorder %s3144_s7, %s3150_s8  ;;  %p3156_p13 = scmp.lt.s32.totalorder %s3154_s10, %s3150_s8 }
  0x30   : > { %p3152_p10 = pnand %p3151_p7, %p3408_p4 }
  0x32   : > { %p3153_p12 = pneg %p3152_p10 }
  0x34   : > { %p3158_p1 = pnand %p3156_p13, %p3153_p12 }
  0x36   : > { %3161 = shalt.err (!%p3158_p1)
}
  0x37   : > { %s3162_s19 = sshra.s32 %s209_s29, 4  ;;  %s3285_s7 = smov [#allocation2]   ;;  %s3163_s19 = int_to_ptr.vmem [resolvable:$true] %s3162_s19 }
  0x38   : > { %s3169_s21 = scalar_lea.vmem %s3163_s19, %s3145_s4  ;;  %s3173_s30 = scalar_lea.vmem %s3285_s7, 2048 }
  0x39   : > { %p3170_p2 = scmp.ne.s32.totalorder %s3163_s19, %s3169_s21  ;;  %p3175_p7 = scmp.lt.s32.totalorder %s3173_s30, %s3169_s21 }
  0x3b   : > { %p3171_p6 = pnand %p3170_p2, %p3408_p4 }
  0x3d   : > { %p3172_p3 = pneg %p3171_p6 }
  0x3f   : > { %p3177_p10 = pnand %p3175_p7, %p3172_p3 }
  0x41   : > { %3180 = shalt.err (!%p3177_p10)
}
  0x42   : > { %s3286_s18 = smov 256   ;;  %s3287_s8 = smov 16  }
  0x43   : > { %s4416_s11 = sshll.u32 %s4465_s6, 8 }
  0x44   : > { %214 = dma.hbm_to_vmem [thread:$0]  (%p3408_p4), %s3419_s24, %s4416_s11, %s209_s29, %s3405_s9, %s3286_s18, %s3286_s18, %s3287_s8  }
  0x45 PF: > { %220 = sbr.rel (%p3384_p0) target bundleno = 1051 (0x41b), region = 32 }
  0x4a   : > { %s3445_s30 = sand.u32 1, %s3263_s13  }
  0x4b   : > { %s2727_s4 = sshll.u32 %s3445_s30, 10  ;;  %s223_s10 = scalar_lea.sflag [#allocation3], %s3445_s30 }
  0x4c   : > { %s3449_s19 = scalar_lea.vmem [#allocation2], %s2727_s4 }
  0x4d   : > { %3246 = dma.done.wait (%p3364_p8), %s223_s10, 16384  }
  0x4e   : > { %3248 = vsyncadd (%p3364_p8), %s223_s10, 4294950912 }
  0x4f   : > { %3250 = dma.done.wait (%p3356_p5), [#allocation6], 6192  }
  0x50   : > { %3252 = vsyncadd (%p3356_p5), [#allocation6], 4294961104  ;;  %v2816_v0 = vld [vmem:[#allocation5 + $0xa8] sm:$0xf]  ;;  %v2956_v1 = vld [vmem:[#allocation5 + $0xb0] sm:$0xf0] }
  0x51   : > { %v2912_v2 = vld [vmem:[#allocation5 + $0x168] sm:$0xf]  ;;  %v2817_v3 = vor.u32 %v2956_v1, %v2816_v0  ;;  %v2980_v4 = vld [vmem:[#allocation5 + $0x170] sm:$0xf0]  ;;  %v2804_v5 = vld [vmem:[#allocation5 + $0x90] sm:$0xf] }
  0x52   : > { %v2953_v6 = vld [vmem:[#allocation5 + $0x98] sm:$0xf0]  ;;  %v2913_v7 = vor.u32 %v2980_v4, %v2912_v2  ;;  %v2900_v8 = vld [vmem:[#allocation5 + $0x150] sm:$0xf]  ;;  %v2792_v12 = vld [vmem:[#allocation5 + $0x78] sm:$0xf] }
  0x53   : > { %v2977_v9 = vld [vmem:[#allocation5 + $0x158] sm:$0xf0]  ;;  %795 = vmatpush.bf16.msra.mxu0 %v2817_v3  ;;  %2982 = vmatpush.bf16.msra.mxu2 %v2817_v3  ;;  %v2805_v10 = vor.u32 %v2953_v6, %v2804_v5  ;;  %v2950_v13 = vld [vmem:[#allocation5 + $0x80] sm:$0xf0]  ;;  %v2888_v14 = vld [vmem:[#allocation5 + $0x138] sm:$0xf] }
  0x54   : > { %964 = vmatpush.bf16.msra.mxu1 %v2913_v7  ;;  %2990 = vmatpush.bf16.msra.mxu3 %v2913_v7  ;;  %v2901_v11 = vor.u32 %v2977_v9, %v2900_v8  ;;  %v2974_v15 = vld [vmem:[#allocation5 + $0x140] sm:$0xf0]  ;;  %v2793_v16 = vor.u32 %v2950_v13, %v2792_v12  ;;  %v2780_v18 = vld [vmem:[#allocation5 + $0x60] sm:$0xf]  ;;  %v2947_v19 = vld [vmem:[#allocation5 + $0x68] sm:$0xf0] }
  0x55   : > { %v2889_v17 = vor.u32 %v2974_v15, %v2888_v14  ;;  %v2876_v20 = vld [vmem:[#allocation5 + $0x120] sm:$0xf]  ;;  %v2971_v21 = vld [vmem:[#allocation5 + $0x128] sm:$0xf0]  ;;  %v2781_v22 = vor.u32 %v2947_v19, %v2780_v18  ;;  %v2768_v24 = vld [vmem:[#allocation5 + $0x48] sm:$0xf] }
  0x56   : > { %v2877_v23 = vor.u32 %v2971_v21, %v2876_v20  ;;  %v2944_v25 = vld [vmem:[#allocation5 + $0x50] sm:$0xf0]  ;;  %v2864_v26 = vld [vmem:[#allocation5 + $0x108] sm:$0xf]  ;;  %v2756_v30 = vld [vmem:[#allocation5 + $0x30] sm:$0xf] }
  0x57   : > { %796 = vmatpush.bf16.msra.mxu0 %v2805_v10  ;;  %2983 = vmatpush.bf16.msra.mxu2 %v2805_v10  ;;  %v2968_v27 = vld [vmem:[#allocation5 + $0x110] sm:$0xf0]  ;;  %v2769_v28 = vor.u32 %v2944_v25, %v2768_v24  ;;  %v2941_v31 = vld [vmem:[#allocation5 + $0x38] sm:$0xf0]  ;;  %v2852_v32 = vld [vmem:[#allocation5 + $0xf0] sm:$0xf] }
  0x58   : > { %965 = vmatpush.bf16.msra.mxu1 %v2901_v11  ;;  %2991 = vmatpush.bf16.msra.mxu3 %v2901_v11  ;;  %v2865_v29 = vor.u32 %v2968_v27, %v2864_v26  ;;  %v2965_v33 = vld [vmem:[#allocation5 + $0xf8] sm:$0xf0]  ;;  %v2757_v34 = vor.u32 %v2941_v31, %v2756_v30  ;;  %v2744_v36 = vld [vmem:[#allocation5 + $0x18] sm:$0xf]  ;;  %v2938_v37 = vld [vmem:[#allocation5 + $0x20] sm:$0xf0] }
  0x59   : > { %v2853_v35 = vor.u32 %v2965_v33, %v2852_v32  ;;  %v2840_v38 = vld [vmem:[#allocation5 + $0xd8] sm:$0xf]  ;;  %v2962_v39 = vld [vmem:[#allocation5 + $0xe0] sm:$0xf0]  ;;  %v2745_v40 = vor.u32 %v2938_v37, %v2744_v36  ;;  %v2732_v41 = vld [vmem:[#allocation5] sm:$0xf] }
  0x5a   : > { %v2841_v42 = vor.u32 %v2962_v39, %v2840_v38  ;;  %v2935_v43 = vld [vmem:[#allocation5 + $0x8] sm:$0xf0]  ;;  %v2828_v44 = vld [vmem:[#allocation5 + $0xc0] sm:$0xf]  ;;  %v277_v47 = vld [vmem:[%s3449_s19 + $0x10] sm:$0xff]  ;;  %s2998_s23 = smul.u32 1536, %s3445_s30 }
  0x5b   : > { %797 = vmatpush.bf16.msra.mxu0 %v2793_v16  ;;  %2984 = vmatpush.bf16.msra.mxu2 %v2793_v16  ;;  %v2959_v45 = vld [vmem:[#allocation5 + $0xc8] sm:$0xf0]  ;;  %v275_v46 = vld [vmem:[%s3449_s19] sm:$0xff]  ;;  %v2818_v50 = vld [vmem:[#allocation5 + $0xb4] sm:$0xf0]  ;;  %v2733_v53 = vor.u32 %v2935_v43, %v2732_v41  ;;  %s2578_s5 = scalar_lea.sflag [#allocation4], %s3445_s30 }
  0x5c   : > { %966 = vmatpush.bf16.msra.mxu1 %v2889_v17  ;;  %2992 = vmatpush.bf16.msra.mxu3 %v2889_v17  ;;  %v339_v48 = vld [vmem:[%s3449_s19 + $0x200] sm:$0xff]  ;;  %v2955_v49 = vld [vmem:[#allocation5 + $0xac] sm:$0xf]  ;;  %v2914_v52 = vld [vmem:[#allocation5 + $0x174] sm:$0xf0]  ;;  %v2829_v57 = vor.u32 %v2959_v45, %v2828_v44  ;;  %v3467_v2 = vpack.c.bf16 %v277_v47, %v275_v46  ;;  %s3644_s25 = scalar_lea.vmem [#allocation8], %s2998_s23 }
  0x5d   : > { %v2979_v51 = vld [vmem:[#allocation5 + $0x16c] sm:$0xf]  ;;  %v341_v54 = vld [vmem:[%s3449_s19 + $0x210] sm:$0xff]  ;;  %v278_v56 = vld [vmem:[%s3449_s19 + $0x18] sm:$0xff]  ;;  %v2821_v61 = vor.u32 %v2955_v49, %v2818_v50  ;;  %s2922_s6 = sshll.u32 (%p3368_p9), %s3271_s15, 6 }
  0x5e   : > { %v276_v55 = vld [vmem:[%s3449_s19 + $0x8] sm:$0xff]  ;;  %v342_v59 = vld [vmem:[%s3449_s19 + $0x218] sm:$0xff]  ;;  %v2824_v60 = vld [vmem:[#allocation5 + $0xb0] sm:$0xf]  ;;  %v2917_v62 = vor.u32 %v2979_v51, %v2914_v52  ;;  %v3469_v3 = vpack.c.bf16 %v341_v54, %v339_v48  ;;  %s2587_s9 = ssub.s32 (%p3368_p9), 98, %s2922_s6 }
  0x5f   : > { %798 = vmatpush.bf16.msra.mxu0 %v2781_v22  ;;  %2985 = vmatpush.bf16.msra.mxu2 %v2781_v22  ;;  %v340_v58 = vld [vmem:[%s3449_s19 + $0x208] sm:$0xff]  ;;  %v2957_v63 = vld [vmem:[#allocation5 + $0xb8] sm:$0xf0]  ;;  %v2920_v0 = vld [vmem:[#allocation5 + $0x170] sm:$0xf]  ;;  %v3471_v4 = vpack.c.bf16 %v278_v56, %v276_v55  ;;  %p2588_p5 = scmp.lt.s32.totalorder (%p3368_p9), %s2587_s9, 64 }
  0x60   : > { %967 = vmatpush.bf16.msra.mxu1 %v2877_v23  ;;  %2993 = vmatpush.bf16.msra.mxu3 %v2877_v23  ;;  %v2981_v1 = vld [vmem:[#allocation5 + $0x178] sm:$0xf0]  ;;  %v3473_v5 = vpack.c.bf16 %v342_v59, %v340_v58  ;;  %v2825_v6 = vor.u32 %v2957_v63, %v2824_v60  ;;  %v2952_v8 = vld [vmem:[#allocation5 + $0x94] sm:$0xf]  ;;  %v2806_v9 = vld [vmem:[#allocation5 + $0x9c] sm:$0xf0] }
  0x61   : > { %v2921_v7 = vor.u32 %v2981_v1, %v2920_v0  ;;  %v2976_v10 = vld [vmem:[#allocation5 + $0x154] sm:$0xf]  ;;  %v2809_v11 = vor.u32 %v2952_v8, %v2806_v9  ;;  %v2902_v12 = vld [vmem:[#allocation5 + $0x15c] sm:$0xf0]  ;;  %v2812_v13 = vld [vmem:[#allocation5 + $0x98] sm:$0xf] }
  0x62   : > { %v2954_v14 = vld [vmem:[#allocation5 + $0xa0] sm:$0xf0]  ;;  %v2905_v15 = vor.u32 %v2976_v10, %v2902_v12  ;;  %v2908_v17 = vld [vmem:[#allocation5 + $0x158] sm:$0xf]  ;;  %v281_v21 = vld [vmem:[%s3449_s19 + $0x30] sm:$0xff] }
  0x63   : > { %799 = vmatpush.bf16.msra.mxu0 %v2769_v28  ;;  %2986 = vmatpush.bf16.msra.mxu2 %v2769_v28  ;;  %v2813_v16 = vor.u32 %v2954_v14, %v2812_v13  ;;  %v2978_v18 = vld [vmem:[#allocation5 + $0x160] sm:$0xf0]  ;;  %v345_v23 = vld [vmem:[%s3449_s19 + $0x230] sm:$0xff]  ;;  %v280_v24 = vld [vmem:[%s3449_s19 + $0x28] sm:$0xff] }
  0x64   : > { %968 = vmatpush.bf16.msra.mxu1 %v2865_v29  ;;  %2994 = vmatpush.bf16.msra.mxu3 %v2865_v29  ;;  %v2909_v19 = vor.u32 %v2978_v18, %v2908_v17  ;;  %v279_v20 = vld [vmem:[%s3449_s19 + $0x20] sm:$0xff]  ;;  %v282_v25 = vld [vmem:[%s3449_s19 + $0x38] sm:$0xff]  ;;  %v344_v26 = vld [vmem:[%s3449_s19 + $0x228] sm:$0xff] }
  0x65   : > { %v343_v22 = vld [vmem:[%s3449_s19 + $0x220] sm:$0xff]  ;;  %v346_v27 = vld [vmem:[%s3449_s19 + $0x238] sm:$0xff]  ;;  %v3487_v28 = vpack.c.bf16 %v281_v21, %v279_v20  ;;  %v3491_v30 = vpack.c.bf16 %v282_v25, %v280_v24  ;;  %v285_v33 = vld [vmem:[%s3449_s19 + $0x50] sm:$0xff] }
  0x66   : > { %v3489_v29 = vpack.c.bf16 %v345_v23, %v343_v22  ;;  %v3493_v31 = vpack.c.bf16 %v346_v27, %v344_v26  ;;  %v283_v32 = vld [vmem:[%s3449_s19 + $0x40] sm:$0xff]  ;;  %v284_v36 = vld [vmem:[%s3449_s19 + $0x48] sm:$0xff]  ;;  %v286_v37 = vld [vmem:[%s3449_s19 + $0x58] sm:$0xff] }
  0x67   : > { %800 = vmatpush.bf16.msra.mxu0 %v2757_v34  ;;  %2987 = vmatpush.bf16.msra.mxu2 %v2757_v34  ;;  %v347_v34 = vld [vmem:[%s3449_s19 + $0x240] sm:$0xff]  ;;  %v348_v38 = vld [vmem:[%s3449_s19 + $0x248] sm:$0xff]  ;;  %v350_v39 = vld [vmem:[%s3449_s19 + $0x258] sm:$0xff] }
  0x68   : > { %969 = vmatpush.bf16.msra.mxu1 %v2853_v35  ;;  %2995 = vmatpush.bf16.msra.mxu3 %v2853_v35  ;;  %v349_v35 = vld [vmem:[%s3449_s19 + $0x250] sm:$0xff]  ;;  %v3513_v43 = vpack.c.bf16 %v350_v39, %v348_v38  ;;  %v2949_v44 = vld [vmem:[#allocation5 + $0x7c] sm:$0xf]  ;;  %v2794_v45 = vld [vmem:[#allocation5 + $0x84] sm:$0xf0] }
  0x69   : > { %v3509_v41 = vpack.c.bf16 %v349_v35, %v347_v34  ;;  %v2973_v46 = vld [vmem:[#allocation5 + $0x13c] sm:$0xf]  ;;  %v2797_v47 = vor.u32 %v2949_v44, %v2794_v45  ;;  %v2890_v48 = vld [vmem:[#allocation5 + $0x144] sm:$0xf0]  ;;  %v2800_v49 = vld [vmem:[#allocation5 + $0x80] sm:$0xf] }
  0x6a   : > { %v2951_v50 = vld [vmem:[#allocation5 + $0x88] sm:$0xf0]  ;;  %v2893_v51 = vor.u32 %v2973_v46, %v2890_v48  ;;  %v287_v56 = vld [vmem:[%s3449_s19 + $0x60] sm:$0xff]  ;;  %v353_v59 = vld [vmem:[%s3449_s19 + $0x270] sm:$0xff] }
  0x6b   : > { %801 = vmatpush.bf16.msra.mxu0 %v2745_v40  ;;  %2988 = vmatpush.bf16.msra.mxu2 %v2745_v40  ;;  %v3507_v40 = vpack.c.bf16 %v285_v33, %v283_v32  ;;  %v2801_v52 = vor.u32 %v2951_v50, %v2800_v49  ;;  %v2975_v54 = vld [vmem:[#allocation5 + $0x148] sm:$0xf0]  ;;  %v351_v58 = vld [vmem:[%s3449_s19 + $0x260] sm:$0xff]  ;;  %v354_v63 = vld [vmem:[%s3449_s19 + $0x278] sm:$0xff] }
  0x6c   : > { %970 = vmatpush.bf16.msra.mxu1 %v2841_v42  ;;  %2996 = vmatpush.bf16.msra.mxu3 %v2841_v42  ;;  %v3511_v42 = vpack.c.bf16 %v286_v37, %v284_v36  ;;  %v288_v60 = vld [vmem:[%s3449_s19 + $0x68] sm:$0xff]  ;;  %v3529_v1 = vpack.c.bf16 %v353_v59, %v351_v58  ;;  %v291_v8 = vld [vmem:[%s3449_s19 + $0x80] sm:$0xff]  ;;  %v293_v9 = vld [vmem:[%s3449_s19 + $0x90] sm:$0xff] }
  0x6d   : > { %v355_v10 = vld [vmem:[%s3449_s19 + $0x280] sm:$0xff]  ;;  %v292_v12 = vld [vmem:[%s3449_s19 + $0x88] sm:$0xff]  ;;  %v294_v13 = vld [vmem:[%s3449_s19 + $0x98] sm:$0xff] }
  0x6e   : > { %v356_v14 = vld [vmem:[%s3449_s19 + $0x288] sm:$0xff]  ;;  %v3551_v18 = vpack.c.bf16 %v294_v13, %v292_v12  ;;  %v2946_v20 = vld [vmem:[#allocation5 + $0x64] sm:$0xf]  ;;  %v2782_v21 = vld [vmem:[#allocation5 + $0x6c] sm:$0xf0] }
  0x6f   : > { %802 = vmatpush.bf16.msra.mxu0 %v2733_v53  ;;  %2989 = vmatpush.bf16.msra.mxu2 %v2733_v53  ;;  %v2896_v53 = vld [vmem:[#allocation5 + $0x140] sm:$0xf]  ;;  %v2970_v22 = vld [vmem:[#allocation5 + $0x124] sm:$0xf]  ;;  %v2785_v23 = vor.u32 %v2946_v20, %v2782_v21  ;;  %v2878_v24 = vld [vmem:[#allocation5 + $0x12c] sm:$0xf0] }
  0x70   : > { %971 = vmatpush.bf16.msra.mxu1 %v2829_v57  ;;  %2997 = vmatpush.bf16.msra.mxu3 %v2829_v57  ;;  %v2897_v55 = vor.u32 %v2975_v54, %v2896_v53  ;;  %v289_v57 = vld [vmem:[%s3449_s19 + $0x70] sm:$0xff]  ;;  %v2788_v25 = vld [vmem:[#allocation5 + $0x68] sm:$0xf]  ;;  %v2881_v27 = vor.u32 %v2970_v22, %v2878_v24  ;;  %v295_v36 = vld [vmem:[%s3449_s19 + $0xa0] sm:$0xff] }
  0x71   : > { %v3527_v0 = vpack.c.bf16 %v289_v57, %v287_v56  ;;  %v2948_v26 = vld [vmem:[#allocation5 + $0x70] sm:$0xf0]  ;;  %v2884_v33 = vld [vmem:[#allocation5 + $0x128] sm:$0xf]  ;;  %v359_v38 = vld [vmem:[%s3449_s19 + $0x2a0] sm:$0xff] }
  0x72   : > { %803 = vmatmul.bf16.vlgmr.msra.gmra.mxu0 %v3467_v2  ;;  %883 = vmatmul.bf16.vlgmr.msra.gmra.mxu2 %v3469_v3  ;;  %v2789_v32 = vor.u32 %v2948_v26, %v2788_v25  ;;  %v2972_v34 = vld [vmem:[#allocation5 + $0x130] sm:$0xf0]  ;;  %v296_v44 = vld [vmem:[%s3449_s19 + $0xa8] sm:$0xff]  ;;  %v298_v45 = vld [vmem:[%s3449_s19 + $0xb8] sm:$0xff] }
  0x73   : > { %1133 = vmatpush.bf16.msrb.mxu2 %v2821_v61  ;;  %972 = vmatmul.bf16.vlgmr.msra.gmra.mxu1 %v3471_v4  ;;  %v290_v61 = vld [vmem:[%s3449_s19 + $0x78] sm:$0xff]  ;;  %v2885_v35 = vor.u32 %v2972_v34, %v2884_v33  ;;  %v297_v37 = vld [vmem:[%s3449_s19 + $0xb0] sm:$0xff]  ;;  %v360_v46 = vld [vmem:[%s3449_s19 + $0x2a8] sm:$0xff]  ;;  %v3571_v50 = vpack.c.bf16 %v298_v45, %v296_v44 }
  0x74   : > { %1302 = vmatpush.bf16.msrb.mxu3 %v2917_v62  ;;  %1471 = vmatpush.bf16.msrb.mxu0 %v2825_v6  ;;  %v352_v62 = vld [vmem:[%s3449_s19 + $0x268] sm:$0xff]  ;;  %v3531_v6 = vpack.c.bf16 %v290_v61, %v288_v60  ;;  %v361_v39 = vld [vmem:[%s3449_s19 + $0x2b0] sm:$0xff]  ;;  %v3567_v48 = vpack.c.bf16 %v297_v37, %v295_v36  ;;  %v363_v54 = vld [vmem:[%s3449_s19 + $0x2c0] sm:$0xff] }
  0x75   : > { %1052 = vmatmul.bf16.vlgmr.msra.gmra.mxu3 %v3473_v5  ;;  %1640 = vmatpush.bf16.msrb.mxu1 %v2921_v7  ;;  %v3533_v7 = vpack.c.bf16 %v354_v63, %v352_v62  ;;  %v3569_v49 = vpack.c.bf16 %v361_v39, %v359_v38  ;;  %v301_v53 = vld [vmem:[%s3449_s19 + $0xd0] sm:$0xff]  ;;  %v300_v56 = vld [vmem:[%s3449_s19 + $0xc8] sm:$0xff]  ;;  %v302_v57 = vld [vmem:[%s3449_s19 + $0xd8] sm:$0xff] }
  0x76   : > { %v364_v58 = vld [vmem:[%s3449_s19 + $0x2c8] sm:$0xff]  ;;  %v366_v59 = vld [vmem:[%s3449_s19 + $0x2d8] sm:$0xff]  ;;  %v3591_v62 = vpack.c.bf16 %v302_v57, %v300_v56  ;;  %v367_v20 = vld [vmem:[%s3449_s19 + $0x2e0] sm:$0xff] }
  0x77   : > { %1134 = vmatpush.bf16.msrb.mxu2 %v2809_v11  ;;  %v357_v11 = vld [vmem:[%s3449_s19 + $0x290] sm:$0xff]  ;;  %v3593_v63 = vpack.c.bf16 %v366_v59, %v364_v58  ;;  %v2866_v12 = vld [vmem:[#allocation5 + $0x114] sm:$0xf0]  ;;  %v304_v22 = vld [vmem:[%s3449_s19 + $0xe8] sm:$0xff] }
  0x78   : > { %1303 = vmatpush.bf16.msrb.mxu3 %v2905_v15  ;;  %1472 = vmatpush.bf16.msrb.mxu0 %v2813_v16  ;;  %v358_v15 = vld [vmem:[%s3449_s19 + $0x298] sm:$0xff]  ;;  %v3547_v16 = vpack.c.bf16 %v293_v9, %v291_v8  ;;  %v3549_v17 = vpack.c.bf16 %v357_v11, %v355_v10  ;;  %v2943_v8 = vld [vmem:[#allocation5 + $0x4c] sm:$0xf]  ;;  %v369_v21 = vld [vmem:[%s3449_s19 + $0x2f0] sm:$0xff] }
  0x79   : > { %1641 = vmatpush.bf16.msrb.mxu1 %v2909_v19  ;;  %v3553_v19 = vpack.c.bf16 %v358_v15, %v356_v14  ;;  %4419 = vst [vmem:[#allocation14_spill] sm:$0xff] %v3593_v63  ;;  %v2770_v9 = vld [vmem:[#allocation5 + $0x54] sm:$0xf0]  ;;  %v2967_v10 = vld [vmem:[#allocation5 + $0x10c] sm:$0xf]  ;;  %v303_v14 = vld [vmem:[%s3449_s19 + $0xe0] sm:$0xff] }
  0x7a   : > { %v2773_v11 = vor.u32 %v2943_v8, %v2770_v9  ;;  %v2869_v13 = vor.u32 %v2967_v10, %v2866_v12  ;;  %v305_v15 = vld [vmem:[%s3449_s19 + $0xf0] sm:$0xff]  ;;  %v368_v24 = vld [vmem:[%s3449_s19 + $0x2e8] sm:$0xff]  ;;  %v370_v25 = vld [vmem:[%s3449_s19 + $0x2f8] sm:$0xff] }
  0x7b   : > { %1135 = vmatpush.bf16.msrb.mxu2 %v2797_v47  ;;  %v362_v47 = vld [vmem:[%s3449_s19 + $0x2b8] sm:$0xff]  ;;  %v3607_v26 = vpack.c.bf16 %v305_v15, %v303_v14  ;;  %v3613_v33 = vpack.c.bf16 %v370_v25, %v368_v24  ;;  %v2776_v34 = vld [vmem:[#allocation5 + $0x50] sm:$0xf]  ;;  %v531_v44 = vld [vmem:[#allocation7] sm:$0x7] }
  0x7c   : > { %1304 = vmatpush.bf16.msrb.mxu3 %v2893_v51  ;;  %1473 = vmatpush.bf16.msrb.mxu0 %v2801_v52  ;;  %v3573_v51 = vpack.c.bf16 %v362_v47, %v360_v46  ;;  %v299_v52 = vld [vmem:[%s3449_s19 + $0xc0] sm:$0xff]  ;;  %v2872_v36 = vld [vmem:[#allocation5 + $0x110] sm:$0xf]  ;;  %v2969_v38 = vld [vmem:[#allocation5 + $0x118] sm:$0xf0] }
  0x7d   : > { %1642 = vmatpush.bf16.msrb.mxu1 %v2897_v55  ;;  %v365_v55 = vld [vmem:[%s3449_s19 + $0x2d0] sm:$0xff]  ;;  %v3587_v60 = vpack.c.bf16 %v301_v53, %v299_v52  ;;  %4421 = vst [vmem:[#allocation16_spill] sm:$0xff] %v3613_v33  ;;  %v2873_v39 = vor.u32 %v2969_v38, %v2872_v36  ;;  %v307_v45 = vld [vmem:[%s3449_s19 + $0x100] sm:$0xff]  ;;  %v308_v53 = vld [vmem:[%s3449_s19 + $0x108] sm:$0xff] }
  0x7e   : > { %4417 = vst [vmem:[#allocation12_spill] sm:$0xff] %v3573_v51  ;;  %v3589_v61 = vpack.c.bf16 %v365_v55, %v363_v54  ;;  %v309_v46 = vld [vmem:[%s3449_s19 + $0x110] sm:$0xff]  ;;  %v371_v47 = vld [vmem:[%s3449_s19 + $0x300] sm:$0xff]  ;;  %v3624_v54 = vperm.slane %v531_v44, 0  ;;  %v310_v55 = vld [vmem:[%s3449_s19 + $0x118] sm:$0xff] }
  0x7f   : > { %1136 = vmatpush.bf16.msrb.mxu2 %v2785_v23  ;;  %v306_v23 = vld [vmem:[%s3449_s19 + $0xf8] sm:$0xff]  ;;  %v373_v52 = vld [vmem:[%s3449_s19 + $0x310] sm:$0xff]  ;;  %v372_v56 = vld [vmem:[%s3449_s19 + $0x308] sm:$0xff]  ;;  %v3629_v58 = vpack.c.bf16 %v309_v46, %v307_v45  ;;  %v3633_v9 = vpack.c.bf16 %v310_v55, %v308_v53 }
  0x80   : > { %1305 = vmatpush.bf16.msrb.mxu3 %v2881_v27  ;;  %1474 = vmatpush.bf16.msrb.mxu0 %v2789_v32  ;;  %4418 = vst [vmem:[#allocation13_spill] sm:$0xff] %v3589_v61  ;;  %v3609_v27 = vpack.c.bf16 %v369_v21, %v367_v20  ;;  %v3611_v32 = vpack.c.bf16 %v306_v23, %v304_v22  ;;  %v374_v57 = vld [vmem:[%s3449_s19 + $0x318] sm:$0xff]  ;;  %v2940_v24 = vld [vmem:[#allocation5 + $0x34] sm:$0xf]  ;;  %v2758_v25 = vld [vmem:[#allocation5 + $0x3c] sm:$0xf0] }
  0x81   : > { %1643 = vmatpush.bf16.msrb.mxu1 %v2885_v35  ;;  %v2945_v35 = vld [vmem:[#allocation5 + $0x58] sm:$0xf0]  ;;  %v3631_v59 = vpack.c.bf16 %v373_v52, %v371_v47  ;;  %v3635_v10 = vpack.c.bf16 %v374_v57, %v372_v56  ;;  %v2761_v38 = vor.u32 %v2940_v24, %v2758_v25  ;;  %v311_v47 = vld [vmem:[%s3449_s19 + $0x120] sm:$0xff]  ;;  %v313_v52 = vld [vmem:[%s3449_s19 + $0x130] sm:$0xff] }
  0x82   : > { %808 = vmatmul.bf16.gmra.mxu0 %v3487_v28  ;;  %888 = vmatmul.bf16.gmra.mxu2 %v3489_v29  ;;  %4420 = vst [vmem:[#allocation15_spill] sm:$0xff] %v3609_v27  ;;  %v2777_v37 = vor.u32 %v2945_v35, %v2776_v34  ;;  %v2964_v34 = vld [vmem:[#allocation5 + $0xf4] sm:$0xf]  ;;  %v375_v53 = vld [vmem:[%s3449_s19 + $0x320] sm:$0xff]  ;;  %v312_v56 = vld [vmem:[%s3449_s19 + $0x128] sm:$0xff] }
  0x83   : > { %977 = vmatmul.bf16.gmra.mxu1 %v3491_v30  ;;  %1137 = vmatpush.bf16.msrb.mxu2 %v2773_v11  ;;  %4422 = vst [vmem:[#allocation17_spill] sm:$0xff] %v3631_v59  ;;  %v377_v55 = vld [vmem:[%s3449_s19 + $0x330] sm:$0xff] }
  0x84   : > { %1306 = vmatpush.bf16.msrb.mxu3 %v2869_v13  ;;  %1475 = vmatpush.bf16.msrb.mxu0 %v2777_v37  ;;  %4423 = vst [vmem:[#allocation18_spill] sm:$0xff] %v3635_v10 }
  0x85   : > { %1057 = vmatmul.bf16.gmra.mxu3 %v3493_v31  ;;  %1644 = vmatpush.bf16.msrb.mxu1 %v2873_v39  ;;  %v2854_v39 = vld [vmem:[#allocation5 + $0xfc] sm:$0xf0] }
  0x86   : > { %v2857_v44 = vor.u32 %v2964_v34, %v2854_v39 }
  0x87   : > { %1138 = vmatpush.bf16.msrb.mxu2 %v2761_v38 }
  0x88   : > { %1307 = vmatpush.bf16.msrb.mxu3 %v2857_v44 }
  0x92   : > { %813 = vmatmul.bf16.gmra.mxu0 %v3507_v40  ;;  %893 = vmatmul.bf16.gmra.mxu2 %v3509_v41 }
  0x93   : > { %982 = vmatmul.bf16.gmra.mxu1 %v3511_v42 }
  0x95   : > { %1062 = vmatmul.bf16.gmra.mxu3 %v3513_v43 }
  0xa2   : > { %818 = vmatmul.bf16.gmra.mxu0 %v3527_v0  ;;  %898 = vmatmul.bf16.gmra.mxu2 %v3529_v1 }
  0xa3   : > { %987 = vmatmul.bf16.gmra.mxu1 %v3531_v6 }
  0xa5   : > { %1067 = vmatmul.bf16.gmra.mxu3 %v3533_v7 }
  0xb2   : > { %823 = vmatmul.bf16.gmra.mxu0 %v3547_v16  ;;  %903 = vmatmul.bf16.gmra.mxu2 %v3549_v17 }
  0xb3   : > { %992 = vmatmul.bf16.gmra.mxu1 %v3551_v18 }
  0xb5   : > { %1072 = vmatmul.bf16.gmra.mxu3 %v3553_v19 }
  0xc2   : > { %828 = vmatmul.bf16.gmra.mxu0 %v3567_v48  ;;  %908 = vmatmul.bf16.gmra.mxu2 %v3569_v49 }
  0xc3   : > { %997 = vmatmul.bf16.gmra.mxu1 %v3571_v50 }
  0xc5   : > { %1077 = vmatmul.bf16.gmra.mxu3 %v3573_v51 }
  0xd2   : > { %833 = vmatmul.bf16.gmra.mxu0 %v3587_v60  ;;  %913 = vmatmul.bf16.gmra.mxu2 %v3589_v61 }
  0xd3   : > { %1002 = vmatmul.bf16.gmra.mxu1 %v3591_v62 }
  0xd5   : > { %1082 = vmatmul.bf16.gmra.mxu3 %v3593_v63 }
  0xe2   : > { %838 = vmatmul.bf16.gmra.mxu0 %v3607_v26  ;;  %918 = vmatmul.bf16.gmra.mxu2 %v3609_v27 }
  0xe3   : > { %1007 = vmatmul.bf16.gmra.mxu1 %v3611_v32 }
  0xe5   : > { %1087 = vmatmul.bf16.gmra.mxu3 %v3613_v33 }
  0xef   : > { %v804_v8 = vpop.f32.mrf.mxu0 }
  0xf0   : > { %v805_v11 = vadd.f32 %v804_v8, %v3624_v54  ;;  %v973_v12 = vpop.f32.mrf.mxu1 }
  0xf2   : > { %v974_v13 = vadd.f32 %v973_v12, %v805_v11  ;;  %843 = vmatmul.bf16.gmra.mxu0 %v3629_v58  ;;  %923 = vmatmul.bf16.gmra.mxu2 %v3631_v59  ;;  %v314_v11 = vld [vmem:[%s3449_s19 + $0x138] sm:$0xff]  ;;  %v376_v12 = vld [vmem:[%s3449_s19 + $0x328] sm:$0xff] }
  0xf3   : > { %1012 = vmatmul.bf16.gmra.mxu1 %v3633_v9  ;;  %v3663_v25 = vpack.c.bf16 %v314_v11, %v312_v56 }
  0xf4   : > { %vm1809_vm0 = vcmp.ge.f32.partialorder %v974_v13, 0.0  ;;  %v2001_v14 = vmul.f32 0.01, %v974_v13 }
  0xf5   : > { %1092 = vmatmul.bf16.gmra.mxu3 %v3635_v10  ;;  %v884_v15 = vpop.f32.mrf.mxu2 }
  0xf6   : > { %v2193_v20 = vsel %vm1809_vm0, %v974_v13, %v2001_v14  ;;  %v885_v21 = vadd.f32 %v884_v15, %v3624_v54  ;;  %v378_v13 = vld [vmem:[%s3449_s19 + $0x338] sm:$0xff] }
  0xf7   : > { %2385 = vst [vmem:[%s3644_s25] sm:$0xff] %v2193_v20  ;;  %v806_v23 = vpop.f32.mrf.mxu0  ;;  %v3665_v34 = vpack.c.bf16 %v378_v13, %v376_v12 }
  0xf8   : > { %v1053_v22 = vpop.f32.mrf.mxu3  ;;  %v807_v36 = vadd.f32 %v806_v23, %v3624_v54  ;;  %v975_v37 = vpop.f32.mrf.mxu1  ;;  %v3660_v23 = vpack.c.bf16 %v377_v55, %v375_v53 }
  0xf9   : > { %v1054_v35 = vadd.f32 %v1053_v22, %v885_v21  ;;  %v3658_v22 = vpack.c.bf16 %v313_v52, %v311_v47  ;;  %4425 = vst [vmem:[#allocation20_spill] sm:$0xff] %v3665_v34 }
  0xfa   : > { %v976_v46 = vadd.f32 %v975_v37, %v807_v36  ;;  %4424 = vst [vmem:[#allocation19_spill] sm:$0xff] %v3660_v23  ;;  %v2942_v36 = vld [vmem:[#allocation5 + $0x40] sm:$0xf0] }
  0xfb   : > { %vm1905_vm1 = vcmp.ge.f32.partialorder %v1054_v35, 0.0  ;;  %v2097_v45 = vmul.f32 0.01, %v1054_v35 }
  0xfc   : > { %vm1812_vm2 = vcmp.ge.f32.partialorder %v976_v46, 0.0  ;;  %v2004_v8 = vmul.f32 0.01, %v976_v46 }
  0xfd   : > { %v2289_v57 = vsel %vm1905_vm1, %v1054_v35, %v2097_v45  ;;  %v886_v14 = vpop.f32.mrf.mxu2  ;;  %v2764_v35 = vld [vmem:[#allocation5 + $0x38] sm:$0xf] }
  0xfe   : > { %2481 = vst [vmem:[%s3644_s25 + $0x300] sm:$0xff] %v2289_v57  ;;  %v2196_v15 = vsel %vm1812_vm2, %v976_v46, %v2004_v8  ;;  %v887_v20 = vadd.f32 %v886_v14, %v3624_v54  ;;  %v2765_v44 = vor.u32 %v2942_v36, %v2764_v35  ;;  %v2860_v45 = vld [vmem:[#allocation5 + $0xf8] sm:$0xf]  ;;  %v2966_v46 = vld [vmem:[#allocation5 + $0x100] sm:$0xf0]  ;;  %v317_v36 = vld [vmem:[%s3449_s19 + $0x150] sm:$0xff] }
  0xff   : > { %2388 = vst [vmem:[%s3644_s25 + $0x18] sm:$0xff] %v2196_v15  ;;  %v809_v24 = vpop.f32.mrf.mxu0  ;;  %v2861_v47 = vor.u32 %v2966_v46, %v2860_v45  ;;  %v315_v35 = vld [vmem:[%s3449_s19 + $0x140] sm:$0xff]  ;;  %v318_v46 = vld [vmem:[%s3449_s19 + $0x158] sm:$0xff] }
 0x100   : > { %v1055_v21 = vpop.f32.mrf.mxu3  ;;  %v810_v38 = vadd.f32 %v809_v24, %v3624_v54  ;;  %v978_v39 = vpop.f32.mrf.mxu1  ;;  %1476 = vmatpush.bf16.msrb.mxu0 %v2765_v44 }
 0x101   : > { %v1056_v37 = vadd.f32 %v1055_v21, %v887_v20  ;;  %1645 = vmatpush.bf16.msrb.mxu1 %v2861_v47  ;;  %v380_v47 = vld [vmem:[%s3449_s19 + $0x348] sm:$0xff] }
 0x102   : > { %v979_v53 = vadd.f32 %v978_v39, %v810_v38  ;;  %848 = vmatmul.bf16.gmra.mxu0 %v3658_v22  ;;  %928 = vmatmul.bf16.gmra.mxu2 %v3660_v23  ;;  %v381_v38 = vld [vmem:[%s3449_s19 + $0x350] sm:$0xff]  ;;  %v316_v39 = vld [vmem:[%s3449_s19 + $0x148] sm:$0xff] }
 0x103   : > { %vm1908_vm3 = vcmp.ge.f32.partialorder %v1056_v37, 0.0  ;;  %v2100_v52 = vmul.f32 0.01, %v1056_v37  ;;  %1017 = vmatmul.bf16.gmra.mxu1 %v3663_v25 }
 0x104   : > { %vm1815_vm4 = vcmp.ge.f32.partialorder %v979_v53, 0.0  ;;  %v2007_v56 = vmul.f32 0.01, %v979_v53 }
 0x105   : > { %1097 = vmatmul.bf16.gmra.mxu3 %v3665_v34  ;;  %v2292_v55 = vsel %vm1908_vm3, %v1056_v37, %v2100_v52  ;;  %v889_v57 = vpop.f32.mrf.mxu2  ;;  %v379_v37 = vld [vmem:[%s3449_s19 + $0x340] sm:$0xff]  ;;  %v382_v52 = vld [vmem:[%s3449_s19 + $0x358] sm:$0xff] }
 0x106   : > { %2484 = vst [vmem:[%s3644_s25 + $0x318] sm:$0xff] %v2292_v55  ;;  %v2199_v8 = vsel %vm1815_vm4, %v979_v53, %v2007_v56  ;;  %v890_v11 = vadd.f32 %v889_v57, %v3624_v54 }
 0x107   : > { %2391 = vst [vmem:[%s3644_s25 + $0x30] sm:$0xff] %v2199_v8  ;;  %v811_v13 = vpop.f32.mrf.mxu0  ;;  %v3686_v8 = vpack.c.bf16 %v317_v36, %v315_v35 }
 0x108   : > { %v1058_v12 = vpop.f32.mrf.mxu3  ;;  %v812_v15 = vadd.f32 %v811_v13, %v3624_v54  ;;  %v980_v20 = vpop.f32.mrf.mxu1  ;;  %v3691_v13 = vpack.c.bf16 %v318_v46, %v316_v39 }
 0x109   : > { %v1059_v14 = vadd.f32 %v1058_v12, %v890_v11  ;;  %v3688_v11 = vpack.c.bf16 %v381_v38, %v379_v37 }
 0x10a   : > { %v981_v24 = vadd.f32 %v980_v20, %v812_v15 }
 0x10b   : > { %vm1911_vm5 = vcmp.ge.f32.partialorder %v1059_v14, 0.0  ;;  %v2103_v21 = vmul.f32 0.01, %v1059_v14  ;;  %4426 = vst [vmem:[#allocation21_spill] sm:$0xff] %v3688_v11 }
 0x10c   : > { %vm1818_vm6 = vcmp.ge.f32.partialorder %v981_v24, 0.0  ;;  %v2010_v45 = vmul.f32 0.01, %v981_v24 }
 0x10d   : > { %v2295_v44 = vsel %vm1911_vm5, %v1059_v14, %v2103_v21  ;;  %v891_v53 = vpop.f32.mrf.mxu2  ;;  %v3693_v14 = vpack.c.bf16 %v382_v52, %v380_v47  ;;  %v2937_v47 = vld [vmem:[#allocation5 + $0x1c] sm:$0xf]  ;;  %v2746_v52 = vld [vmem:[#allocation5 + $0x24] sm:$0xf0] }
 0x10e   : > { %2487 = vst [vmem:[%s3644_s25 + $0x330] sm:$0xff] %v2295_v44  ;;  %v2202_v55 = vsel %vm1818_vm6, %v981_v24, %v2010_v45  ;;  %v892_v56 = vadd.f32 %v891_v53, %v3624_v54 }
 0x10f   : > { %2394 = vst [vmem:[%s3644_s25 + $0x48] sm:$0xff] %v2202_v55  ;;  %v814_v12 = vpop.f32.mrf.mxu0 }
 0x110   : > { %v1060_v57 = vpop.f32.mrf.mxu3  ;;  %4427 = vst [vmem:[#allocation22_spill] sm:$0xff] %v3693_v14  ;;  %v815_v20 = vadd.f32 %v814_v12, %v3624_v54  ;;  %v983_v21 = vpop.f32.mrf.mxu1  ;;  %v2961_v12 = vld [vmem:[#allocation5 + $0xdc] sm:$0xf] }
 0x111   : > { %v1061_v15 = vadd.f32 %v1060_v57, %v892_v56  ;;  %v2749_v57 = vor.u32 %v2937_v47, %v2746_v52  ;;  %v384_v47 = vld [vmem:[%s3449_s19 + $0x368] sm:$0xff]  ;;  %v386_v52 = vld [vmem:[%s3449_s19 + $0x378] sm:$0xff] }
 0x112   : > { %v984_v44 = vadd.f32 %v983_v21, %v815_v20  ;;  %853 = vmatmul.bf16.gmra.mxu0 %v3686_v8  ;;  %933 = vmatmul.bf16.gmra.mxu2 %v3688_v11 }
 0x113   : > { %vm1914_vm7 = vcmp.ge.f32.partialorder %v1061_v15, 0.0  ;;  %v2106_v24 = vmul.f32 0.01, %v1061_v15  ;;  %1022 = vmatmul.bf16.gmra.mxu1 %v3691_v13  ;;  %1139 = vmatpush.bf16.msrb.mxu2 %v2749_v57 }
 0x114   : > { %vm1821_vm8 = vcmp.ge.f32.partialorder %v984_v44, 0.0  ;;  %v2013_v36 = vmul.f32 0.01, %v984_v44 }
 0x115   : > { %1102 = vmatmul.bf16.gmra.mxu3 %v3693_v14  ;;  %v2298_v35 = vsel %vm1914_vm7, %v1061_v15, %v2106_v24  ;;  %v894_v37 = vpop.f32.mrf.mxu2  ;;  %v2842_v15 = vld [vmem:[#allocation5 + $0xe4] sm:$0xf0] }
 0x116   : > { %2490 = vst [vmem:[%s3644_s25 + $0x348] sm:$0xff] %v2298_v35  ;;  %v2205_v38 = vsel %vm1821_vm8, %v984_v44, %v2013_v36  ;;  %v895_v39 = vadd.f32 %v894_v37, %v3624_v54  ;;  %v2845_v20 = vor.u32 %v2961_v12, %v2842_v15  ;;  %v319_v44 = vld [vmem:[%s3449_s19 + $0x160] sm:$0xff]  ;;  %v321_v35 = vld [vmem:[%s3449_s19 + $0x170] sm:$0xff] }
 0x117   : > { %2397 = vst [vmem:[%s3644_s25 + $0x60] sm:$0xff] %v2205_v38  ;;  %v816_v46 = vpop.f32.mrf.mxu0  ;;  %v383_v36 = vld [vmem:[%s3449_s19 + $0x360] sm:$0xff]  ;;  %v385_v37 = vld [vmem:[%s3449_s19 + $0x370] sm:$0xff]  ;;  %v320_v38 = vld [vmem:[%s3449_s19 + $0x168] sm:$0xff] }
 0x118   : > { %v1063_v45 = vpop.f32.mrf.mxu3  ;;  %v817_v55 = vadd.f32 %v816_v46, %v3624_v54  ;;  %v985_v56 = vpop.f32.mrf.mxu1  ;;  %1308 = vmatpush.bf16.msrb.mxu3 %v2845_v20  ;;  %v322_v46 = vld [vmem:[%s3449_s19 + $0x178] sm:$0xff]  ;;  %v3716_v57 = vpack.c.bf16 %v385_v37, %v383_v36  ;;  %v2752_v20 = vld [vmem:[#allocation5 + $0x20] sm:$0xf] }
 0x119   : > { %v1064_v53 = vadd.f32 %v1063_v45, %v895_v39  ;;  %v3719_v34 = vpack.c.bf16 %v322_v46, %v320_v38 }
 0x11a   : > { %v986_v24 = vadd.f32 %v985_v56, %v817_v55  ;;  %v3714_v56 = vpack.c.bf16 %v321_v35, %v319_v44  ;;  %4428 = vst [vmem:[#allocation23_spill] sm:$0xff] %v3716_v57 }
 0x11b   : > { %vm1917_vm9 = vcmp.ge.f32.partialorder %v1064_v53, 0.0  ;;  %v2109_v21 = vmul.f32 0.01, %v1064_v53 }
 0x11c   : > { %vm1824_vm10 = vcmp.ge.f32.partialorder %v986_v24, 0.0  ;;  %v2016_v45 = vmul.f32 0.01, %v986_v24 }
 0x11d   : > { %v2301_v39 = vsel %vm1917_vm9, %v1064_v53, %v2109_v21  ;;  %v896_v12 = vpop.f32.mrf.mxu2  ;;  %v3721_v53 = vpack.c.bf16 %v386_v52, %v384_v47  ;;  %v2939_v21 = vld [vmem:[#allocation5 + $0x28] sm:$0xf0] }
 0x11e   : > { %2493 = vst [vmem:[%s3644_s25 + $0x360] sm:$0xff] %v2301_v39  ;;  %v2208_v15 = vsel %vm1824_vm10, %v986_v24, %v2016_v45  ;;  %v897_v14 = vadd.f32 %v896_v12, %v3624_v54  ;;  %v2753_v24 = vor.u32 %v2939_v21, %v2752_v20  ;;  %v2848_v45 = vld [vmem:[#allocation5 + $0xe0] sm:$0xf]  ;;  %v2963_v12 = vld [vmem:[#allocation5 + $0xe8] sm:$0xf0] }
 0x11f   : > { %2400 = vst [vmem:[%s3644_s25 + $0x78] sm:$0xff] %v2208_v15  ;;  %v819_v11 = vpop.f32.mrf.mxu0  ;;  %v2849_v44 = vor.u32 %v2963_v12, %v2848_v45  ;;  %v323_v21 = vld [vmem:[%s3449_s19 + $0x180] sm:$0xff]  ;;  %v389_v45 = vld [vmem:[%s3449_s19 + $0x390] sm:$0xff]  ;;  %v324_v12 = vld [vmem:[%s3449_s19 + $0x188] sm:$0xff] }
 0x120   : > { %v1065_v55 = vpop.f32.mrf.mxu3  ;;  %4429 = vst [vmem:[#allocation24_spill] sm:$0xff] %v3721_v53  ;;  %v820_v39 = vadd.f32 %v819_v11, %v3624_v54  ;;  %v988_v10 = vpop.f32.mrf.mxu1  ;;  %1477 = vmatpush.bf16.msrb.mxu0 %v2753_v24  ;;  %v387_v24 = vld [vmem:[%s3449_s19 + $0x380] sm:$0xff] }
 0x121   : > { %v1066_v23 = vadd.f32 %v1065_v55, %v897_v14  ;;  %1646 = vmatpush.bf16.msrb.mxu1 %v2849_v44 }
 0x122   : > { %v989_v36 = vadd.f32 %v988_v10, %v820_v39  ;;  %858 = vmatmul.bf16.gmra.mxu0 %v3714_v56  ;;  %938 = vmatmul.bf16.gmra.mxu2 %v3716_v57  ;;  %v325_v39 = vld [vmem:[%s3449_s19 + $0x190] sm:$0xff] }
 0x123   : > { %vm1920_vm11 = vcmp.ge.f32.partialorder %v1066_v23, 0.0  ;;  %v2112_v35 = vmul.f32 0.01, %v1066_v23  ;;  %1027 = vmatmul.bf16.gmra.mxu1 %v3719_v34 }
 0x124   : > { %vm1827_vm12 = vcmp.ge.f32.partialorder %v989_v36, 0.0  ;;  %v2019_v11 = vmul.f32 0.01, %v989_v36 }
 0x125   : > { %1107 = vmatmul.bf16.gmra.mxu3 %v3721_v53  ;;  %v2304_v14 = vsel %vm1920_vm11, %v1066_v23, %v2112_v35  ;;  %v899_v37 = vpop.f32.mrf.mxu2 }
 0x126   : > { %2496 = vst [vmem:[%s3644_s25 + $0x378] sm:$0xff] %v2304_v14  ;;  %v2211_v10 = vsel %vm1827_vm12, %v989_v36, %v2019_v11  ;;  %v900_v38 = vadd.f32 %v899_v37, %v3624_v54  ;;  %v326_v36 = vld [vmem:[%s3449_s19 + $0x198] sm:$0xff]  ;;  %v388_v14 = vld [vmem:[%s3449_s19 + $0x388] sm:$0xff] }
 0x127   : > { %2403 = vst [vmem:[%s3644_s25 + $0x90] sm:$0xff] %v2211_v10  ;;  %v821_v47 = vpop.f32.mrf.mxu0  ;;  %v390_v11 = vld [vmem:[%s3449_s19 + $0x398] sm:$0xff]  ;;  %v3747_v53 = vpack.c.bf16 %v326_v36, %v324_v12 }
 0x128   : > { %v1068_v46 = vpop.f32.mrf.mxu3  ;;  %v822_v52 = vadd.f32 %v821_v47, %v3624_v54  ;;  %v990_v15 = vpop.f32.mrf.mxu1  ;;  %v3742_v47 = vpack.c.bf16 %v325_v39, %v323_v21 }
 0x129   : > { %v1069_v23 = vadd.f32 %v1068_v46, %v900_v38 }
 0x12a   : > { %v991_v20 = vadd.f32 %v990_v15, %v822_v52  ;;  %v3744_v52 = vpack.c.bf16 %v389_v45, %v387_v24 }
 0x12b   : > { %vm1923_vm13 = vcmp.ge.f32.partialorder %v1069_v23, 0.0  ;;  %v2115_v55 = vmul.f32 0.01, %v1069_v23 }
 0x12c   : > { %vm1830_vm14 = vcmp.ge.f32.partialorder %v991_v20, 0.0  ;;  %v2022_v35 = vmul.f32 0.01, %v991_v20  ;;  %4430 = vst [vmem:[#allocation25_spill] sm:$0xff] %v3744_v52 }
 0x12d   : > { %v2307_v44 = vsel %vm1923_vm13, %v1069_v23, %v2115_v55  ;;  %v901_v37 = vpop.f32.mrf.mxu2  ;;  %v3749_v23 = vpack.c.bf16 %v390_v11, %v388_v14  ;;  %v2934_v14 = vld [vmem:[#allocation5 + $0x4] sm:$0xf]  ;;  %v2734_v11 = vld [vmem:[#allocation5 + $0xc] sm:$0xf0] }
 0x12e   : > { %2499 = vst [vmem:[%s3644_s25 + $0x390] sm:$0xff] %v2307_v44  ;;  %v2214_v10 = vsel %vm1830_vm14, %v991_v20, %v2022_v35  ;;  %v902_v38 = vadd.f32 %v901_v37, %v3624_v54 }
 0x12f   : > { %2406 = vst [vmem:[%s3644_s25 + $0xa8] sm:$0xff] %v2214_v10  ;;  %v824_v15 = vpop.f32.mrf.mxu0 }
 0x130   : > { %v1070_v46 = vpop.f32.mrf.mxu3  ;;  %4431 = vst [vmem:[#allocation26_spill] sm:$0xff] %v3749_v23  ;;  %v825_v57 = vadd.f32 %v824_v15, %v3624_v54  ;;  %v993_v44 = vpop.f32.mrf.mxu1  ;;  %v2958_v15 = vld [vmem:[#allocation5 + $0xc4] sm:$0xf] }
 0x131   : > { %v1071_v55 = vadd.f32 %v1070_v46, %v902_v38  ;;  %v2737_v46 = vor.u32 %v2934_v14, %v2734_v11  ;;  %v330_v14 = vld [vmem:[%s3449_s19 + $0x1b8] sm:$0xff]  ;;  %v392_v11 = vld [vmem:[%s3449_s19 + $0x3a8] sm:$0xff] }
 0x132   : > { %v994_v35 = vadd.f32 %v993_v44, %v825_v57  ;;  %863 = vmatmul.bf16.gmra.mxu0 %v3742_v47  ;;  %943 = vmatmul.bf16.gmra.mxu2 %v3744_v52 }
 0x133   : > { %vm1926_vm15 = vcmp.ge.f32.partialorder %v1071_v55, 0.0  ;;  %v2118_v20 = vmul.f32 0.01, %v1071_v55  ;;  %1032 = vmatmul.bf16.gmra.mxu1 %v3747_v53  ;;  %1140 = vmatpush.bf16.msrb.mxu2 %v2737_v46 }
 0x134   : > { %vm1833_vm0 = vcmp.ge.f32.partialorder %v994_v35, 0.0  ;;  %v2025_v39 = vmul.f32 0.01, %v994_v35 }
 0x135   : > { %1112 = vmatmul.bf16.gmra.mxu3 %v3749_v23  ;;  %v2310_v21 = vsel %vm1926_vm15, %v1071_v55, %v2118_v20  ;;  %v904_v24 = vpop.f32.mrf.mxu2  ;;  %v2830_v55 = vld [vmem:[#allocation5 + $0xcc] sm:$0xf0]  ;;  %v394_v23 = vld [vmem:[%s3449_s19 + $0x3b8] sm:$0xff] }
 0x136   : > { %2502 = vst [vmem:[%s3644_s25 + $0x3a8] sm:$0xff] %v2310_v21  ;;  %v2217_v45 = vsel %vm1833_vm0, %v994_v35, %v2025_v39  ;;  %v905_v12 = vadd.f32 %v904_v24, %v3624_v54  ;;  %v2833_v44 = vor.u32 %v2958_v15, %v2830_v55  ;;  %v327_v21 = vld [vmem:[%s3449_s19 + $0x1a0] sm:$0xff]  ;;  %v329_v39 = vld [vmem:[%s3449_s19 + $0x1b0] sm:$0xff] }
 0x137   : > { %2409 = vst [vmem:[%s3644_s25 + $0xc0] sm:$0xff] %v2217_v45  ;;  %v826_v57 = vpop.f32.mrf.mxu0  ;;  %v391_v24 = vld [vmem:[%s3449_s19 + $0x3a0] sm:$0xff]  ;;  %v393_v45 = vld [vmem:[%s3449_s19 + $0x3b0] sm:$0xff] }
 0x138   : > { %v1073_v36 = vpop.f32.mrf.mxu3  ;;  %v827_v10 = vadd.f32 %v826_v57, %v3624_v54  ;;  %v995_v38 = vpop.f32.mrf.mxu1  ;;  %1309 = vmatpush.bf16.msrb.mxu3 %v2833_v44  ;;  %v3772_v46 = vpack.c.bf16 %v393_v45, %v391_v24  ;;  %v2740_v44 = vld [vmem:[#allocation5 + $0x8] sm:$0xf] }
 0x139   : > { %v1074_v37 = vadd.f32 %v1073_v36, %v905_v12  ;;  %v328_v12 = vld [vmem:[%s3449_s19 + $0x1a8] sm:$0xff] }
 0x13a   : > { %v996_v35 = vadd.f32 %v995_v38, %v827_v10  ;;  %v3770_v38 = vpack.c.bf16 %v329_v39, %v327_v21  ;;  %4432 = vst [vmem:[#allocation27_spill] sm:$0xff] %v3772_v46  ;;  %v3775_v33 = vpack.c.bf16 %v330_v14, %v328_v12 }
 0x13b   : > { %vm1929_vm1 = vcmp.ge.f32.partialorder %v1074_v37, 0.0  ;;  %v2121_v20 = vmul.f32 0.01, %v1074_v37 }
 0x13c   : > { %vm1836_vm2 = vcmp.ge.f32.partialorder %v996_v35, 0.0  ;;  %v2028_v57 = vmul.f32 0.01, %v996_v35 }
 0x13d   : > { %v2313_v36 = vsel %vm1929_vm1, %v1074_v37, %v2121_v20  ;;  %v906_v15 = vpop.f32.mrf.mxu2  ;;  %v3777_v37 = vpack.c.bf16 %v394_v23, %v392_v11  ;;  %v2936_v20 = vld [vmem:[#allocation5 + $0x10] sm:$0xf0] }
 0x13e   : > { %2505 = vst [vmem:[%s3644_s25 + $0x3c0] sm:$0xff] %v2313_v36  ;;  %v2220_v55 = vsel %vm1836_vm2, %v996_v35, %v2028_v57  ;;  %v907_v52 = vadd.f32 %v906_v15, %v3624_v54  ;;  %v2741_v35 = vor.u32 %v2936_v20, %v2740_v44  ;;  %v2836_v57 = vld [vmem:[#allocation5 + $0xc8] sm:$0xf]  ;;  %v2960_v15 = vld [vmem:[#allocation5 + $0xd0] sm:$0xf0]  ;;  %v331_v20 = vld [vmem:[%s3449_s19 + $0x1c0] sm:$0xff] }
 0x13f   : > { %2412 = vst [vmem:[%s3644_s25 + $0xd8] sm:$0xff] %v2220_v55  ;;  %v829_v59 = vpop.f32.mrf.mxu0  ;;  %v2837_v21 = vor.u32 %v2960_v15, %v2836_v57  ;;  %v397_v57 = vld [vmem:[%s3449_s19 + $0x3d0] sm:$0xff]  ;;  %v332_v15 = vld [vmem:[%s3449_s19 + $0x1c8] sm:$0xff] }
 0x140   : > { %v1075_v10 = vpop.f32.mrf.mxu3  ;;  %4433 = vst [vmem:[#allocation28_spill] sm:$0xff] %v3777_v37  ;;  %v830_v36 = vadd.f32 %v829_v59, %v3624_v54  ;;  %v998_v63 = vpop.f32.mrf.mxu1  ;;  %1478 = vmatpush.bf16.msrb.mxu0 %v2741_v35  ;;  %v395_v35 = vld [vmem:[%s3449_s19 + $0x3c0] sm:$0xff] }
 0x141   : > { %v1076_v27 = vadd.f32 %v1075_v10, %v907_v52  ;;  %1647 = vmatpush.bf16.msrb.mxu1 %v2837_v21 }
 0x142   : > { %v999_v24 = vadd.f32 %v998_v63, %v830_v36  ;;  %868 = vmatmul.bf16.gmra.mxu0 %v3770_v38  ;;  %948 = vmatmul.bf16.gmra.mxu2 %v3772_v46  ;;  %v333_v36 = vld [vmem:[%s3449_s19 + $0x1d0] sm:$0xff] }
 0x143   : > { %vm1932_vm3 = vcmp.ge.f32.partialorder %v1076_v27, 0.0  ;;  %v2124_v39 = vmul.f32 0.01, %v1076_v27  ;;  %1037 = vmatmul.bf16.gmra.mxu1 %v3775_v33 }
 0x144   : > { %vm1839_vm4 = vcmp.ge.f32.partialorder %v999_v24, 0.0  ;;  %v2031_v59 = vmul.f32 0.01, %v999_v24 }
 0x145   : > { %1117 = vmatmul.bf16.gmra.mxu3 %v3777_v37  ;;  %v2316_v52 = vsel %vm1932_vm3, %v1076_v27, %v2124_v39  ;;  %v909_v23 = vpop.f32.mrf.mxu2 }
 0x146   : > { %2508 = vst [vmem:[%s3644_s25 + $0x3d8] sm:$0xff] %v2316_v52  ;;  %v2223_v63 = vsel %vm1839_vm4, %v999_v24, %v2031_v59  ;;  %v910_v45 = vadd.f32 %v909_v23, %v3624_v54  ;;  %v334_v24 = vld [vmem:[%s3449_s19 + $0x1d8] sm:$0xff]  ;;  %v396_v52 = vld [vmem:[%s3449_s19 + $0x3c8] sm:$0xff] }
 0x147   : > { %2415 = vst [vmem:[%s3644_s25 + $0xf0] sm:$0xff] %v2223_v63  ;;  %v831_v14 = vpop.f32.mrf.mxu0  ;;  %v398_v59 = vld [vmem:[%s3449_s19 + $0x3d8] sm:$0xff]  ;;  %v3803_v37 = vpack.c.bf16 %v334_v24, %v332_v15 }
 0x148   : > { %v1078_v12 = vpop.f32.mrf.mxu3  ;;  %v832_v11 = vadd.f32 %v831_v14, %v3624_v54  ;;  %v1000_v55 = vpop.f32.mrf.mxu1  ;;  %v3798_v14 = vpack.c.bf16 %v333_v36, %v331_v20 }
 0x149   : > { %v1079_v27 = vadd.f32 %v1078_v12, %v910_v45 }
 0x14a   : > { %v1001_v44 = vadd.f32 %v1000_v55, %v832_v11  ;;  %v3800_v11 = vpack.c.bf16 %v397_v57, %v395_v35 }
 0x14b   : > { %vm1935_vm5 = vcmp.ge.f32.partialorder %v1079_v27, 0.0  ;;  %v2127_v10 = vmul.f32 0.01, %v1079_v27 }
 0x14c   : > { %vm1842_vm6 = vcmp.ge.f32.partialorder %v1001_v44, 0.0  ;;  %v2034_v39 = vmul.f32 0.01, %v1001_v44  ;;  %4434 = vst [vmem:[#allocation29_spill] sm:$0xff] %v3800_v11 }
 0x14d   : > { %v2319_v21 = vsel %vm1935_vm5, %v1079_v27, %v2127_v10  ;;  %v911_v23 = vpop.f32.mrf.mxu2  ;;  %v3805_v27 = vpack.c.bf16 %v398_v59, %v396_v52 }
 0x14e   : > { %2511 = vst [vmem:[%s3644_s25 + $0x3f0] sm:$0xff] %v2319_v21  ;;  %v2226_v63 = vsel %vm1842_vm6, %v1001_v44, %v2034_v39  ;;  %v912_v45 = vadd.f32 %v911_v23, %v3624_v54 }
 0x14f   : > { %2418 = vst [vmem:[%s3644_s25 + $0x108] sm:$0xff] %v2226_v63  ;;  %v834_v55 = vpop.f32.mrf.mxu0 }
 0x150   : > { %v1080_v12 = vpop.f32.mrf.mxu3  ;;  %4435 = vst [vmem:[#allocation30_spill] sm:$0xff] %v3805_v27  ;;  %v835_v46 = vadd.f32 %v834_v55, %v3624_v54  ;;  %v1003_v21 = vpop.f32.mrf.mxu1  ;;  %v337_v55 = vld [vmem:[%s3449_s19 + $0x1f0] sm:$0xff] }
 0x151   : > { %v1081_v10 = vadd.f32 %v1080_v12, %v912_v45  ;;  %v335_v12 = vld [vmem:[%s3449_s19 + $0x1e0] sm:$0xff] }
 0x152   : > { %v1004_v39 = vadd.f32 %v1003_v21, %v835_v46  ;;  %873 = vmatmul.bf16.gmra.mxu0 %v3798_v14  ;;  %953 = vmatmul.bf16.gmra.mxu2 %v3800_v11  ;;  %v401_v21 = vld [vmem:[%s3449_s19 + $0x3f0] sm:$0xff]  ;;  %v3826_v11 = vpack.c.bf16 %v337_v55, %v335_v12 }
 0x153   : > { %vm1938_vm7 = vcmp.ge.f32.partialorder %v1081_v10, 0.0  ;;  %v2130_v44 = vmul.f32 0.01, %v1081_v10  ;;  %1042 = vmatmul.bf16.gmra.mxu1 %v3803_v37 }
 0x154   : > { %vm1845_vm8 = vcmp.ge.f32.partialorder %v1004_v39, 0.0  ;;  %v2037_v36 = vmul.f32 0.01, %v1004_v39 }
 0x155   : > { %1122 = vmatmul.bf16.gmra.mxu3 %v3805_v27  ;;  %v2322_v20 = vsel %vm1938_vm7, %v1081_v10, %v2130_v44  ;;  %v914_v35 = vpop.f32.mrf.mxu2  ;;  %v399_v10 = vld [vmem:[%s3449_s19 + $0x3e0] sm:$0xff]  ;;  %v336_v44 = vld [vmem:[%s3449_s19 + $0x1e8] sm:$0xff] }
 0x156   : > { %2514 = vst [vmem:[%s3644_s25 + $0x408] sm:$0xff] %v2322_v20  ;;  %v2229_v57 = vsel %vm1845_vm8, %v1004_v39, %v2037_v36  ;;  %v915_v46 = vadd.f32 %v914_v35, %v3624_v54  ;;  %v338_v36 = vld [vmem:[%s3449_s19 + $0x1f8] sm:$0xff]  ;;  %v400_v35 = vld [vmem:[%s3449_s19 + $0x3e8] sm:$0xff] }
 0x157   : > { %2421 = vst [vmem:[%s3644_s25 + $0x120] sm:$0xff] %v2229_v57  ;;  %v836_v24 = vpop.f32.mrf.mxu0  ;;  %v402_v57 = vld [vmem:[%s3449_s19 + $0x3f8] sm:$0xff]  ;;  %v3831_v61 = vpack.c.bf16 %v338_v36, %v336_v44 }
 0x158   : > { %v1083_v15 = vpop.f32.mrf.mxu3  ;;  %v837_v59 = vadd.f32 %v836_v24, %v3624_v54  ;;  %v1005_v23 = vpop.f32.mrf.mxu1 }
 0x159   : > { %v1084_v52 = vadd.f32 %v1083_v15, %v915_v46 }
 0x15a   : > { %v1006_v45 = vadd.f32 %v1005_v23, %v837_v59  ;;  %v3828_v59 = vpack.c.bf16 %v401_v21, %v399_v10 }
 0x15b   : > { %vm1941_vm9 = vcmp.ge.f32.partialorder %v1084_v52, 0.0  ;;  %v2133_v63 = vmul.f32 0.01, %v1084_v52 }
 0x15c   : > { %vm1848_vm10 = vcmp.ge.f32.partialorder %v1006_v45, 0.0  ;;  %v2040_v20 = vmul.f32 0.01, %v1006_v45 }
 0x15d   : > { %v2325_v39 = vsel %vm1941_vm9, %v1084_v52, %v2133_v63  ;;  %v916_v46 = vpop.f32.mrf.mxu2  ;;  %v3833_v52 = vpack.c.bf16 %v402_v57, %v400_v35 }
 0x15e   : > { %2517 = vst [vmem:[%s3644_s25 + $0x420] sm:$0xff] %v2325_v39  ;;  %v2232_v15 = vsel %vm1848_vm10, %v1006_v45, %v2040_v20  ;;  %v917_v24 = vadd.f32 %v916_v46, %v3624_v54 }
 0x15f   : > { %2424 = vst [vmem:[%s3644_s25 + $0x138] sm:$0xff] %v2232_v15  ;;  %v839_v23 = vpop.f32.mrf.mxu0 }
 0x160   : > { %v1085_v27 = vpop.f32.mrf.mxu3  ;;  %v840_v51 = vadd.f32 %v839_v23, %v3624_v54  ;;  %v1008_v39 = vpop.f32.mrf.mxu1 }
 0x161   : > { %v1086_v63 = vadd.f32 %v1085_v27, %v917_v24 }
 0x162   : > { %v1009_v20 = vadd.f32 %v1008_v39, %v840_v51  ;;  %878 = vmatmul.bf16.gmra.mxu0 %v3826_v11  ;;  %958 = vmatmul.bf16.gmra.mxu2 %v3828_v59 }
 0x163   : > { %vm1944_vm11 = vcmp.ge.f32.partialorder %v1086_v63, 0.0  ;;  %v2136_v45 = vmul.f32 0.01, %v1086_v63  ;;  %1047 = vmatmul.bf16.gmra.mxu1 %v3831_v61 }
 0x164   : > { %vm1851_vm12 = vcmp.ge.f32.partialorder %v1009_v20, 0.0  ;;  %v2043_v55 = vmul.f32 0.01, %v1009_v20 }
 0x165   : > { %1127 = vmatmul.bf16.gmra.mxu3 %v3833_v52  ;;  %v2328_v12 = vsel %vm1944_vm11, %v1086_v63, %v2136_v45  ;;  %v919_v27 = vpop.f32.mrf.mxu2 }
 0x166   : > { %2520 = vst [vmem:[%s3644_s25 + $0x438] sm:$0xff] %v2328_v12  ;;  %v2235_v10 = vsel %vm1851_vm12, %v1009_v20, %v2043_v55  ;;  %v920_v21 = vadd.f32 %v919_v27, %v3624_v54 }
 0x167   : > { %2427 = vst [vmem:[%s3644_s25 + $0x150] sm:$0xff] %v2235_v10  ;;  %v841_v51 = vpop.f32.mrf.mxu0 }
 0x168   : > { %v1088_v44 = vpop.f32.mrf.mxu3  ;;  %v842_v35 = vadd.f32 %v841_v51, %v3624_v54  ;;  %v1010_v57 = vpop.f32.mrf.mxu1 }
 0x169   : > { %v1089_v36 = vadd.f32 %v1088_v44, %v920_v21 }
 0x16a   : > { %v1011_v15 = vadd.f32 %v1010_v57, %v842_v35 }
 0x16b   : > { %vm1947_vm13 = vcmp.ge.f32.partialorder %v1089_v36, 0.0  ;;  %v2139_v46 = vmul.f32 0.01, %v1089_v36 }
 0x16c   : > { %vm1854_vm14 = vcmp.ge.f32.partialorder %v1011_v15, 0.0  ;;  %v2046_v23 = vmul.f32 0.01, %v1011_v15 }
 0x16d   : > { %v2331_v24 = vsel %vm1947_vm13, %v1089_v36, %v2139_v46  ;;  %v921_v63 = vpop.f32.mrf.mxu2 }
 0x16e   : > { %2523 = vst [vmem:[%s3644_s25 + $0x450] sm:$0xff] %v2331_v24  ;;  %v2238_v39 = vsel %vm1854_vm14, %v1011_v15, %v2046_v23  ;;  %v922_v45 = vadd.f32 %v921_v63, %v3624_v54 }
 0x16f   : > { %2430 = vst [vmem:[%s3644_s25 + $0x168] sm:$0xff] %v2238_v39  ;;  %v844_v12 = vpop.f32.mrf.mxu0 }
 0x170   : > { %v1090_v20 = vpop.f32.mrf.mxu3  ;;  %v845_v27 = vadd.f32 %v844_v12, %v3624_v54  ;;  %v1013_v10 = vpop.f32.mrf.mxu1 }
 0x171   : > { %v1091_v55 = vadd.f32 %v1090_v20, %v922_v45 }
 0x172   : > { %v1014_v44 = vadd.f32 %v1013_v10, %v845_v27  ;;  %1141 = vmatmul.bf16.vlgmr.msrb.gmra.mxu2 %v3467_v2  ;;  %1479 = vmatmul.bf16.vlgmr.msrb.gmra.mxu0 %v3467_v2 }
 0x173   : > { %vm1950_vm15 = vcmp.ge.f32.partialorder %v1091_v55, 0.0  ;;  %v2142_v21 = vmul.f32 0.01, %v1091_v55  ;;  %1648 = vmatmul.bf16.vlgmr.msrb.gmra.mxu1 %v3471_v4 }
 0x174   : > { %vm1857_vm0 = vcmp.ge.f32.partialorder %v1014_v44, 0.0  ;;  %v2049_v36 = vmul.f32 0.01, %v1014_v44 }
 0x175   : > { %1310 = vmatmul.bf16.vlgmr.msrb.gmra.mxu3 %v3471_v4  ;;  %v2334_v51 = vsel %vm1950_vm15, %v1091_v55, %v2142_v21  ;;  %v924_v35 = vpop.f32.mrf.mxu2 }
 0x176   : > { %2526 = vst [vmem:[%s3644_s25 + $0x468] sm:$0xff] %v2334_v51  ;;  %v2241_v57 = vsel %vm1857_vm0, %v1014_v44, %v2049_v36  ;;  %v925_v46 = vadd.f32 %v924_v35, %v3624_v54 }
 0x177   : > { %2433 = vst [vmem:[%s3644_s25 + $0x180] sm:$0xff] %v2241_v57  ;;  %v846_v24 = vpop.f32.mrf.mxu0 }
 0x178   : > { %v1093_v15 = vpop.f32.mrf.mxu3  ;;  %v847_v2 = vadd.f32 %v846_v24, %v3624_v54  ;;  %v1015_v63 = vpop.f32.mrf.mxu1 }
 0x179   : > { %v1094_v23 = vadd.f32 %v1093_v15, %v925_v46 }
 0x17a   : > { %v1016_v4 = vadd.f32 %v1015_v63, %v847_v2 }
 0x17b   : > { %vm1953_vm1 = vcmp.ge.f32.partialorder %v1094_v23, 0.0  ;;  %v2145_v39 = vmul.f32 0.01, %v1094_v23 }
 0x17c   : > { %vm1860_vm2 = vcmp.ge.f32.partialorder %v1016_v4, 0.0  ;;  %v2052_v20 = vmul.f32 0.01, %v1016_v4 }
 0x17d   : > { %v2337_v45 = vsel %vm1953_vm1, %v1094_v23, %v2145_v39  ;;  %v926_v12 = vpop.f32.mrf.mxu2 }
 0x17e   : > { %2529 = vst [vmem:[%s3644_s25 + $0x480] sm:$0xff] %v2337_v45  ;;  %v2244_v55 = vsel %vm1860_vm2, %v1016_v4, %v2052_v20  ;;  %v927_v27 = vadd.f32 %v926_v12, %v3624_v54 }
 0x17f   : > { %2436 = vst [vmem:[%s3644_s25 + $0x198] sm:$0xff] %v2244_v55  ;;  %v849_v21 = vpop.f32.mrf.mxu0 }
 0x180   : > { %v1095_v10 = vpop.f32.mrf.mxu3  ;;  %v850_v51 = vadd.f32 %v849_v21, %v3624_v54  ;;  %v1018_v36 = vpop.f32.mrf.mxu1 }
 0x181   : > { %v1096_v44 = vadd.f32 %v1095_v10, %v927_v27 }
 0x182   : > { %v1019_v57 = vadd.f32 %v1018_v36, %v850_v51  ;;  %1146 = vmatmul.bf16.gmra.mxu2 %v3487_v28  ;;  %1484 = vmatmul.bf16.gmra.mxu0 %v3487_v28 }
 0x183   : > { %vm1956_vm3 = vcmp.ge.f32.partialorder %v1096_v44, 0.0  ;;  %v2148_v35 = vmul.f32 0.01, %v1096_v44  ;;  %1653 = vmatmul.bf16.gmra.mxu1 %v3491_v30 }
 0x184   : > { %vm1863_vm4 = vcmp.ge.f32.partialorder %v1019_v57, 0.0  ;;  %v2055_v15 = vmul.f32 0.01, %v1019_v57 }
 0x185   : > { %1315 = vmatmul.bf16.gmra.mxu3 %v3491_v30  ;;  %v2340_v46 = vsel %vm1956_vm3, %v1096_v44, %v2148_v35  ;;  %v929_v24 = vpop.f32.mrf.mxu2 }
 0x186   : > { %2532 = vst [vmem:[%s3644_s25 + $0x498] sm:$0xff] %v2340_v46  ;;  %v2247_v23 = vsel %vm1863_vm4, %v1019_v57, %v2055_v15  ;;  %v930_v2 = vadd.f32 %v929_v24, %v3624_v54 }
 0x187   : > { %2439 = vst [vmem:[%s3644_s25 + $0x1b0] sm:$0xff] %v2247_v23  ;;  %v851_v39 = vpop.f32.mrf.mxu0 }
 0x188   : > { %v1098_v63 = vpop.f32.mrf.mxu3  ;;  %v852_v28 = vadd.f32 %v851_v39, %v3624_v54  ;;  %v1020_v45 = vpop.f32.mrf.mxu1 }
 0x189   : > { %v1099_v4 = vadd.f32 %v1098_v63, %v930_v2 }
 0x18a   : > { %v1021_v30 = vadd.f32 %v1020_v45, %v852_v28 }
 0x18b   : > { %vm1959_vm5 = vcmp.ge.f32.partialorder %v1099_v4, 0.0  ;;  %v2151_v20 = vmul.f32 0.01, %v1099_v4 }
 0x18c   : > { %vm1866_vm6 = vcmp.ge.f32.partialorder %v1021_v30, 0.0  ;;  %v2058_v55 = vmul.f32 0.01, %v1021_v30 }
 0x18d   : > { %v2343_v12 = vsel %vm1959_vm5, %v1099_v4, %v2151_v20  ;;  %v931_v27 = vpop.f32.mrf.mxu2 }
 0x18e   : > { %2535 = vst [vmem:[%s3644_s25 + $0x4b0] sm:$0xff] %v2343_v12  ;;  %v2250_v10 = vsel %vm1866_vm6, %v1021_v30, %v2058_v55  ;;  %v932_v21 = vadd.f32 %v931_v27, %v3624_v54 }
 0x18f   : > { %2442 = vst [vmem:[%s3644_s25 + $0x1c8] sm:$0xff] %v2250_v10  ;;  %v854_v51 = vpop.f32.mrf.mxu0 }
 0x190   : > { %v1100_v44 = vpop.f32.mrf.mxu3  ;;  %v855_v35 = vadd.f32 %v854_v51, %v3624_v54  ;;  %v1023_v57 = vpop.f32.mrf.mxu1 }
 0x191   : > { %v1101_v36 = vadd.f32 %v1100_v44, %v932_v21 }
 0x192   : > { %v1024_v15 = vadd.f32 %v1023_v57, %v855_v35  ;;  %1151 = vmatmul.bf16.gmra.mxu2 %v3507_v40  ;;  %1489 = vmatmul.bf16.gmra.mxu0 %v3507_v40 }
 0x193   : > { %vm1962_vm7 = vcmp.ge.f32.partialorder %v1101_v36, 0.0  ;;  %v2154_v46 = vmul.f32 0.01, %v1101_v36  ;;  %1658 = vmatmul.bf16.gmra.mxu1 %v3511_v42 }
 0x194   : > { %vm1869_vm8 = vcmp.ge.f32.partialorder %v1024_v15, 0.0  ;;  %v2061_v23 = vmul.f32 0.01, %v1024_v15 }
 0x195   : > { %1320 = vmatmul.bf16.gmra.mxu3 %v3511_v42  ;;  %v2346_v24 = vsel %vm1962_vm7, %v1101_v36, %v2154_v46  ;;  %v934_v2 = vpop.f32.mrf.mxu2 }
 0x196   : > { %2538 = vst [vmem:[%s3644_s25 + $0x4c8] sm:$0xff] %v2346_v24  ;;  %v2253_v63 = vsel %vm1869_vm8, %v1024_v15, %v2061_v23  ;;  %v935_v39 = vadd.f32 %v934_v2, %v3624_v54 }
 0x197   : > { %2445 = vst [vmem:[%s3644_s25 + $0x1e0] sm:$0xff] %v2253_v63  ;;  %v856_v28 = vpop.f32.mrf.mxu0 }
 0x198   : > { %v1103_v4 = vpop.f32.mrf.mxu3  ;;  %v857_v40 = vadd.f32 %v856_v28, %v3624_v54  ;;  %v1025_v20 = vpop.f32.mrf.mxu1 }
 0x199   : > { %v1104_v45 = vadd.f32 %v1103_v4, %v935_v39 }
 0x19a   : > { %v1026_v42 = vadd.f32 %v1025_v20, %v857_v40 }
 0x19b   : > { %vm1965_vm9 = vcmp.ge.f32.partialorder %v1104_v45, 0.0  ;;  %v2157_v30 = vmul.f32 0.01, %v1104_v45 }
 0x19c   : > { %vm1872_vm10 = vcmp.ge.f32.partialorder %v1026_v42, 0.0  ;;  %v2064_v55 = vmul.f32 0.01, %v1026_v42 }
 0x19d   : > { %v2349_v12 = vsel %vm1965_vm9, %v1104_v45, %v2157_v30  ;;  %v936_v27 = vpop.f32.mrf.mxu2 }
 0x19e   : > { %2541 = vst [vmem:[%s3644_s25 + $0x4e0] sm:$0xff] %v2349_v12  ;;  %v2256_v10 = vsel %vm1872_vm10, %v1026_v42, %v2064_v55  ;;  %v937_v21 = vadd.f32 %v936_v27, %v3624_v54 }
 0x19f   : > { %2448 = vst [vmem:[%s3644_s25 + $0x1f8] sm:$0xff] %v2256_v10  ;;  %v859_v51 = vpop.f32.mrf.mxu0 }
 0x1a0   : > { %v1105_v44 = vpop.f32.mrf.mxu3  ;;  %v860_v35 = vadd.f32 %v859_v51, %v3624_v54  ;;  %v1028_v57 = vpop.f32.mrf.mxu1 }
 0x1a1   : > { %v1106_v36 = vadd.f32 %v1105_v44, %v937_v21 }
 0x1a2   : > { %v1029_v15 = vadd.f32 %v1028_v57, %v860_v35  ;;  %1156 = vmatmul.bf16.gmra.mxu2 %v3527_v0  ;;  %1494 = vmatmul.bf16.gmra.mxu0 %v3527_v0 }
 0x1a3   : > { %vm1968_vm11 = vcmp.ge.f32.partialorder %v1106_v36, 0.0  ;;  %v2160_v46 = vmul.f32 0.01, %v1106_v36  ;;  %1663 = vmatmul.bf16.gmra.mxu1 %v3531_v6 }
 0x1a4   : > { %vm1875_vm12 = vcmp.ge.f32.partialorder %v1029_v15, 0.0  ;;  %v2067_v23 = vmul.f32 0.01, %v1029_v15 }
 0x1a5   : > { %1325 = vmatmul.bf16.gmra.mxu3 %v3531_v6  ;;  %v2352_v24 = vsel %vm1968_vm11, %v1106_v36, %v2160_v46  ;;  %v939_v2 = vpop.f32.mrf.mxu2 }
 0x1a6   : > { %2544 = vst [vmem:[%s3644_s25 + $0x4f8] sm:$0xff] %v2352_v24  ;;  %v2259_v63 = vsel %vm1875_vm12, %v1029_v15, %v2067_v23  ;;  %v940_v39 = vadd.f32 %v939_v2, %v3624_v54 }
 0x1a7   : > { %2451 = vst [vmem:[%s3644_s25 + $0x210] sm:$0xff] %v2259_v63  ;;  %v861_v28 = vpop.f32.mrf.mxu0 }
 0x1a8   : > { %v1108_v4 = vpop.f32.mrf.mxu3  ;;  %v862_v0 = vadd.f32 %v861_v28, %v3624_v54  ;;  %v1030_v40 = vpop.f32.mrf.mxu1 }
 0x1a9   : > { %v1109_v45 = vadd.f32 %v1108_v4, %v940_v39 }
 0x1aa   : > { %v1031_v6 = vadd.f32 %v1030_v40, %v862_v0 }
 0x1ab   : > { %vm1971_vm13 = vcmp.ge.f32.partialorder %v1109_v45, 0.0  ;;  %v2163_v20 = vmul.f32 0.01, %v1109_v45 }
 0x1ac   : > { %vm1878_vm14 = vcmp.ge.f32.partialorder %v1031_v6, 0.0  ;;  %v2070_v42 = vmul.f32 0.01, %v1031_v6 }
 0x1ad   : > { %v2355_v30 = vsel %vm1971_vm13, %v1109_v45, %v2163_v20  ;;  %v941_v12 = vpop.f32.mrf.mxu2 }
 0x1ae   : > { %2547 = vst [vmem:[%s3644_s25 + $0x510] sm:$0xff] %v2355_v30  ;;  %v2262_v55 = vsel %vm1878_vm14, %v1031_v6, %v2070_v42  ;;  %v942_v27 = vadd.f32 %v941_v12, %v3624_v54 }
 0x1af   : > { %2454 = vst [vmem:[%s3644_s25 + $0x228] sm:$0xff] %v2262_v55  ;;  %v864_v21 = vpop.f32.mrf.mxu0 }
 0x1b0   : > { %v1110_v10 = vpop.f32.mrf.mxu3  ;;  %v865_v51 = vadd.f32 %v864_v21, %v3624_v54  ;;  %v1033_v36 = vpop.f32.mrf.mxu1 }
 0x1b1   : > { %v1111_v44 = vadd.f32 %v1110_v10, %v942_v27 }
 0x1b2   : > { %v1034_v57 = vadd.f32 %v1033_v36, %v865_v51  ;;  %1161 = vmatmul.bf16.gmra.mxu2 %v3547_v16  ;;  %1499 = vmatmul.bf16.gmra.mxu0 %v3547_v16 }
 0x1b3   : > { %vm1974_vm15 = vcmp.ge.f32.partialorder %v1111_v44, 0.0  ;;  %v2166_v35 = vmul.f32 0.01, %v1111_v44  ;;  %1668 = vmatmul.bf16.gmra.mxu1 %v3551_v18 }
 0x1b4   : > { %vm1881_vm0 = vcmp.ge.f32.partialorder %v1034_v57, 0.0  ;;  %v2073_v15 = vmul.f32 0.01, %v1034_v57 }
 0x1b5   : > { %1330 = vmatmul.bf16.gmra.mxu3 %v3551_v18  ;;  %v2358_v46 = vsel %vm1974_vm15, %v1111_v44, %v2166_v35  ;;  %v944_v24 = vpop.f32.mrf.mxu2 }
 0x1b6   : > { %2550 = vst [vmem:[%s3644_s25 + $0x528] sm:$0xff] %v2358_v46  ;;  %v2265_v23 = vsel %vm1881_vm0, %v1034_v57, %v2073_v15  ;;  %v945_v2 = vadd.f32 %v944_v24, %v3624_v54 }
 0x1b7   : > { %2457 = vst [vmem:[%s3644_s25 + $0x240] sm:$0xff] %v2265_v23  ;;  %v866_v39 = vpop.f32.mrf.mxu0 }
 0x1b8   : > { %v1113_v63 = vpop.f32.mrf.mxu3  ;;  %v867_v16 = vadd.f32 %v866_v39, %v3624_v54  ;;  %v1035_v28 = vpop.f32.mrf.mxu1 }
 0x1b9   : > { %v1114_v4 = vadd.f32 %v1113_v63, %v945_v2 }
 0x1ba   : > { %v1036_v18 = vadd.f32 %v1035_v28, %v867_v16 }
 0x1bb   : > { %vm1977_vm1 = vcmp.ge.f32.partialorder %v1114_v4, 0.0  ;;  %v2169_v45 = vmul.f32 0.01, %v1114_v4 }
 0x1bc   : > { %vm1884_vm2 = vcmp.ge.f32.partialorder %v1036_v18, 0.0  ;;  %v2076_v40 = vmul.f32 0.01, %v1036_v18 }
 0x1bd   : > { %v2361_v0 = vsel %vm1977_vm1, %v1114_v4, %v2169_v45  ;;  %v946_v20 = vpop.f32.mrf.mxu2 }
 0x1be   : > { %2553 = vst [vmem:[%s3644_s25 + $0x540] sm:$0xff] %v2361_v0  ;;  %v2268_v6 = vsel %vm1884_vm2, %v1036_v18, %v2076_v40  ;;  %v947_v30 = vadd.f32 %v946_v20, %v3624_v54 }
 0x1bf   : > { %2460 = vst [vmem:[%s3644_s25 + $0x258] sm:$0xff] %v2268_v6  ;;  %v869_v12 = vpop.f32.mrf.mxu0 }
 0x1c0   : > { %v1115_v42 = vpop.f32.mrf.mxu3  ;;  %v870_v27 = vadd.f32 %v869_v12, %v3624_v54  ;;  %v1038_v10 = vpop.f32.mrf.mxu1 }
 0x1c1   : > { %v1116_v55 = vadd.f32 %v1115_v42, %v947_v30 }
 0x1c2   : > { %v1039_v44 = vadd.f32 %v1038_v10, %v870_v27  ;;  %1166 = vmatmul.bf16.gmra.mxu2 %v3567_v48  ;;  %1504 = vmatmul.bf16.gmra.mxu0 %v3567_v48 }
 0x1c3   : > { %vm1980_vm3 = vcmp.ge.f32.partialorder %v1116_v55, 0.0  ;;  %v2172_v21 = vmul.f32 0.01, %v1116_v55  ;;  %1673 = vmatmul.bf16.gmra.mxu1 %v3571_v50 }
 0x1c4   : > { %vm1887_vm4 = vcmp.ge.f32.partialorder %v1039_v44, 0.0  ;;  %v2079_v36 = vmul.f32 0.01, %v1039_v44 }
 0x1c5   : > { %1335 = vmatmul.bf16.gmra.mxu3 %v3571_v50  ;;  %v2364_v51 = vsel %vm1980_vm3, %v1116_v55, %v2172_v21  ;;  %v949_v35 = vpop.f32.mrf.mxu2 }
 0x1c6   : > { %2556 = vst [vmem:[%s3644_s25 + $0x558] sm:$0xff] %v2364_v51  ;;  %v2271_v57 = vsel %vm1887_vm4, %v1039_v44, %v2079_v36  ;;  %v950_v46 = vadd.f32 %v949_v35, %v3624_v54 }
 0x1c7   : > { %2463 = vst [vmem:[%s3644_s25 + $0x270] sm:$0xff] %v2271_v57  ;;  %v871_v24 = vpop.f32.mrf.mxu0 }
 0x1c8   : > { %v1118_v15 = vpop.f32.mrf.mxu3  ;;  %v872_v48 = vadd.f32 %v871_v24, %v3624_v54  ;;  %v1040_v2 = vpop.f32.mrf.mxu1 }
 0x1c9   : > { %v1119_v23 = vadd.f32 %v1118_v15, %v950_v46 }
 0x1ca   : > { %v1041_v50 = vadd.f32 %v1040_v2, %v872_v48 }
 0x1cb   : > { %vm1983_vm5 = vcmp.ge.f32.partialorder %v1119_v23, 0.0  ;;  %v2175_v63 = vmul.f32 0.01, %v1119_v23 }
 0x1cc   : > { %vm1890_vm6 = vcmp.ge.f32.partialorder %v1041_v50, 0.0  ;;  %v2082_v4 = vmul.f32 0.01, %v1041_v50 }
 0x1cd   : > { %v2367_v39 = vsel %vm1983_vm5, %v1119_v23, %v2175_v63  ;;  %v951_v16 = vpop.f32.mrf.mxu2 }
 0x1ce   : > { %2559 = vst [vmem:[%s3644_s25 + $0x570] sm:$0xff] %v2367_v39  ;;  %v2274_v28 = vsel %vm1890_vm6, %v1041_v50, %v2082_v4  ;;  %v952_v45 = vadd.f32 %v951_v16, %v3624_v54 }
 0x1cf   : > { %2466 = vst [vmem:[%s3644_s25 + $0x288] sm:$0xff] %v2274_v28  ;;  %v874_v0 = vpop.f32.mrf.mxu0 }
 0x1d0   : > { %v1120_v18 = vpop.f32.mrf.mxu3  ;;  %v875_v20 = vadd.f32 %v874_v0, %v3624_v54  ;;  %v1043_v6 = vpop.f32.mrf.mxu1 }
 0x1d1   : > { %v1121_v40 = vadd.f32 %v1120_v18, %v952_v45 }
 0x1d2   : > { %v1044_v42 = vadd.f32 %v1043_v6, %v875_v20  ;;  %1171 = vmatmul.bf16.gmra.mxu2 %v3587_v60  ;;  %1509 = vmatmul.bf16.gmra.mxu0 %v3587_v60 }
 0x1d3   : > { %vm1986_vm7 = vcmp.ge.f32.partialorder %v1121_v40, 0.0  ;;  %v2178_v30 = vmul.f32 0.01, %v1121_v40  ;;  %1678 = vmatmul.bf16.gmra.mxu1 %v3591_v62 }
 0x1d4   : > { %vm1893_vm8 = vcmp.ge.f32.partialorder %v1044_v42, 0.0  ;;  %v2085_v55 = vmul.f32 0.01, %v1044_v42 }
 0x1d5   : > { %1340 = vmatmul.bf16.gmra.mxu3 %v3591_v62  ;;  %v2370_v12 = vsel %vm1986_vm7, %v1121_v40, %v2178_v30  ;;  %v954_v27 = vpop.f32.mrf.mxu2 }
 0x1d6   : > { %2562 = vst [vmem:[%s3644_s25 + $0x588] sm:$0xff] %v2370_v12  ;;  %v2277_v10 = vsel %vm1893_vm8, %v1044_v42, %v2085_v55  ;;  %v955_v21 = vadd.f32 %v954_v27, %v3624_v54 }
 0x1d7   : > { %2469 = vst [vmem:[%s3644_s25 + $0x2a0] sm:$0xff] %v2277_v10  ;;  %v876_v51 = vpop.f32.mrf.mxu0 }
 0x1d8   : > { %v1123_v44 = vpop.f32.mrf.mxu3  ;;  %v877_v60 = vadd.f32 %v876_v51, %v3624_v54  ;;  %v1045_v35 = vpop.f32.mrf.mxu1 }
 0x1d9   : > { %v1124_v36 = vadd.f32 %v1123_v44, %v955_v21  ;;  %v3082_v21 = vld [vmem:[#allocation7] sm:$0x7] }
 0x1da   : > { %v1046_v62 = vadd.f32 %v1045_v35, %v877_v60  ;;  %v3940_v44 = vperm.slane %v3082_v21, 2 }
 0x1db   : > { %vm1989_vm9 = vcmp.ge.f32.partialorder %v1124_v36, 0.0  ;;  %v2181_v57 = vmul.f32 0.01, %v1124_v36 }
 0x1dc   : > { %vm1896_vm10 = vcmp.ge.f32.partialorder %v1046_v62, 0.0  ;;  %v2088_v15 = vmul.f32 0.01, %v1046_v62 }
 0x1dd   : > { %v2373_v46 = vsel %vm1989_vm9, %v1124_v36, %v2181_v57  ;;  %v956_v24 = vpop.f32.mrf.mxu2 }
 0x1de   : > { %2565 = vst [vmem:[%s3644_s25 + $0x5a0] sm:$0xff] %v2373_v46  ;;  %v2280_v23 = vsel %vm1896_vm10, %v1046_v62, %v2088_v15  ;;  %v957_v48 = vadd.f32 %v956_v24, %v3624_v54 }
 0x1df   : > { %2472 = vst [vmem:[%s3644_s25 + $0x2b8] sm:$0xff] %v2280_v23  ;;  %v879_v63 = vpop.f32.mrf.mxu0 }
 0x1e0   : > { %v1125_v2 = vpop.f32.mrf.mxu3  ;;  %v880_v39 = vadd.f32 %v879_v63, %v3624_v54  ;;  %v1048_v4 = vpop.f32.mrf.mxu1 }
 0x1e1   : > { %v1126_v50 = vadd.f32 %v1125_v2, %v957_v48  ;;  %v3948_v48 = vperm.slane %v3082_v21, 1 }
 0x1e2   : > { %v1049_v28 = vadd.f32 %v1048_v4, %v880_v39  ;;  %1176 = vmatmul.bf16.gmra.mxu2 %v3607_v26  ;;  %1514 = vmatmul.bf16.gmra.mxu0 %v3607_v26 }
 0x1e3   : > { %vm1992_vm11 = vcmp.ge.f32.partialorder %v1126_v50, 0.0  ;;  %v2184_v16 = vmul.f32 0.01, %v1126_v50  ;;  %1683 = vmatmul.bf16.gmra.mxu1 %v3611_v32 }
 0x1e4   : > { %vm1899_vm12 = vcmp.ge.f32.partialorder %v1049_v28, 0.0  ;;  %v2091_v18 = vmul.f32 0.01, %v1049_v28 }
 0x1e5   : > { %1345 = vmatmul.bf16.gmra.mxu3 %v3611_v32  ;;  %v2376_v45 = vsel %vm1992_vm11, %v1126_v50, %v2184_v16  ;;  %v959_v0 = vpop.f32.mrf.mxu2 }
 0x1e6   : > { %2568 = vst [vmem:[%s3644_s25 + $0x5b8] sm:$0xff] %v2376_v45  ;;  %v2283_v40 = vsel %vm1899_vm12, %v1049_v28, %v2091_v18  ;;  %v960_v20 = vadd.f32 %v959_v0, %v3624_v54 }
 0x1e7   : > { %2475 = vst [vmem:[%s3644_s25 + $0x2d0] sm:$0xff] %v2283_v40  ;;  %v881_v30 = vpop.f32.mrf.mxu0 }
 0x1e8   : > { %v1128_v6 = vpop.f32.mrf.mxu3  ;;  %v882_v26 = vadd.f32 %v881_v30, %v3624_v54  ;;  %v1050_v12 = vpop.f32.mrf.mxu1 }
 0x1e9   : > { %v1129_v42 = vadd.f32 %v1128_v6, %v960_v20 }
 0x1ea   : > { %v1051_v32 = vadd.f32 %v1050_v12, %v882_v26 }
 0x1eb   : > { %vm1995_vm13 = vcmp.ge.f32.partialorder %v1129_v42, 0.0  ;;  %v2187_v55 = vmul.f32 0.01, %v1129_v42 }
 0x1ec   : > { %vm1902_vm14 = vcmp.ge.f32.partialorder %v1051_v32, 0.0  ;;  %v2094_v10 = vmul.f32 0.01, %v1051_v32 }
 0x1ed   : > { %v2379_v27 = vsel %vm1995_vm13, %v1129_v42, %v2187_v55  ;;  %v961_v51 = vpop.f32.mrf.mxu2 }
 0x1ee   : > { %2571 = vst [vmem:[%s3644_s25 + $0x5d0] sm:$0xff] %v2379_v27  ;;  %v2286_v36 = vsel %vm1902_vm14, %v1051_v32, %v2094_v10  ;;  %v962_v60 = vadd.f32 %v961_v51, %v3624_v54 }
 0x1ef   : > { %2478 = vst [vmem:[%s3644_s25 + $0x2e8] sm:$0xff] %v2286_v36  ;;  %v1480_v57 = vpop.f32.mrf.mxu0 }
 0x1f0   : > { %v1130_v35 = vpop.f32.mrf.mxu3  ;;  %v1481_v46 = vadd.f32 %v1480_v57, %v3940_v44  ;;  %v1649_v15 = vpop.f32.mrf.mxu1 }
 0x1f1   : > { %v1131_v62 = vadd.f32 %v1130_v35, %v962_v60 }
 0x1f2   : > { %v1650_v23 = vadd.f32 %v1649_v15, %v1481_v46  ;;  %1181 = vmatmul.bf16.gmra.mxu2 %v3629_v58  ;;  %1519 = vmatmul.bf16.gmra.mxu0 %v3629_v58 }
 0x1f3   : > { %vm1998_vm15 = vcmp.ge.f32.partialorder %v1131_v62, 0.0  ;;  %v2190_v24 = vmul.f32 0.01, %v1131_v62  ;;  %1688 = vmatmul.bf16.gmra.mxu1 %v3633_v9 }
 0x1f4   : > { %vm1811_vm0 = vcmp.ge.f32.partialorder %v1650_v23, 0.0  ;;  %v2003_v2 = vmul.f32 0.01, %v1650_v23 }
 0x1f5   : > { %1350 = vmatmul.bf16.gmra.mxu3 %v3633_v9  ;;  %v2382_v54 = vsel %vm1998_vm15, %v1131_v62, %v2190_v24  ;;  %v1142_v63 = vpop.f32.mrf.mxu2 }
 0x1f6   : > { %2574 = vst [vmem:[%s3644_s25 + $0x5e8] sm:$0xff] %v2382_v54  ;;  %v2195_v50 = vsel %vm1811_vm0, %v1650_v23, %v2003_v2  ;;  %v1143_v39 = vadd.f32 %v1142_v63, %v3948_v48 }
 0x1f7   : > { %2387 = vst [vmem:[%s3644_s25 + $0x10] sm:$0xff] %v2195_v50  ;;  %v1482_v16 = vpop.f32.mrf.mxu0 }
 0x1f8   : > { %v1311_v4 = vpop.f32.mrf.mxu3  ;;  %v1483_v28 = vadd.f32 %v1482_v16, %v3940_v44  ;;  %v1651_v45 = vpop.f32.mrf.mxu1 }
 0x1f9   : > { %v1312_v58 = vadd.f32 %v1311_v4, %v1143_v39 }
 0x1fa   : > { %v1652_v9 = vadd.f32 %v1651_v45, %v1483_v28 }
 0x1fb   : > { %vm1810_vm1 = vcmp.ge.f32.partialorder %v1312_v58, 0.0  ;;  %v2002_v18 = vmul.f32 0.01, %v1312_v58 }
 0x1fc   : > { %vm1814_vm2 = vcmp.ge.f32.partialorder %v1652_v9, 0.0  ;;  %v2006_v40 = vmul.f32 0.01, %v1652_v9 }
 0x1fd   : > { %v2194_v0 = vsel %vm1810_vm1, %v1312_v58, %v2002_v18  ;;  %v1144_v20 = vpop.f32.mrf.mxu2 }
 0x1fe   : > { %2386 = vst [vmem:[%s3644_s25 + $0x8] sm:$0xff] %v2194_v0  ;;  %v2198_v6 = vsel %vm1814_vm2, %v1652_v9, %v2006_v40  ;;  %v1145_v30 = vadd.f32 %v1144_v20, %v3948_v48 }
 0x1ff   : > { %2390 = vst [vmem:[%s3644_s25 + $0x28] sm:$0xff] %v2198_v6  ;;  %v1485_v26 = vpop.f32.mrf.mxu0 }
 0x200   : > { %v1313_v42 = vpop.f32.mrf.mxu3  ;;  %v1486_v55 = vadd.f32 %v1485_v26, %v3940_v44  ;;  %v1654_v32 = vpop.f32.mrf.mxu1 }
 0x201   : > { %v1314_v12 = vadd.f32 %v1313_v42, %v1145_v30 }
 0x202   : > { %v1655_v10 = vadd.f32 %v1654_v32, %v1486_v55  ;;  %1186 = vmatmul.bf16.gmra.mxu2 %v3658_v22  ;;  %1524 = vmatmul.bf16.gmra.mxu0 %v3658_v22 }
 0x203   : > { %vm1813_vm3 = vcmp.ge.f32.partialorder %v1314_v12, 0.0  ;;  %v2005_v27 = vmul.f32 0.01, %v1314_v12  ;;  %1693 = vmatmul.bf16.gmra.mxu1 %v3663_v25 }
 0x204   : > { %vm1817_vm4 = vcmp.ge.f32.partialorder %v1655_v10, 0.0  ;;  %v2009_v51 = vmul.f32 0.01, %v1655_v10 }
 0x205   : > { %1355 = vmatmul.bf16.gmra.mxu3 %v3663_v25  ;;  %v2197_v21 = vsel %vm1813_vm3, %v1314_v12, %v2005_v27  ;;  %v1147_v36 = vpop.f32.mrf.mxu2 }
 0x206   : > { %2389 = vst [vmem:[%s3644_s25 + $0x20] sm:$0xff] %v2197_v21  ;;  %v2201_v60 = vsel %vm1817_vm4, %v1655_v10, %v2009_v51  ;;  %v1148_v35 = vadd.f32 %v1147_v36, %v3948_v48 }
 0x207   : > { %2393 = vst [vmem:[%s3644_s25 + $0x40] sm:$0xff] %v2201_v60  ;;  %v1487_v62 = vpop.f32.mrf.mxu0 }
 0x208   : > { %v1316_v57 = vpop.f32.mrf.mxu3  ;;  %v1488_v22 = vadd.f32 %v1487_v62, %v3940_v44  ;;  %v1656_v15 = vpop.f32.mrf.mxu1 }
 0x209   : > { %v1317_v46 = vadd.f32 %v1316_v57, %v1148_v35 }
 0x20a   : > { %v1657_v25 = vadd.f32 %v1656_v15, %v1488_v22 }
 0x20b   : > { %vm1816_vm5 = vcmp.ge.f32.partialorder %v1317_v46, 0.0  ;;  %v2008_v24 = vmul.f32 0.01, %v1317_v46 }
 0x20c   : > { %vm1820_vm6 = vcmp.ge.f32.partialorder %v1657_v25, 0.0  ;;  %v2012_v54 = vmul.f32 0.01, %v1657_v25 }
 0x20d   : > { %v2200_v23 = vsel %vm1816_vm5, %v1317_v46, %v2008_v24  ;;  %v1149_v2 = vpop.f32.mrf.mxu2 }
 0x20e   : > { %2392 = vst [vmem:[%s3644_s25 + $0x38] sm:$0xff] %v2200_v23  ;;  %v2204_v63 = vsel %vm1820_vm6, %v1657_v25, %v2012_v54  ;;  %v1150_v50 = vadd.f32 %v1149_v2, %v3948_v48 }
 0x20f   : > { %2396 = vst [vmem:[%s3644_s25 + $0x58] sm:$0xff] %v2204_v63  ;;  %v1490_v4 = vpop.f32.mrf.mxu0 }
 0x210   : > { %v1318_v39 = vpop.f32.mrf.mxu3  ;;  %v1491_v58 = vadd.f32 %v1490_v4, %v3940_v44  ;;  %v1659_v28 = vpop.f32.mrf.mxu1 }
 0x211   : > { %v1319_v16 = vadd.f32 %v1318_v39, %v1150_v50 }
 0x212   : > { %v1660_v18 = vadd.f32 %v1659_v28, %v1491_v58  ;;  %1191 = vmatmul.bf16.gmra.mxu2 %v3686_v8  ;;  %1529 = vmatmul.bf16.gmra.mxu0 %v3686_v8 }
 0x213   : > { %vm1819_vm7 = vcmp.ge.f32.partialorder %v1319_v16, 0.0  ;;  %v2011_v45 = vmul.f32 0.01, %v1319_v16  ;;  %1698 = vmatmul.bf16.gmra.mxu1 %v3691_v13 }
 0x214   : > { %vm1823_vm8 = vcmp.ge.f32.partialorder %v1660_v18, 0.0  ;;  %v2015_v0 = vmul.f32 0.01, %v1660_v18 }
 0x215   : > { %1360 = vmatmul.bf16.gmra.mxu3 %v3691_v13  ;;  %v2203_v9 = vsel %vm1819_vm7, %v1319_v16, %v2011_v45  ;;  %v1152_v40 = vpop.f32.mrf.mxu2 }
 0x216   : > { %2395 = vst [vmem:[%s3644_s25 + $0x50] sm:$0xff] %v2203_v9  ;;  %v2207_v20 = vsel %vm1823_vm8, %v1660_v18, %v2015_v0  ;;  %v1153_v6 = vadd.f32 %v1152_v40, %v3948_v48 }
 0x217   : > { %2399 = vst [vmem:[%s3644_s25 + $0x70] sm:$0xff] %v2207_v20  ;;  %v1492_v42 = vpop.f32.mrf.mxu0 }
 0x218   : > { %v1321_v30 = vpop.f32.mrf.mxu3  ;;  %v1493_v8 = vadd.f32 %v1492_v42, %v3940_v44  ;;  %v1661_v12 = vpop.f32.mrf.mxu1 }
 0x219   : > { %v1322_v26 = vadd.f32 %v1321_v30, %v1153_v6 }
 0x21a   : > { %v1662_v13 = vadd.f32 %v1661_v12, %v1493_v8 }
 0x21b   : > { %vm1822_vm9 = vcmp.ge.f32.partialorder %v1322_v26, 0.0  ;;  %v2014_v55 = vmul.f32 0.01, %v1322_v26 }
 0x21c   : > { %vm1826_vm10 = vcmp.ge.f32.partialorder %v1662_v13, 0.0  ;;  %v2018_v27 = vmul.f32 0.01, %v1662_v13 }
 0x21d   : > { %v2206_v32 = vsel %vm1822_vm9, %v1322_v26, %v2014_v55  ;;  %v1154_v10 = vpop.f32.mrf.mxu2 }
 0x21e   : > { %2398 = vst [vmem:[%s3644_s25 + $0x68] sm:$0xff] %v2206_v32  ;;  %v2210_v21 = vsel %vm1826_vm10, %v1662_v13, %v2018_v27  ;;  %v1155_v51 = vadd.f32 %v1154_v10, %v3948_v48 }
 0x21f   : > { %2402 = vst [vmem:[%s3644_s25 + $0x88] sm:$0xff] %v2210_v21  ;;  %v1495_v60 = vpop.f32.mrf.mxu0 }
 0x220   : > { %v1323_v36 = vpop.f32.mrf.mxu3  ;;  %v1496_v57 = vadd.f32 %v1495_v60, %v3940_v44  ;;  %v1664_v62 = vpop.f32.mrf.mxu1 }
 0x221   : > { %v1324_v35 = vadd.f32 %v1323_v36, %v1155_v51 }
 0x222   : > { %v1665_v22 = vadd.f32 %v1664_v62, %v1496_v57  ;;  %1196 = vmatmul.bf16.gmra.mxu2 %v3714_v56  ;;  %1534 = vmatmul.bf16.gmra.mxu0 %v3714_v56 }
 0x223   : > { %vm1825_vm11 = vcmp.ge.f32.partialorder %v1324_v35, 0.0  ;;  %v2017_v46 = vmul.f32 0.01, %v1324_v35  ;;  %1703 = vmatmul.bf16.gmra.mxu1 %v3719_v34 }
 0x224   : > { %vm1829_vm12 = vcmp.ge.f32.partialorder %v1665_v22, 0.0  ;;  %v2021_v24 = vmul.f32 0.01, %v1665_v22 }
 0x225   : > { %1365 = vmatmul.bf16.gmra.mxu3 %v3719_v34  ;;  %v2209_v15 = vsel %vm1825_vm11, %v1324_v35, %v2017_v46  ;;  %v1157_v25 = vpop.f32.mrf.mxu2 }
 0x226   : > { %2401 = vst [vmem:[%s3644_s25 + $0x80] sm:$0xff] %v2209_v15  ;;  %v2213_v23 = vsel %vm1829_vm12, %v1665_v22, %v2021_v24  ;;  %v1158_v54 = vadd.f32 %v1157_v25, %v3948_v48 }
 0x227   : > { %2405 = vst [vmem:[%s3644_s25 + $0xa0] sm:$0xff] %v2213_v23  ;;  %v1497_v63 = vpop.f32.mrf.mxu0 }
 0x228   : > { %v1326_v2 = vpop.f32.mrf.mxu3  ;;  %v1498_v56 = vadd.f32 %v1497_v63, %v3940_v44  ;;  %v1666_v39 = vpop.f32.mrf.mxu1 }
 0x229   : > { %v1327_v50 = vadd.f32 %v1326_v2, %v1158_v54 }
 0x22a   : > { %v1667_v34 = vadd.f32 %v1666_v39, %v1498_v56 }
 0x22b   : > { %vm1828_vm13 = vcmp.ge.f32.partialorder %v1327_v50, 0.0  ;;  %v2020_v4 = vmul.f32 0.01, %v1327_v50 }
 0x22c   : > { %vm1832_vm14 = vcmp.ge.f32.partialorder %v1667_v34, 0.0  ;;  %v2024_v58 = vmul.f32 0.01, %v1667_v34 }
 0x22d   : > { %v2212_v16 = vsel %vm1828_vm13, %v1327_v50, %v2020_v4  ;;  %v1159_v28 = vpop.f32.mrf.mxu2 }
 0x22e   : > { %2404 = vst [vmem:[%s3644_s25 + $0x98] sm:$0xff] %v2212_v16  ;;  %v2216_v45 = vsel %vm1832_vm14, %v1667_v34, %v2024_v58  ;;  %v1160_v18 = vadd.f32 %v1159_v28, %v3948_v48 }
 0x22f   : > { %2408 = vst [vmem:[%s3644_s25 + $0xb8] sm:$0xff] %v2216_v45  ;;  %v1500_v0 = vpop.f32.mrf.mxu0 }
 0x230   : > { %v1328_v9 = vpop.f32.mrf.mxu3  ;;  %v1501_v20 = vadd.f32 %v1500_v0, %v3940_v44  ;;  %v1669_v6 = vpop.f32.mrf.mxu1 }
 0x231   : > { %v1329_v40 = vadd.f32 %v1328_v9, %v1160_v18 }
 0x232   : > { %v1670_v42 = vadd.f32 %v1669_v6, %v1501_v20  ;;  %1201 = vmatmul.bf16.gmra.mxu2 %v3742_v47  ;;  %1539 = vmatmul.bf16.gmra.mxu0 %v3742_v47 }
 0x233   : > { %vm1831_vm15 = vcmp.ge.f32.partialorder %v1329_v40, 0.0  ;;  %v2023_v30 = vmul.f32 0.01, %v1329_v40  ;;  %1708 = vmatmul.bf16.gmra.mxu1 %v3747_v53 }
 0x234   : > { %vm1835_vm0 = vcmp.ge.f32.partialorder %v1670_v42, 0.0  ;;  %v2027_v8 = vmul.f32 0.01, %v1670_v42 }
 0x235   : > { %1370 = vmatmul.bf16.gmra.mxu3 %v3747_v53  ;;  %v2215_v26 = vsel %vm1831_vm15, %v1329_v40, %v2023_v30  ;;  %v1162_v12 = vpop.f32.mrf.mxu2 }
 0x236   : > { %2407 = vst [vmem:[%s3644_s25 + $0xb0] sm:$0xff] %v2215_v26  ;;  %v2219_v55 = vsel %vm1835_vm0, %v1670_v42, %v2027_v8  ;;  %v1163_v13 = vadd.f32 %v1162_v12, %v3948_v48 }
 0x237   : > { %2411 = vst [vmem:[%s3644_s25 + $0xd0] sm:$0xff] %v2219_v55  ;;  %v1502_v27 = vpop.f32.mrf.mxu0 }
 0x238   : > { %v1331_v32 = vpop.f32.mrf.mxu3  ;;  %v1503_v47 = vadd.f32 %v1502_v27, %v3940_v44  ;;  %v1671_v21 = vpop.f32.mrf.mxu1 }
 0x239   : > { %v1332_v10 = vadd.f32 %v1331_v32, %v1163_v13 }
 0x23a   : > { %v1672_v53 = vadd.f32 %v1671_v21, %v1503_v47 }
 0x23b   : > { %vm1834_vm1 = vcmp.ge.f32.partialorder %v1332_v10, 0.0  ;;  %v2026_v51 = vmul.f32 0.01, %v1332_v10 }
 0x23c   : > { %vm1838_vm2 = vcmp.ge.f32.partialorder %v1672_v53, 0.0  ;;  %v2030_v60 = vmul.f32 0.01, %v1672_v53 }
 0x23d   : > { %v2218_v36 = vsel %vm1834_vm1, %v1332_v10, %v2026_v51  ;;  %v1164_v35 = vpop.f32.mrf.mxu2 }
 0x23e   : > { %2410 = vst [vmem:[%s3644_s25 + $0xc8] sm:$0xff] %v2218_v36  ;;  %v2222_v57 = vsel %vm1838_vm2, %v1672_v53, %v2030_v60  ;;  %v1165_v62 = vadd.f32 %v1164_v35, %v3948_v48 }
 0x23f   : > { %2414 = vst [vmem:[%s3644_s25 + $0xe8] sm:$0xff] %v2222_v57  ;;  %v1505_v22 = vpop.f32.mrf.mxu0 }
 0x240   : > { %v1333_v46 = vpop.f32.mrf.mxu3  ;;  %v1506_v24 = vadd.f32 %v1505_v22, %v3940_v44  ;;  %v1674_v25 = vpop.f32.mrf.mxu1 }
 0x241   : > { %v1334_v15 = vadd.f32 %v1333_v46, %v1165_v62 }
 0x242   : > { %v1675_v54 = vadd.f32 %v1674_v25, %v1506_v24  ;;  %1206 = vmatmul.bf16.gmra.mxu2 %v3770_v38  ;;  %1544 = vmatmul.bf16.gmra.mxu0 %v3770_v38 }
 0x243   : > { %vm1837_vm3 = vcmp.ge.f32.partialorder %v1334_v15, 0.0  ;;  %v2029_v23 = vmul.f32 0.01, %v1334_v15  ;;  %1713 = vmatmul.bf16.gmra.mxu1 %v3775_v33 }
 0x244   : > { %vm1841_vm4 = vcmp.ge.f32.partialorder %v1675_v54, 0.0  ;;  %v2033_v63 = vmul.f32 0.01, %v1675_v54 }
 0x245   : > { %1375 = vmatmul.bf16.gmra.mxu3 %v3775_v33  ;;  %v2221_v2 = vsel %vm1837_vm3, %v1334_v15, %v2029_v23  ;;  %v1167_v50 = vpop.f32.mrf.mxu2 }
 0x246   : > { %2413 = vst [vmem:[%s3644_s25 + $0xe0] sm:$0xff] %v2221_v2  ;;  %v2225_v56 = vsel %vm1841_vm4, %v1675_v54, %v2033_v63  ;;  %v1168_v39 = vadd.f32 %v1167_v50, %v3948_v48 }
 0x247   : > { %2417 = vst [vmem:[%s3644_s25 + $0x100] sm:$0xff] %v2225_v56  ;;  %v1507_v34 = vpop.f32.mrf.mxu0 }
 0x248   : > { %v1336_v4 = vpop.f32.mrf.mxu3  ;;  %v1508_v38 = vadd.f32 %v1507_v34, %v3940_v44  ;;  %v1676_v58 = vpop.f32.mrf.mxu1 }
 0x249   : > { %v1337_v16 = vadd.f32 %v1336_v4, %v1168_v39 }
 0x24a   : > { %v1677_v33 = vadd.f32 %v1676_v58, %v1508_v38 }
 0x24b   : > { %vm1840_vm5 = vcmp.ge.f32.partialorder %v1337_v16, 0.0  ;;  %v2032_v28 = vmul.f32 0.01, %v1337_v16 }
 0x24c   : > { %vm1844_vm6 = vcmp.ge.f32.partialorder %v1677_v33, 0.0  ;;  %v2036_v18 = vmul.f32 0.01, %v1677_v33 }
 0x24d   : > { %v2224_v45 = vsel %vm1840_vm5, %v1337_v16, %v2032_v28  ;;  %v1169_v9 = vpop.f32.mrf.mxu2 }
 0x24e   : > { %2416 = vst [vmem:[%s3644_s25 + $0xf8] sm:$0xff] %v2224_v45  ;;  %v2228_v0 = vsel %vm1844_vm6, %v1677_v33, %v2036_v18  ;;  %v1170_v40 = vadd.f32 %v1169_v9, %v3948_v48 }
 0x24f   : > { %2420 = vst [vmem:[%s3644_s25 + $0x118] sm:$0xff] %v2228_v0  ;;  %v1510_v6 = vpop.f32.mrf.mxu0 }
 0x250   : > { %v1338_v20 = vpop.f32.mrf.mxu3  ;;  %v1511_v42 = vadd.f32 %v1510_v6, %v3940_v44  ;;  %v1679_v26 = vpop.f32.mrf.mxu1 }
 0x251   : > { %v1339_v30 = vadd.f32 %v1338_v20, %v1170_v40 }
 0x252   : > { %v1680_v12 = vadd.f32 %v1679_v26, %v1511_v42  ;;  %1211 = vmatmul.bf16.gmra.mxu2 %v3798_v14  ;;  %1549 = vmatmul.bf16.gmra.mxu0 %v3798_v14 }
 0x253   : > { %vm1843_vm7 = vcmp.ge.f32.partialorder %v1339_v30, 0.0  ;;  %v2035_v8 = vmul.f32 0.01, %v1339_v30  ;;  %1718 = vmatmul.bf16.gmra.mxu1 %v3803_v37 }
 0x254   : > { %vm1847_vm8 = vcmp.ge.f32.partialorder %v1680_v12, 0.0  ;;  %v2039_v13 = vmul.f32 0.01, %v1680_v12 }
 0x255   : > { %1380 = vmatmul.bf16.gmra.mxu3 %v3803_v37  ;;  %v2227_v55 = vsel %vm1843_vm7, %v1339_v30, %v2035_v8  ;;  %v1172_v32 = vpop.f32.mrf.mxu2 }
 0x256   : > { %2419 = vst [vmem:[%s3644_s25 + $0x110] sm:$0xff] %v2227_v55  ;;  %v2231_v27 = vsel %vm1847_vm8, %v1680_v12, %v2039_v13  ;;  %v1173_v10 = vadd.f32 %v1172_v32, %v3948_v48 }
 0x257   : > { %2423 = vst [vmem:[%s3644_s25 + $0x130] sm:$0xff] %v2231_v27  ;;  %v1512_v21 = vpop.f32.mrf.mxu0 }
 0x258   : > { %v1341_v47 = vpop.f32.mrf.mxu3  ;;  %v1513_v14 = vadd.f32 %v1512_v21, %v3940_v44  ;;  %v1681_v53 = vpop.f32.mrf.mxu1 }
 0x259   : > { %v1342_v51 = vadd.f32 %v1341_v47, %v1173_v10 }
 0x25a   : > { %v1682_v37 = vadd.f32 %v1681_v53, %v1513_v14 }
 0x25b   : > { %vm1846_vm9 = vcmp.ge.f32.partialorder %v1342_v51, 0.0  ;;  %v2038_v36 = vmul.f32 0.01, %v1342_v51 }
 0x25c   : > { %vm1850_vm10 = vcmp.ge.f32.partialorder %v1682_v37, 0.0  ;;  %v2042_v35 = vmul.f32 0.01, %v1682_v37 }
 0x25d   : > { %v2230_v60 = vsel %vm1846_vm9, %v1342_v51, %v2038_v36  ;;  %v1174_v57 = vpop.f32.mrf.mxu2 }
 0x25e   : > { %2422 = vst [vmem:[%s3644_s25 + $0x128] sm:$0xff] %v2230_v60  ;;  %v2234_v62 = vsel %vm1850_vm10, %v1682_v37, %v2042_v35  ;;  %v1175_v46 = vadd.f32 %v1174_v57, %v3948_v48 }
 0x25f   : > { %2426 = vst [vmem:[%s3644_s25 + $0x148] sm:$0xff] %v2234_v62  ;;  %v1515_v15 = vpop.f32.mrf.mxu0 }
 0x260   : > { %v1343_v22 = vpop.f32.mrf.mxu3  ;;  %v1516_v25 = vadd.f32 %v1515_v15, %v3940_v44  ;;  %v1684_v23 = vpop.f32.mrf.mxu1 }
 0x261   : > { %v1344_v24 = vadd.f32 %v1343_v22, %v1175_v46 }
 0x262   : > { %v1685_v2 = vadd.f32 %v1684_v23, %v1516_v25  ;;  %1216 = vmatmul.bf16.gmra.mxu2 %v3826_v11  ;;  %1554 = vmatmul.bf16.gmra.mxu0 %v3826_v11 }
 0x263   : > { %vm1849_vm11 = vcmp.ge.f32.partialorder %v1344_v24, 0.0  ;;  %v2041_v54 = vmul.f32 0.01, %v1344_v24  ;;  %1723 = vmatmul.bf16.gmra.mxu1 %v3831_v61 }
 0x264   : > { %vm1853_vm12 = vcmp.ge.f32.partialorder %v1685_v2, 0.0  ;;  %v2045_v50 = vmul.f32 0.01, %v1685_v2 }
 0x265   : > { %1385 = vmatmul.bf16.gmra.mxu3 %v3831_v61  ;;  %v2233_v63 = vsel %vm1849_vm11, %v1344_v24, %v2041_v54  ;;  %v1177_v56 = vpop.f32.mrf.mxu2 }
 0x266   : > { %2425 = vst [vmem:[%s3644_s25 + $0x140] sm:$0xff] %v2233_v63  ;;  %v2237_v39 = vsel %vm1853_vm12, %v1685_v2, %v2045_v50  ;;  %v1178_v4 = vadd.f32 %v1177_v56, %v3948_v48 }
 0x267   : > { %2429 = vst [vmem:[%s3644_s25 + $0x160] sm:$0xff] %v2237_v39  ;;  %v1517_v16 = vpop.f32.mrf.mxu0 }
 0x268   : > { %v1346_v34 = vpop.f32.mrf.mxu3  ;;  %v1518_v11 = vadd.f32 %v1517_v16, %v3940_v44  ;;  %v1686_v58 = vpop.f32.mrf.mxu1 }
 0x269   : > { %v1347_v38 = vadd.f32 %v1346_v34, %v1178_v4 }
 0x26a   : > { %v1687_v61 = vadd.f32 %v1686_v58, %v1518_v11 }
 0x26b   : > { %vm1852_vm13 = vcmp.ge.f32.partialorder %v1347_v38, 0.0  ;;  %v2044_v28 = vmul.f32 0.01, %v1347_v38 }
 0x26c   : > { %vm1856_vm14 = vcmp.ge.f32.partialorder %v1687_v61, 0.0  ;;  %v2048_v45 = vmul.f32 0.01, %v1687_v61 }
 0x26d   : > { %v2236_v33 = vsel %vm1852_vm13, %v1347_v38, %v2044_v28  ;;  %v1179_v18 = vpop.f32.mrf.mxu2 }
 0x26e   : > { %2428 = vst [vmem:[%s3644_s25 + $0x158] sm:$0xff] %v2236_v33  ;;  %v2240_v9 = vsel %vm1856_vm14, %v1687_v61, %v2048_v45  ;;  %v1180_v0 = vadd.f32 %v1179_v18, %v3948_v48 }
 0x26f   : > { %2432 = vst [vmem:[%s3644_s25 + $0x178] sm:$0xff] %v2240_v9  ;;  %v1520_v20 = vpop.f32.mrf.mxu0 }
 0x270   : > { %v1348_v40 = vpop.f32.mrf.mxu3  ;;  %v1521_v30 = vadd.f32 %v1520_v20, %v3940_v44  ;;  %v1689_v42 = vpop.f32.mrf.mxu1 }
 0x271   : > { %v1349_v6 = vadd.f32 %v1348_v40, %v1180_v0 }
 0x272   : > { %v1690_v8 = vadd.f32 %v1689_v42, %v1521_v30  ;;  %1221 = vmatmul.bf16.gmra.mxu2 %v3469_v3  ;;  %1559 = vmatmul.bf16.gmra.mxu0 %v3469_v3 }
 0x273   : > { %vm1855_vm15 = vcmp.ge.f32.partialorder %v1349_v6, 0.0  ;;  %v2047_v26 = vmul.f32 0.01, %v1349_v6  ;;  %1728 = vmatmul.bf16.gmra.mxu1 %v3473_v5 }
 0x274   : > { %vm1859_vm0 = vcmp.ge.f32.partialorder %v1690_v8, 0.0  ;;  %v2051_v55 = vmul.f32 0.01, %v1690_v8 }
 0x275   : > { %1390 = vmatmul.bf16.gmra.mxu3 %v3473_v5  ;;  %v2239_v12 = vsel %vm1855_vm15, %v1349_v6, %v2047_v26  ;;  %v1182_v13 = vpop.f32.mrf.mxu2 }
 0x276   : > { %2431 = vst [vmem:[%s3644_s25 + $0x170] sm:$0xff] %v2239_v12  ;;  %v2243_v32 = vsel %vm1859_vm0, %v1690_v8, %v2051_v55  ;;  %v1183_v27 = vadd.f32 %v1182_v13, %v3948_v48 }
 0x277   : > { %2435 = vst [vmem:[%s3644_s25 + $0x190] sm:$0xff] %v2243_v32  ;;  %v1522_v47 = vpop.f32.mrf.mxu0 }
 0x278   : > { %v1351_v10 = vpop.f32.mrf.mxu3  ;;  %v1523_v3 = vadd.f32 %v1522_v47, %v3940_v44  ;;  %v1691_v51 = vpop.f32.mrf.mxu1 }
 0x279   : > { %v1352_v21 = vadd.f32 %v1351_v10, %v1183_v27 }
 0x27a   : > { %v1692_v5 = vadd.f32 %v1691_v51, %v1523_v3 }
 0x27b   : > { %vm1858_vm1 = vcmp.ge.f32.partialorder %v1352_v21, 0.0  ;;  %v2050_v14 = vmul.f32 0.01, %v1352_v21 }
 0x27c   : > { %vm1862_vm2 = vcmp.ge.f32.partialorder %v1692_v5, 0.0  ;;  %v2054_v36 = vmul.f32 0.01, %v1692_v5 }
 0x27d   : > { %v2242_v53 = vsel %vm1858_vm1, %v1352_v21, %v2050_v14  ;;  %v1184_v37 = vpop.f32.mrf.mxu2 }
 0x27e   : > { %2434 = vst [vmem:[%s3644_s25 + $0x188] sm:$0xff] %v2242_v53  ;;  %v2246_v60 = vsel %vm1862_vm2, %v1692_v5, %v2054_v36  ;;  %v1185_v35 = vadd.f32 %v1184_v37, %v3948_v48 }
 0x27f   : > { %2438 = vst [vmem:[%s3644_s25 + $0x1a8] sm:$0xff] %v2246_v60  ;;  %v1525_v62 = vpop.f32.mrf.mxu0 }
 0x280   : > { %v1353_v57 = vpop.f32.mrf.mxu3  ;;  %v1526_v22 = vadd.f32 %v1525_v62, %v3940_v44  ;;  %v1694_v15 = vpop.f32.mrf.mxu1 }
 0x281   : > { %v1354_v46 = vadd.f32 %v1353_v57, %v1185_v35 }
 0x282   : > { %v1695_v25 = vadd.f32 %v1694_v15, %v1526_v22  ;;  %1226 = vmatmul.bf16.gmra.mxu2 %v3489_v29  ;;  %1564 = vmatmul.bf16.gmra.mxu0 %v3489_v29 }
 0x283   : > { %vm1861_vm3 = vcmp.ge.f32.partialorder %v1354_v46, 0.0  ;;  %v2053_v24 = vmul.f32 0.01, %v1354_v46  ;;  %1733 = vmatmul.bf16.gmra.mxu1 %v3493_v31 }
 0x284   : > { %vm1865_vm4 = vcmp.ge.f32.partialorder %v1695_v25, 0.0  ;;  %v2057_v54 = vmul.f32 0.01, %v1695_v25 }
 0x285   : > { %1395 = vmatmul.bf16.gmra.mxu3 %v3493_v31  ;;  %v2245_v23 = vsel %vm1861_vm3, %v1354_v46, %v2053_v24  ;;  %v1187_v2 = vpop.f32.mrf.mxu2 }
 0x286   : > { %2437 = vst [vmem:[%s3644_s25 + $0x1a0] sm:$0xff] %v2245_v23  ;;  %v2249_v63 = vsel %vm1865_vm4, %v1695_v25, %v2057_v54  ;;  %v1188_v50 = vadd.f32 %v1187_v2, %v3948_v48 }
 0x287   : > { %2441 = vst [vmem:[%s3644_s25 + $0x1c0] sm:$0xff] %v2249_v63  ;;  %v1527_v39 = vpop.f32.mrf.mxu0 }
 0x288   : > { %v1356_v56 = vpop.f32.mrf.mxu3  ;;  %v1528_v29 = vadd.f32 %v1527_v39, %v3940_v44  ;;  %v1696_v34 = vpop.f32.mrf.mxu1 }
 0x289   : > { %v1357_v4 = vadd.f32 %v1356_v56, %v1188_v50 }
 0x28a   : > { %v1697_v31 = vadd.f32 %v1696_v34, %v1528_v29 }
 0x28b   : > { %vm1864_vm5 = vcmp.ge.f32.partialorder %v1357_v4, 0.0  ;;  %v2056_v16 = vmul.f32 0.01, %v1357_v4 }
 0x28c   : > { %vm1868_vm6 = vcmp.ge.f32.partialorder %v1697_v31, 0.0  ;;  %v2060_v11 = vmul.f32 0.01, %v1697_v31 }
 0x28d   : > { %v2248_v38 = vsel %vm1864_vm5, %v1357_v4, %v2056_v16  ;;  %v1189_v58 = vpop.f32.mrf.mxu2 }
 0x28e   : > { %2440 = vst [vmem:[%s3644_s25 + $0x1b8] sm:$0xff] %v2248_v38  ;;  %v2252_v28 = vsel %vm1868_vm6, %v1697_v31, %v2060_v11  ;;  %v1190_v61 = vadd.f32 %v1189_v58, %v3948_v48 }
 0x28f   : > { %2444 = vst [vmem:[%s3644_s25 + $0x1d8] sm:$0xff] %v2252_v28  ;;  %v1530_v45 = vpop.f32.mrf.mxu0 }
 0x290   : > { %v1358_v33 = vpop.f32.mrf.mxu3  ;;  %v1531_v9 = vadd.f32 %v1530_v45, %v3940_v44  ;;  %v1699_v0 = vpop.f32.mrf.mxu1 }
 0x291   : > { %v1359_v18 = vadd.f32 %v1358_v33, %v1190_v61 }
 0x292   : > { %v1700_v20 = vadd.f32 %v1699_v0, %v1531_v9  ;;  %1231 = vmatmul.bf16.gmra.mxu2 %v3509_v41  ;;  %1569 = vmatmul.bf16.gmra.mxu0 %v3509_v41 }
 0x293   : > { %vm1867_vm7 = vcmp.ge.f32.partialorder %v1359_v18, 0.0  ;;  %v2059_v40 = vmul.f32 0.01, %v1359_v18  ;;  %1738 = vmatmul.bf16.gmra.mxu1 %v3513_v43 }
 0x294   : > { %vm1871_vm8 = vcmp.ge.f32.partialorder %v1700_v20, 0.0  ;;  %v2063_v30 = vmul.f32 0.01, %v1700_v20 }
 0x295   : > { %1400 = vmatmul.bf16.gmra.mxu3 %v3513_v43  ;;  %v2251_v6 = vsel %vm1867_vm7, %v1359_v18, %v2059_v40  ;;  %v1192_v42 = vpop.f32.mrf.mxu2 }
 0x296   : > { %2443 = vst [vmem:[%s3644_s25 + $0x1d0] sm:$0xff] %v2251_v6  ;;  %v2255_v26 = vsel %vm1871_vm8, %v1700_v20, %v2063_v30  ;;  %v1193_v8 = vadd.f32 %v1192_v42, %v3948_v48 }
 0x297   : > { %2447 = vst [vmem:[%s3644_s25 + $0x1f0] sm:$0xff] %v2255_v26  ;;  %v1532_v55 = vpop.f32.mrf.mxu0 }
 0x298   : > { %v1361_v12 = vpop.f32.mrf.mxu3  ;;  %v1533_v41 = vadd.f32 %v1532_v55, %v3940_v44  ;;  %v1701_v32 = vpop.f32.mrf.mxu1 }
 0x299   : > { %v1362_v13 = vadd.f32 %v1361_v12, %v1193_v8 }
 0x29a   : > { %v1702_v43 = vadd.f32 %v1701_v32, %v1533_v41 }
 0x29b   : > { %vm1870_vm9 = vcmp.ge.f32.partialorder %v1362_v13, 0.0  ;;  %v2062_v27 = vmul.f32 0.01, %v1362_v13 }
 0x29c   : > { %vm1874_vm10 = vcmp.ge.f32.partialorder %v1702_v43, 0.0  ;;  %v2066_v47 = vmul.f32 0.01, %v1702_v43 }
 0x29d   : > { %v2254_v10 = vsel %vm1870_vm9, %v1362_v13, %v2062_v27  ;;  %v1194_v21 = vpop.f32.mrf.mxu2 }
 0x29e   : > { %2446 = vst [vmem:[%s3644_s25 + $0x1e8] sm:$0xff] %v2254_v10  ;;  %v2258_v3 = vsel %vm1874_vm10, %v1702_v43, %v2066_v47  ;;  %v1195_v51 = vadd.f32 %v1194_v21, %v3948_v48  ;;  %v4436_v47 = vld [vmem:[#allocation12_spill] sm:$0xff] }
 0x29f   : > { %2450 = vst [vmem:[%s3644_s25 + $0x208] sm:$0xff] %v2258_v3  ;;  %v1535_v5 = vpop.f32.mrf.mxu0 }
 0x2a0   : > { %v1363_v14 = vpop.f32.mrf.mxu3  ;;  %v1536_v36 = vadd.f32 %v1535_v5, %v3940_v44  ;;  %v1704_v37 = vpop.f32.mrf.mxu1 }
 0x2a1   : > { %v1364_v53 = vadd.f32 %v1363_v14, %v1195_v51 }
 0x2a2   : > { %v1705_v35 = vadd.f32 %v1704_v37, %v1536_v36  ;;  %1236 = vmatmul.bf16.gmra.mxu2 %v3529_v1  ;;  %1574 = vmatmul.bf16.gmra.mxu0 %v3529_v1 }
 0x2a3   : > { %vm1873_vm11 = vcmp.ge.f32.partialorder %v1364_v53, 0.0  ;;  %v2065_v60 = vmul.f32 0.01, %v1364_v53  ;;  %1743 = vmatmul.bf16.gmra.mxu1 %v3533_v7 }
 0x2a4   : > { %vm1877_vm12 = vcmp.ge.f32.partialorder %v1705_v35, 0.0  ;;  %v2069_v62 = vmul.f32 0.01, %v1705_v35 }
 0x2a5   : > { %1405 = vmatmul.bf16.gmra.mxu3 %v3533_v7  ;;  %v2257_v57 = vsel %vm1873_vm11, %v1364_v53, %v2065_v60  ;;  %v1197_v46 = vpop.f32.mrf.mxu2 }
 0x2a6   : > { %2449 = vst [vmem:[%s3644_s25 + $0x200] sm:$0xff] %v2257_v57  ;;  %v2261_v22 = vsel %vm1877_vm12, %v1705_v35, %v2069_v62  ;;  %v1198_v15 = vadd.f32 %v1197_v46, %v3948_v48 }
 0x2a7   : > { %2453 = vst [vmem:[%s3644_s25 + $0x220] sm:$0xff] %v2261_v22  ;;  %v1537_v25 = vpop.f32.mrf.mxu0 }
 0x2a8   : > { %v1366_v24 = vpop.f32.mrf.mxu3  ;;  %v1538_v1 = vadd.f32 %v1537_v25, %v3940_v44  ;;  %v1706_v54 = vpop.f32.mrf.mxu1 }
 0x2a9   : > { %v1367_v23 = vadd.f32 %v1366_v24, %v1198_v15 }
 0x2aa   : > { %v1707_v7 = vadd.f32 %v1706_v54, %v1538_v1 }
 0x2ab   : > { %vm1876_vm13 = vcmp.ge.f32.partialorder %v1367_v23, 0.0  ;;  %v2068_v2 = vmul.f32 0.01, %v1367_v23 }
 0x2ac   : > { %vm1880_vm14 = vcmp.ge.f32.partialorder %v1707_v7, 0.0  ;;  %v2072_v50 = vmul.f32 0.01, %v1707_v7 }
 0x2ad   : > { %v2260_v63 = vsel %vm1876_vm13, %v1367_v23, %v2068_v2  ;;  %v1199_v56 = vpop.f32.mrf.mxu2 }
 0x2ae   : > { %2452 = vst [vmem:[%s3644_s25 + $0x218] sm:$0xff] %v2260_v63  ;;  %v2264_v39 = vsel %vm1880_vm14, %v1707_v7, %v2072_v50  ;;  %v1200_v4 = vadd.f32 %v1199_v56, %v3948_v48  ;;  %v4437_v50 = vld [vmem:[#allocation13_spill] sm:$0xff]  ;;  %v4438_v56 = vld [vmem:[#allocation14_spill] sm:$0xff] }
 0x2af   : > { %2456 = vst [vmem:[%s3644_s25 + $0x238] sm:$0xff] %v2264_v39  ;;  %v1540_v34 = vpop.f32.mrf.mxu0 }
 0x2b0   : > { %v1368_v29 = vpop.f32.mrf.mxu3  ;;  %v1541_v31 = vadd.f32 %v1540_v34, %v3940_v44  ;;  %v1709_v38 = vpop.f32.mrf.mxu1 }
 0x2b1   : > { %v1369_v16 = vadd.f32 %v1368_v29, %v1200_v4 }
 0x2b2   : > { %v1710_v58 = vadd.f32 %v1709_v38, %v1541_v31  ;;  %1241 = vmatmul.bf16.gmra.mxu2 %v3549_v17  ;;  %1579 = vmatmul.bf16.gmra.mxu0 %v3549_v17 }
 0x2b3   : > { %vm1879_vm15 = vcmp.ge.f32.partialorder %v1369_v16, 0.0  ;;  %v2071_v11 = vmul.f32 0.01, %v1369_v16  ;;  %1748 = vmatmul.bf16.gmra.mxu1 %v3553_v19 }
 0x2b4   : > { %vm1883_vm0 = vcmp.ge.f32.partialorder %v1710_v58, 0.0  ;;  %v2075_v61 = vmul.f32 0.01, %v1710_v58 }
 0x2b5   : > { %1410 = vmatmul.bf16.gmra.mxu3 %v3553_v19  ;;  %v2263_v28 = vsel %vm1879_vm15, %v1369_v16, %v2071_v11  ;;  %v1202_v33 = vpop.f32.mrf.mxu2 }
 0x2b6   : > { %2455 = vst [vmem:[%s3644_s25 + $0x230] sm:$0xff] %v2263_v28  ;;  %v2267_v45 = vsel %vm1883_vm0, %v1710_v58, %v2075_v61  ;;  %v1203_v18 = vadd.f32 %v1202_v33, %v3948_v48 }
 0x2b7   : > { %2459 = vst [vmem:[%s3644_s25 + $0x250] sm:$0xff] %v2267_v45  ;;  %v1542_v0 = vpop.f32.mrf.mxu0 }
 0x2b8   : > { %v1371_v9 = vpop.f32.mrf.mxu3  ;;  %v1543_v17 = vadd.f32 %v1542_v0, %v3940_v44  ;;  %v1711_v20 = vpop.f32.mrf.mxu1 }
 0x2b9   : > { %v1372_v40 = vadd.f32 %v1371_v9, %v1203_v18 }
 0x2ba   : > { %v1712_v19 = vadd.f32 %v1711_v20, %v1543_v17 }
 0x2bb   : > { %vm1882_vm1 = vcmp.ge.f32.partialorder %v1372_v40, 0.0  ;;  %v2074_v6 = vmul.f32 0.01, %v1372_v40 }
 0x2bc   : > { %vm1886_vm2 = vcmp.ge.f32.partialorder %v1712_v19, 0.0  ;;  %v2078_v42 = vmul.f32 0.01, %v1712_v19 }
 0x2bd   : > { %v2266_v30 = vsel %vm1882_vm1, %v1372_v40, %v2074_v6  ;;  %v1204_v26 = vpop.f32.mrf.mxu2 }
 0x2be   : > { %2458 = vst [vmem:[%s3644_s25 + $0x248] sm:$0xff] %v2266_v30  ;;  %v2270_v8 = vsel %vm1886_vm2, %v1712_v19, %v2078_v42  ;;  %v1205_v12 = vadd.f32 %v1204_v26, %v3948_v48 }
 0x2bf   : > { %2462 = vst [vmem:[%s3644_s25 + $0x268] sm:$0xff] %v2270_v8  ;;  %v1545_v13 = vpop.f32.mrf.mxu0  ;;  %v4439_v8 = vld [vmem:[#allocation15_spill] sm:$0xff] }
 0x2c0   : > { %v1373_v55 = vpop.f32.mrf.mxu3  ;;  %v1546_v32 = vadd.f32 %v1545_v13, %v3940_v44  ;;  %v1714_v27 = vpop.f32.mrf.mxu1 }
 0x2c1   : > { %v1374_v41 = vadd.f32 %v1373_v55, %v1205_v12  ;;  %v4440_v12 = vld [vmem:[#allocation16_spill] sm:$0xff] }
 0x2c2   : > { %v1715_v10 = vadd.f32 %v1714_v27, %v1546_v32  ;;  %1246 = vmatmul.bf16.gmra.mxu2 %v3569_v49  ;;  %1584 = vmatmul.bf16.gmra.mxu0 %v3569_v49 }
 0x2c3   : > { %vm1885_vm3 = vcmp.ge.f32.partialorder %v1374_v41, 0.0  ;;  %v2077_v43 = vmul.f32 0.01, %v1374_v41  ;;  %1753 = vmatmul.bf16.gmra.mxu1 %v4436_v47 }
 0x2c4   : > { %vm1889_vm4 = vcmp.ge.f32.partialorder %v1715_v10, 0.0  ;;  %v2081_v3 = vmul.f32 0.01, %v1715_v10 }
 0x2c5   : > { %1415 = vmatmul.bf16.gmra.mxu3 %v4436_v47  ;;  %v2269_v21 = vsel %vm1885_vm3, %v1374_v41, %v2077_v43  ;;  %v1207_v51 = vpop.f32.mrf.mxu2 }
 0x2c6   : > { %2461 = vst [vmem:[%s3644_s25 + $0x260] sm:$0xff] %v2269_v21  ;;  %v2273_v14 = vsel %vm1889_vm4, %v1715_v10, %v2081_v3  ;;  %v1208_v5 = vadd.f32 %v1207_v51, %v3948_v48 }
 0x2c7   : > { %2465 = vst [vmem:[%s3644_s25 + $0x280] sm:$0xff] %v2273_v14  ;;  %v1547_v36 = vpop.f32.mrf.mxu0 }
 0x2c8   : > { %v1376_v53 = vpop.f32.mrf.mxu3  ;;  %v1548_v49 = vadd.f32 %v1547_v36, %v3940_v44  ;;  %v1716_v60 = vpop.f32.mrf.mxu1 }
 0x2c9   : > { %v1377_v37 = vadd.f32 %v1376_v53, %v1208_v5 }
 0x2ca   : > { %v1717_v57 = vadd.f32 %v1716_v60, %v1548_v49 }
 0x2cb   : > { %vm1888_vm5 = vcmp.ge.f32.partialorder %v1377_v37, 0.0  ;;  %v2080_v35 = vmul.f32 0.01, %v1377_v37 }
 0x2cc   : > { %vm1892_vm6 = vcmp.ge.f32.partialorder %v1717_v57, 0.0  ;;  %v2084_v46 = vmul.f32 0.01, %v1717_v57 }
 0x2cd   : > { %v2272_v62 = vsel %vm1888_vm5, %v1377_v37, %v2080_v35  ;;  %v1209_v22 = vpop.f32.mrf.mxu2 }
 0x2ce   : > { %2464 = vst [vmem:[%s3644_s25 + $0x278] sm:$0xff] %v2272_v62  ;;  %v2276_v15 = vsel %vm1892_vm6, %v1717_v57, %v2084_v46  ;;  %v1210_v24 = vadd.f32 %v1209_v22, %v3948_v48 }
 0x2cf   : > { %2468 = vst [vmem:[%s3644_s25 + $0x298] sm:$0xff] %v2276_v15  ;;  %v1550_v23 = vpop.f32.mrf.mxu0 }
 0x2d0   : > { %v1378_v25 = vpop.f32.mrf.mxu3  ;;  %v1551_v54 = vadd.f32 %v1550_v23, %v3940_v44  ;;  %v1719_v2 = vpop.f32.mrf.mxu1 }
 0x2d1   : > { %v1379_v1 = vadd.f32 %v1378_v25, %v1210_v24  ;;  %v4441_v24 = vld [vmem:[#allocation17_spill] sm:$0xff]  ;;  %v4442_v25 = vld [vmem:[#allocation18_spill] sm:$0xff] }
 0x2d2   : > { %v1720_v63 = vadd.f32 %v1719_v2, %v1551_v54  ;;  %1251 = vmatmul.bf16.gmra.mxu2 %v4437_v50  ;;  %1589 = vmatmul.bf16.gmra.mxu0 %v4437_v50 }
 0x2d3   : > { %vm1891_vm7 = vcmp.ge.f32.partialorder %v1379_v1, 0.0  ;;  %v2083_v7 = vmul.f32 0.01, %v1379_v1  ;;  %1758 = vmatmul.bf16.gmra.mxu1 %v4438_v56 }
 0x2d4   : > { %vm1895_vm8 = vcmp.ge.f32.partialorder %v1720_v63, 0.0  ;;  %v2087_v4 = vmul.f32 0.01, %v1720_v63 }
 0x2d5   : > { %1420 = vmatmul.bf16.gmra.mxu3 %v4438_v56  ;;  %v2275_v39 = vsel %vm1891_vm7, %v1379_v1, %v2083_v7  ;;  %v1212_v29 = vpop.f32.mrf.mxu2 }
 0x2d6   : > { %2467 = vst [vmem:[%s3644_s25 + $0x290] sm:$0xff] %v2275_v39  ;;  %v2279_v34 = vsel %vm1895_vm8, %v1720_v63, %v2087_v4  ;;  %v1213_v16 = vadd.f32 %v1212_v29, %v3948_v48 }
 0x2d7   : > { %2471 = vst [vmem:[%s3644_s25 + $0x2b0] sm:$0xff] %v2279_v34  ;;  %v1552_v38 = vpop.f32.mrf.mxu0 }
 0x2d8   : > { %v1381_v31 = vpop.f32.mrf.mxu3  ;;  %v1553_v58 = vadd.f32 %v1552_v38, %v3940_v44  ;;  %v1721_v28 = vpop.f32.mrf.mxu1 }
 0x2d9   : > { %v1382_v11 = vadd.f32 %v1381_v31, %v1213_v16 }
 0x2da   : > { %v1722_v33 = vadd.f32 %v1721_v28, %v1553_v58 }
 0x2db   : > { %vm1894_vm9 = vcmp.ge.f32.partialorder %v1382_v11, 0.0  ;;  %v2086_v61 = vmul.f32 0.01, %v1382_v11 }
 0x2dc   : > { %vm1898_vm10 = vcmp.ge.f32.partialorder %v1722_v33, 0.0  ;;  %v2090_v18 = vmul.f32 0.01, %v1722_v33 }
 0x2dd   : > { %v2278_v45 = vsel %vm1894_vm9, %v1382_v11, %v2086_v61  ;;  %v1214_v9 = vpop.f32.mrf.mxu2 }
 0x2de   : > { %2470 = vst [vmem:[%s3644_s25 + $0x2a8] sm:$0xff] %v2278_v45  ;;  %v2282_v0 = vsel %vm1898_vm10, %v1722_v33, %v2090_v18  ;;  %v1215_v40 = vadd.f32 %v1214_v9, %v3948_v48 }
 0x2df   : > { %2474 = vst [vmem:[%s3644_s25 + $0x2c8] sm:$0xff] %v2282_v0  ;;  %v1555_v20 = vpop.f32.mrf.mxu0 }
 0x2e0   : > { %v1383_v17 = vpop.f32.mrf.mxu3  ;;  %v1556_v19 = vadd.f32 %v1555_v20, %v3940_v44  ;;  %v1724_v30 = vpop.f32.mrf.mxu1 }
 0x2e1   : > { %v1384_v6 = vadd.f32 %v1383_v17, %v1215_v40  ;;  %v4443_v40 = vld [vmem:[#allocation19_spill] sm:$0xff]  ;;  %v4444_v17 = vld [vmem:[#allocation20_spill] sm:$0xff] }
 0x2e2   : > { %v1725_v26 = vadd.f32 %v1724_v30, %v1556_v19  ;;  %1256 = vmatmul.bf16.gmra.mxu2 %v4439_v8  ;;  %1594 = vmatmul.bf16.gmra.mxu0 %v4439_v8 }
 0x2e3   : > { %vm1897_vm11 = vcmp.ge.f32.partialorder %v1384_v6, 0.0  ;;  %v2089_v42 = vmul.f32 0.01, %v1384_v6  ;;  %1763 = vmatmul.bf16.gmra.mxu1 %v4440_v12 }
 0x2e4   : > { %vm1901_vm12 = vcmp.ge.f32.partialorder %v1725_v26, 0.0  ;;  %v2093_v13 = vmul.f32 0.01, %v1725_v26 }
 0x2e5   : > { %1425 = vmatmul.bf16.gmra.mxu3 %v4440_v12  ;;  %v2281_v55 = vsel %vm1897_vm11, %v1384_v6, %v2089_v42  ;;  %v1217_v41 = vpop.f32.mrf.mxu2 }
 0x2e6   : > { %2473 = vst [vmem:[%s3644_s25 + $0x2c0] sm:$0xff] %v2281_v55  ;;  %v2285_v32 = vsel %vm1901_vm12, %v1725_v26, %v2093_v13  ;;  %v1218_v27 = vadd.f32 %v1217_v41, %v3948_v48 }
 0x2e7   : > { %2477 = vst [vmem:[%s3644_s25 + $0x2e0] sm:$0xff] %v2285_v32  ;;  %v1557_v10 = vpop.f32.mrf.mxu0 }
 0x2e8   : > { %v1386_v43 = vpop.f32.mrf.mxu3  ;;  %v1558_v21 = vadd.f32 %v1557_v10, %v3940_v44  ;;  %v1726_v3 = vpop.f32.mrf.mxu1 }
 0x2e9   : > { %v1387_v47 = vadd.f32 %v1386_v43, %v1218_v27 }
 0x2ea   : > { %v1727_v14 = vadd.f32 %v1726_v3, %v1558_v21 }
 0x2eb   : > { %vm1900_vm13 = vcmp.ge.f32.partialorder %v1387_v47, 0.0  ;;  %v2092_v51 = vmul.f32 0.01, %v1387_v47 }
 0x2ec   : > { %vm1904_vm14 = vcmp.ge.f32.partialorder %v1727_v14, 0.0  ;;  %v2096_v53 = vmul.f32 0.01, %v1727_v14 }
 0x2ed   : > { %v2284_v5 = vsel %vm1900_vm13, %v1387_v47, %v2092_v51  ;;  %v1219_v36 = vpop.f32.mrf.mxu2 }
 0x2ee   : > { %2476 = vst [vmem:[%s3644_s25 + $0x2d8] sm:$0xff] %v2284_v5  ;;  %v2288_v37 = vsel %vm1904_vm14, %v1727_v14, %v2096_v53  ;;  %v1220_v49 = vadd.f32 %v1219_v36, %v3948_v48 }
 0x2ef   : > { %2480 = vst [vmem:[%s3644_s25 + $0x2f8] sm:$0xff] %v2288_v37  ;;  %v1560_v35 = vpop.f32.mrf.mxu0 }
 0x2f0   : > { %v1388_v60 = vpop.f32.mrf.mxu3  ;;  %v1561_v62 = vadd.f32 %v1560_v35, %v3940_v44  ;;  %v1729_v46 = vpop.f32.mrf.mxu1 }
 0x2f1   : > { %v1389_v57 = vadd.f32 %v1388_v60, %v1220_v49  ;;  %v4445_v49 = vld [vmem:[#allocation21_spill] sm:$0xff]  ;;  %v4446_v60 = vld [vmem:[#allocation22_spill] sm:$0xff] }
 0x2f2   : > { %v1730_v15 = vadd.f32 %v1729_v46, %v1561_v62  ;;  %1261 = vmatmul.bf16.gmra.mxu2 %v4441_v24  ;;  %1599 = vmatmul.bf16.gmra.mxu0 %v4441_v24 }
 0x2f3   : > { %vm1903_vm15 = vcmp.ge.f32.partialorder %v1389_v57, 0.0  ;;  %v2095_v22 = vmul.f32 0.01, %v1389_v57  ;;  %1768 = vmatmul.bf16.gmra.mxu1 %v4442_v25 }
 0x2f4   : > { %vm1907_vm0 = vcmp.ge.f32.partialorder %v1730_v15, 0.0  ;;  %v2099_v1 = vmul.f32 0.01, %v1730_v15 }
 0x2f5   : > { %1430 = vmatmul.bf16.gmra.mxu3 %v4442_v25  ;;  %v2287_v23 = vsel %vm1903_vm15, %v1389_v57, %v2095_v22  ;;  %v1222_v54 = vpop.f32.mrf.mxu2 }
 0x2f6   : > { %2479 = vst [vmem:[%s3644_s25 + $0x2f0] sm:$0xff] %v2287_v23  ;;  %v2291_v2 = vsel %vm1907_vm0, %v1730_v15, %v2099_v1  ;;  %v1223_v7 = vadd.f32 %v1222_v54, %v3948_v48 }
 0x2f7   : > { %2483 = vst [vmem:[%s3644_s25 + $0x310] sm:$0xff] %v2291_v2  ;;  %v1562_v50 = vpop.f32.mrf.mxu0 }
 0x2f8   : > { %v1391_v63 = vpop.f32.mrf.mxu3  ;;  %v1563_v39 = vadd.f32 %v1562_v50, %v3940_v44  ;;  %v1731_v4 = vpop.f32.mrf.mxu1 }
 0x2f9   : > { %v1392_v56 = vadd.f32 %v1391_v63, %v1223_v7 }
 0x2fa   : > { %v1732_v34 = vadd.f32 %v1731_v4, %v1563_v39 }
 0x2fb   : > { %vm1906_vm1 = vcmp.ge.f32.partialorder %v1392_v56, 0.0  ;;  %v2098_v29 = vmul.f32 0.01, %v1392_v56 }
 0x2fc   : > { %vm1910_vm2 = vcmp.ge.f32.partialorder %v1732_v34, 0.0  ;;  %v2102_v31 = vmul.f32 0.01, %v1732_v34 }
 0x2fd   : > { %v2290_v16 = vsel %vm1906_vm1, %v1392_v56, %v2098_v29  ;;  %v1224_v38 = vpop.f32.mrf.mxu2 }
 0x2fe   : > { %2482 = vst [vmem:[%s3644_s25 + $0x308] sm:$0xff] %v2290_v16  ;;  %v2294_v11 = vsel %vm1910_vm2, %v1732_v34, %v2102_v31  ;;  %v1225_v58 = vadd.f32 %v1224_v38, %v3948_v48 }
 0x2ff   : > { %2486 = vst [vmem:[%s3644_s25 + $0x328] sm:$0xff] %v2294_v11  ;;  %v1565_v61 = vpop.f32.mrf.mxu0 }
 0x300   : > { %v1393_v28 = vpop.f32.mrf.mxu3  ;;  %v1566_v45 = vadd.f32 %v1565_v61, %v3940_v44  ;;  %v1734_v18 = vpop.f32.mrf.mxu1 }
 0x301   : > { %v1394_v33 = vadd.f32 %v1393_v28, %v1225_v58  ;;  %v4447_v58 = vld [vmem:[#allocation23_spill] sm:$0xff]  ;;  %v4448_v28 = vld [vmem:[#allocation24_spill] sm:$0xff] }
 0x302   : > { %v1735_v0 = vadd.f32 %v1734_v18, %v1566_v45  ;;  %1266 = vmatmul.bf16.gmra.mxu2 %v4443_v40  ;;  %1604 = vmatmul.bf16.gmra.mxu0 %v4443_v40 }
 0x303   : > { %vm1909_vm3 = vcmp.ge.f32.partialorder %v1394_v33, 0.0  ;;  %v2101_v9 = vmul.f32 0.01, %v1394_v33  ;;  %1773 = vmatmul.bf16.gmra.mxu1 %v4444_v17 }
 0x304   : > { %vm1913_vm4 = vcmp.ge.f32.partialorder %v1735_v0, 0.0  ;;  %v2105_v6 = vmul.f32 0.01, %v1735_v0 }
 0x305   : > { %1435 = vmatmul.bf16.gmra.mxu3 %v4444_v17  ;;  %v2293_v20 = vsel %vm1909_vm3, %v1394_v33, %v2101_v9  ;;  %v1227_v19 = vpop.f32.mrf.mxu2 }
 0x306   : > { %2485 = vst [vmem:[%s3644_s25 + $0x320] sm:$0xff] %v2293_v20  ;;  %v2297_v30 = vsel %vm1913_vm4, %v1735_v0, %v2105_v6  ;;  %v1228_v42 = vadd.f32 %v1227_v19, %v3948_v48 }
 0x307   : > { %2489 = vst [vmem:[%s3644_s25 + $0x340] sm:$0xff] %v2297_v30  ;;  %v1567_v8 = vpop.f32.mrf.mxu0 }
 0x308   : > { %v1396_v26 = vpop.f32.mrf.mxu3  ;;  %v1568_v55 = vadd.f32 %v1567_v8, %v3940_v44  ;;  %v1736_v13 = vpop.f32.mrf.mxu1 }
 0x309   : > { %v1397_v12 = vadd.f32 %v1396_v26, %v1228_v42 }
 0x30a   : > { %v1737_v32 = vadd.f32 %v1736_v13, %v1568_v55 }
 0x30b   : > { %vm1912_vm5 = vcmp.ge.f32.partialorder %v1397_v12, 0.0  ;;  %v2104_v41 = vmul.f32 0.01, %v1397_v12 }
 0x30c   : > { %vm1916_vm6 = vcmp.ge.f32.partialorder %v1737_v32, 0.0  ;;  %v2108_v43 = vmul.f32 0.01, %v1737_v32 }
 0x30d   : > { %v2296_v27 = vsel %vm1912_vm5, %v1397_v12, %v2104_v41  ;;  %v1229_v10 = vpop.f32.mrf.mxu2 }
 0x30e   : > { %2488 = vst [vmem:[%s3644_s25 + $0x338] sm:$0xff] %v2296_v27  ;;  %v2300_v47 = vsel %vm1916_vm6, %v1737_v32, %v2108_v43  ;;  %v1230_v21 = vadd.f32 %v1229_v10, %v3948_v48 }
 0x30f   : > { %2492 = vst [vmem:[%s3644_s25 + $0x358] sm:$0xff] %v2300_v47  ;;  %v1570_v51 = vpop.f32.mrf.mxu0 }
 0x310   : > { %v1398_v3 = vpop.f32.mrf.mxu3  ;;  %v1571_v5 = vadd.f32 %v1570_v51, %v3940_v44  ;;  %v1739_v53 = vpop.f32.mrf.mxu1 }
 0x311   : > { %v1399_v14 = vadd.f32 %v1398_v3, %v1230_v21  ;;  %v4449_v21 = vld [vmem:[#allocation25_spill] sm:$0xff]  ;;  %v4450_v3 = vld [vmem:[#allocation26_spill] sm:$0xff] }
 0x312   : > { %v1740_v37 = vadd.f32 %v1739_v53, %v1571_v5  ;;  %1271 = vmatmul.bf16.gmra.mxu2 %v4445_v49  ;;  %1609 = vmatmul.bf16.gmra.mxu0 %v4445_v49 }
 0x313   : > { %vm1915_vm7 = vcmp.ge.f32.partialorder %v1399_v14, 0.0  ;;  %v2107_v36 = vmul.f32 0.01, %v1399_v14  ;;  %1778 = vmatmul.bf16.gmra.mxu1 %v4446_v60 }
 0x314   : > { %vm1919_vm8 = vcmp.ge.f32.partialorder %v1740_v37, 0.0  ;;  %v2111_v57 = vmul.f32 0.01, %v1740_v37 }
 0x315   : > { %1440 = vmatmul.bf16.gmra.mxu3 %v4446_v60  ;;  %v2299_v35 = vsel %vm1915_vm7, %v1399_v14, %v2107_v36  ;;  %v1232_v62 = vpop.f32.mrf.mxu2 }
 0x316   : > { %2491 = vst [vmem:[%s3644_s25 + $0x350] sm:$0xff] %v2299_v35  ;;  %v2303_v46 = vsel %vm1919_vm8, %v1740_v37, %v2111_v57  ;;  %v1233_v22 = vadd.f32 %v1232_v62, %v3948_v48 }
 0x317   : > { %2495 = vst [vmem:[%s3644_s25 + $0x370] sm:$0xff] %v2303_v46  ;;  %v1572_v24 = vpop.f32.mrf.mxu0 }
 0x318   : > { %v1401_v15 = vpop.f32.mrf.mxu3  ;;  %v1573_v23 = vadd.f32 %v1572_v24, %v3940_v44  ;;  %v1741_v1 = vpop.f32.mrf.mxu1 }
 0x319   : > { %v1402_v25 = vadd.f32 %v1401_v15, %v1233_v22 }
 0x31a   : > { %v1742_v2 = vadd.f32 %v1741_v1, %v1573_v23 }
 0x31b   : > { %vm1918_vm9 = vcmp.ge.f32.partialorder %v1402_v25, 0.0  ;;  %v2110_v54 = vmul.f32 0.01, %v1402_v25 }
 0x31c   : > { %vm1922_vm10 = vcmp.ge.f32.partialorder %v1742_v2, 0.0  ;;  %v2114_v63 = vmul.f32 0.01, %v1742_v2 }
 0x31d   : > { %v2302_v7 = vsel %vm1918_vm9, %v1402_v25, %v2110_v54  ;;  %v1234_v50 = vpop.f32.mrf.mxu2 }
 0x31e   : > { %2494 = vst [vmem:[%s3644_s25 + $0x368] sm:$0xff] %v2302_v7  ;;  %v2306_v56 = vsel %vm1922_vm10, %v1742_v2, %v2114_v63  ;;  %v1235_v39 = vadd.f32 %v1234_v50, %v3948_v48 }
 0x31f   : > { %2498 = vst [vmem:[%s3644_s25 + $0x388] sm:$0xff] %v2306_v56  ;;  %v1575_v29 = vpop.f32.mrf.mxu0 }
 0x320   : > { %v1403_v4 = vpop.f32.mrf.mxu3  ;;  %v1576_v16 = vadd.f32 %v1575_v29, %v3940_v44  ;;  %v1744_v31 = vpop.f32.mrf.mxu1 }
 0x321   : > { %v1404_v34 = vadd.f32 %v1403_v4, %v1235_v39  ;;  %v4451_v39 = vld [vmem:[#allocation27_spill] sm:$0xff]  ;;  %v4452_v4 = vld [vmem:[#allocation28_spill] sm:$0xff] }
 0x322   : > { %v1745_v11 = vadd.f32 %v1744_v31, %v1576_v16  ;;  %1276 = vmatmul.bf16.gmra.mxu2 %v4447_v58  ;;  %1614 = vmatmul.bf16.gmra.mxu0 %v4447_v58 }
 0x323   : > { %vm1921_vm11 = vcmp.ge.f32.partialorder %v1404_v34, 0.0  ;;  %v2113_v38 = vmul.f32 0.01, %v1404_v34  ;;  %1783 = vmatmul.bf16.gmra.mxu1 %v4448_v28 }
 0x324   : > { %vm1925_vm12 = vcmp.ge.f32.partialorder %v1745_v11, 0.0  ;;  %v2117_v33 = vmul.f32 0.01, %v1745_v11 }
 0x325   : > { %1445 = vmatmul.bf16.gmra.mxu3 %v4448_v28  ;;  %v2305_v61 = vsel %vm1921_vm11, %v1404_v34, %v2113_v38  ;;  %v1237_v45 = vpop.f32.mrf.mxu2 }
 0x326   : > { %2497 = vst [vmem:[%s3644_s25 + $0x380] sm:$0xff] %v2305_v61  ;;  %v2309_v18 = vsel %vm1925_vm12, %v1745_v11, %v2117_v33  ;;  %v1238_v9 = vadd.f32 %v1237_v45, %v3948_v48 }
 0x327   : > { %2501 = vst [vmem:[%s3644_s25 + $0x3a0] sm:$0xff] %v2309_v18  ;;  %v1577_v40 = vpop.f32.mrf.mxu0 }
 0x328   : > { %v1406_v0 = vpop.f32.mrf.mxu3  ;;  %v1578_v20 = vadd.f32 %v1577_v40, %v3940_v44  ;;  %v1746_v6 = vpop.f32.mrf.mxu1 }
 0x329   : > { %v1407_v17 = vadd.f32 %v1406_v0, %v1238_v9 }
 0x32a   : > { %v1747_v30 = vadd.f32 %v1746_v6, %v1578_v20 }
 0x32b   : > { %vm1924_vm13 = vcmp.ge.f32.partialorder %v1407_v17, 0.0  ;;  %v2116_v19 = vmul.f32 0.01, %v1407_v17 }
 0x32c   : > { %vm1928_vm14 = vcmp.ge.f32.partialorder %v1747_v30, 0.0  ;;  %v2120_v26 = vmul.f32 0.01, %v1747_v30 }
 0x32d   : > { %v2308_v42 = vsel %vm1924_vm13, %v1407_v17, %v2116_v19  ;;  %v1239_v8 = vpop.f32.mrf.mxu2 }
 0x32e   : > { %2500 = vst [vmem:[%s3644_s25 + $0x398] sm:$0xff] %v2308_v42  ;;  %v2312_v12 = vsel %vm1928_vm14, %v1747_v30, %v2120_v26  ;;  %v1240_v55 = vadd.f32 %v1239_v8, %v3948_v48 }
 0x32f   : > { %2504 = vst [vmem:[%s3644_s25 + $0x3b8] sm:$0xff] %v2312_v12  ;;  %v1580_v41 = vpop.f32.mrf.mxu0 }
 0x330   : > { %v1408_v13 = vpop.f32.mrf.mxu3  ;;  %v1581_v27 = vadd.f32 %v1580_v41, %v3940_v44  ;;  %v1749_v43 = vpop.f32.mrf.mxu1 }
 0x331   : > { %v1409_v32 = vadd.f32 %v1408_v13, %v1240_v55  ;;  %v4453_v55 = vld [vmem:[#allocation29_spill] sm:$0xff]  ;;  %v4454_v13 = vld [vmem:[#allocation30_spill] sm:$0xff] }
 0x332   : > { %v1750_v47 = vadd.f32 %v1749_v43, %v1581_v27  ;;  %1281 = vmatmul.bf16.gmra.mxu2 %v4449_v21  ;;  %1619 = vmatmul.bf16.gmra.mxu0 %v4449_v21 }
 0x333   : > { %vm1927_vm15 = vcmp.ge.f32.partialorder %v1409_v32, 0.0  ;;  %v2119_v10 = vmul.f32 0.01, %v1409_v32  ;;  %1788 = vmatmul.bf16.gmra.mxu1 %v4450_v3 }
 0x334   : > { %vm1931_vm0 = vcmp.ge.f32.partialorder %v1750_v47, 0.0  ;;  %v2123_v14 = vmul.f32 0.01, %v1750_v47 }
 0x335   : > { %1450 = vmatmul.bf16.gmra.mxu3 %v4450_v3  ;;  %v2311_v51 = vsel %vm1927_vm15, %v1409_v32, %v2119_v10  ;;  %v1242_v5 = vpop.f32.mrf.mxu2 }
 0x336   : > { %2503 = vst [vmem:[%s3644_s25 + $0x3b0] sm:$0xff] %v2311_v51  ;;  %v2315_v53 = vsel %vm1931_vm0, %v1750_v47, %v2123_v14  ;;  %v1243_v36 = vadd.f32 %v1242_v5, %v3948_v48 }
 0x337   : > { %2507 = vst [vmem:[%s3644_s25 + $0x3d0] sm:$0xff] %v2315_v53  ;;  %v1582_v49 = vpop.f32.mrf.mxu0 }
 0x338   : > { %v1411_v37 = vpop.f32.mrf.mxu3  ;;  %v1583_v35 = vadd.f32 %v1582_v49, %v3940_v44  ;;  %v1751_v57 = vpop.f32.mrf.mxu1 }
 0x339   : > { %v1412_v60 = vadd.f32 %v1411_v37, %v1243_v36 }
 0x33a   : > { %v1752_v46 = vadd.f32 %v1751_v57, %v1583_v35 }
 0x33b   : > { %vm1930_vm1 = vcmp.ge.f32.partialorder %v1412_v60, 0.0  ;;  %v2122_v62 = vmul.f32 0.01, %v1412_v60 }
 0x33c   : > { %vm1934_vm2 = vcmp.ge.f32.partialorder %v1752_v46, 0.0  ;;  %v2126_v15 = vmul.f32 0.01, %v1752_v46 }
 0x33d   : > { %v2314_v22 = vsel %vm1930_vm1, %v1412_v60, %v2122_v62  ;;  %v1244_v24 = vpop.f32.mrf.mxu2 }
 0x33e   : > { %2506 = vst [vmem:[%s3644_s25 + $0x3c8] sm:$0xff] %v2314_v22  ;;  %v2318_v25 = vsel %vm1934_vm2, %v1752_v46, %v2126_v15  ;;  %v1245_v23 = vadd.f32 %v1244_v24, %v3948_v48 }
 0x33f   : > { %2510 = vst [vmem:[%s3644_s25 + $0x3e8] sm:$0xff] %v2318_v25  ;;  %v1585_v54 = vpop.f32.mrf.mxu0 }
 0x340   : > { %v1413_v1 = vpop.f32.mrf.mxu3  ;;  %v1586_v7 = vadd.f32 %v1585_v54, %v3940_v44  ;;  %v1754_v63 = vpop.f32.mrf.mxu1 }
 0x341   : > { %v1414_v2 = vadd.f32 %v1413_v1, %v1245_v23 }
 0x342   : > { %v1755_v56 = vadd.f32 %v1754_v63, %v1586_v7  ;;  %1286 = vmatmul.bf16.gmra.mxu2 %v4451_v39  ;;  %1624 = vmatmul.bf16.gmra.mxu0 %v4451_v39 }
 0x343   : > { %vm1933_vm3 = vcmp.ge.f32.partialorder %v1414_v2, 0.0  ;;  %v2125_v50 = vmul.f32 0.01, %v1414_v2  ;;  %1793 = vmatmul.bf16.gmra.mxu1 %v4452_v4 }
 0x344   : > { %vm1937_vm4 = vcmp.ge.f32.partialorder %v1755_v56, 0.0  ;;  %v2129_v34 = vmul.f32 0.01, %v1755_v56 }
 0x345   : > { %1455 = vmatmul.bf16.gmra.mxu3 %v4452_v4  ;;  %v2317_v29 = vsel %vm1933_vm3, %v1414_v2, %v2125_v50  ;;  %v1247_v16 = vpop.f32.mrf.mxu2 }
 0x346   : > { %2509 = vst [vmem:[%s3644_s25 + $0x3e0] sm:$0xff] %v2317_v29  ;;  %v2321_v31 = vsel %vm1937_vm4, %v1755_v56, %v2129_v34  ;;  %v1248_v38 = vadd.f32 %v1247_v16, %v3948_v48 }
 0x347   : > { %2513 = vst [vmem:[%s3644_s25 + $0x400] sm:$0xff] %v2321_v31  ;;  %v1587_v58 = vpop.f32.mrf.mxu0 }
 0x348   : > { %v1416_v11 = vpop.f32.mrf.mxu3  ;;  %v1588_v61 = vadd.f32 %v1587_v58, %v3940_v44  ;;  %v1756_v33 = vpop.f32.mrf.mxu1 }
 0x349   : > { %v1417_v28 = vadd.f32 %v1416_v11, %v1248_v38 }
 0x34a   : > { %v1757_v18 = vadd.f32 %v1756_v33, %v1588_v61 }
 0x34b   : > { %vm1936_vm5 = vcmp.ge.f32.partialorder %v1417_v28, 0.0  ;;  %v2128_v45 = vmul.f32 0.01, %v1417_v28 }
 0x34c   : > { %vm1940_vm6 = vcmp.ge.f32.partialorder %v1757_v18, 0.0  ;;  %v2132_v0 = vmul.f32 0.01, %v1757_v18 }
 0x34d   : > { %v2320_v9 = vsel %vm1936_vm5, %v1417_v28, %v2128_v45  ;;  %v1249_v40 = vpop.f32.mrf.mxu2 }
 0x34e   : > { %2512 = vst [vmem:[%s3644_s25 + $0x3f8] sm:$0xff] %v2320_v9  ;;  %v2324_v17 = vsel %vm1940_vm6, %v1757_v18, %v2132_v0  ;;  %v1250_v20 = vadd.f32 %v1249_v40, %v3948_v48 }
 0x34f   : > { %2516 = vst [vmem:[%s3644_s25 + $0x418] sm:$0xff] %v2324_v17  ;;  %v1590_v19 = vpop.f32.mrf.mxu0 }
 0x350   : > { %v1418_v6 = vpop.f32.mrf.mxu3  ;;  %v1591_v42 = vadd.f32 %v1590_v19, %v3940_v44  ;;  %v1759_v26 = vpop.f32.mrf.mxu1 }
 0x351   : > { %v1419_v30 = vadd.f32 %v1418_v6, %v1250_v20 }
 0x352   : > { %v1760_v12 = vadd.f32 %v1759_v26, %v1591_v42  ;;  %1291 = vmatmul.bf16.gmra.mxu2 %v4453_v55  ;;  %1629 = vmatmul.bf16.gmra.mxu0 %v4453_v55 }
 0x353   : > { %vm1939_vm7 = vcmp.ge.f32.partialorder %v1419_v30, 0.0  ;;  %v2131_v8 = vmul.f32 0.01, %v1419_v30  ;;  %1798 = vmatmul.bf16.gmra.mxu1 %v4454_v13 }
 0x354   : > { %vm1943_vm8 = vcmp.ge.f32.partialorder %v1760_v12, 0.0  ;;  %v2135_v32 = vmul.f32 0.01, %v1760_v12 }
 0x355   : > { %1460 = vmatmul.bf16.gmra.mxu3 %v4454_v13  ;;  %v2323_v41 = vsel %vm1939_vm7, %v1419_v30, %v2131_v8  ;;  %v1252_v27 = vpop.f32.mrf.mxu2 }
 0x356   : > { %2515 = vst [vmem:[%s3644_s25 + $0x410] sm:$0xff] %v2323_v41  ;;  %v2327_v43 = vsel %vm1943_vm8, %v1760_v12, %v2135_v32  ;;  %v1253_v10 = vadd.f32 %v1252_v27, %v3948_v48 }
 0x357   : > { %2519 = vst [vmem:[%s3644_s25 + $0x430] sm:$0xff] %v2327_v43  ;;  %v1592_v21 = vpop.f32.mrf.mxu0 }
 0x358   : > { %v1421_v47 = vpop.f32.mrf.mxu3  ;;  %v1593_v51 = vadd.f32 %v1592_v21, %v3940_v44  ;;  %v1761_v14 = vpop.f32.mrf.mxu1 }
 0x359   : > { %v1422_v3 = vadd.f32 %v1421_v47, %v1253_v10 }
 0x35a   : > { %v1762_v53 = vadd.f32 %v1761_v14, %v1593_v51 }
 0x35b   : > { %vm1942_vm9 = vcmp.ge.f32.partialorder %v1422_v3, 0.0  ;;  %v2134_v5 = vmul.f32 0.01, %v1422_v3 }
 0x35c   : > { %vm1946_vm10 = vcmp.ge.f32.partialorder %v1762_v53, 0.0  ;;  %v2138_v37 = vmul.f32 0.01, %v1762_v53 }
 0x35d   : > { %v2326_v36 = vsel %vm1942_vm9, %v1422_v3, %v2134_v5  ;;  %v1254_v49 = vpop.f32.mrf.mxu2 }
 0x35e   : > { %2518 = vst [vmem:[%s3644_s25 + $0x428] sm:$0xff] %v2326_v36  ;;  %v2330_v60 = vsel %vm1946_vm10, %v1762_v53, %v2138_v37  ;;  %v1255_v35 = vadd.f32 %v1254_v49, %v3948_v48 }
 0x35f   : > { %2522 = vst [vmem:[%s3644_s25 + $0x448] sm:$0xff] %v2330_v60  ;;  %v1595_v62 = vpop.f32.mrf.mxu0 }
 0x360   : > { %v1423_v57 = vpop.f32.mrf.mxu3  ;;  %v1596_v22 = vadd.f32 %v1595_v62, %v3940_v44  ;;  %v1764_v15 = vpop.f32.mrf.mxu1 }
 0x361   : > { %v1424_v46 = vadd.f32 %v1423_v57, %v1255_v35 }
 0x362   : > { %v1765_v25 = vadd.f32 %v1764_v15, %v1596_v22  ;;  %1296 = vmatmul.bf16.gmra.mxu2 %v3828_v59  ;;  %1634 = vmatmul.bf16.gmra.mxu0 %v3828_v59 }
 0x363   : > { %vm1945_vm11 = vcmp.ge.f32.partialorder %v1424_v46, 0.0  ;;  %v2137_v24 = vmul.f32 0.01, %v1424_v46  ;;  %1803 = vmatmul.bf16.gmra.mxu1 %v3833_v52 }
 0x364   : > { %vm1949_vm12 = vcmp.ge.f32.partialorder %v1765_v25, 0.0  ;;  %v2141_v1 = vmul.f32 0.01, %v1765_v25 }
 0x365   : > { %1465 = vmatmul.bf16.gmra.mxu3 %v3833_v52  ;;  %v2329_v23 = vsel %vm1945_vm11, %v1424_v46, %v2137_v24  ;;  %v1257_v54 = vpop.f32.mrf.mxu2 }
 0x366   : > { %2521 = vst [vmem:[%s3644_s25 + $0x440] sm:$0xff] %v2329_v23  ;;  %v2333_v2 = vsel %vm1949_vm12, %v1765_v25, %v2141_v1  ;;  %v1258_v7 = vadd.f32 %v1257_v54, %v3948_v48 }
 0x367   : > { %2525 = vst [vmem:[%s3644_s25 + $0x460] sm:$0xff] %v2333_v2  ;;  %v1597_v50 = vpop.f32.mrf.mxu0 }
 0x368   : > { %v1426_v63 = vpop.f32.mrf.mxu3  ;;  %v1598_v59 = vadd.f32 %v1597_v50, %v3940_v44  ;;  %v1766_v39 = vpop.f32.mrf.mxu1 }
 0x369   : > { %v1427_v56 = vadd.f32 %v1426_v63, %v1258_v7 }
 0x36a   : > { %v1767_v52 = vadd.f32 %v1766_v39, %v1598_v59 }
 0x36b   : > { %vm1948_vm13 = vcmp.ge.f32.partialorder %v1427_v56, 0.0  ;;  %v2140_v4 = vmul.f32 0.01, %v1427_v56 }
 0x36c   : > { %vm1952_vm14 = vcmp.ge.f32.partialorder %v1767_v52, 0.0  ;;  %v2144_v34 = vmul.f32 0.01, %v1767_v52 }
 0x36d   : > { %v2332_v29 = vsel %vm1948_vm13, %v1427_v56, %v2140_v4  ;;  %v1259_v16 = vpop.f32.mrf.mxu2 }
 0x36e   : > { %2524 = vst [vmem:[%s3644_s25 + $0x458] sm:$0xff] %v2332_v29  ;;  %v2336_v31 = vsel %vm1952_vm14, %v1767_v52, %v2144_v34  ;;  %v1260_v38 = vadd.f32 %v1259_v16, %v3948_v48 }
 0x36f   : > { %2528 = vst [vmem:[%s3644_s25 + $0x478] sm:$0xff] %v2336_v31  ;;  %v1600_v58 = vpop.f32.mrf.mxu0 }
 0x370   : > { %v1428_v11 = vpop.f32.mrf.mxu3  ;;  %v1601_v61 = vadd.f32 %v1600_v58, %v3940_v44  ;;  %v1769_v33 = vpop.f32.mrf.mxu1 }
 0x371   : > { %v1429_v28 = vadd.f32 %v1428_v11, %v1260_v38 }
 0x372   : > { %v1770_v18 = vadd.f32 %v1769_v33, %v1601_v61 }
 0x373   : > { %vm1951_vm15 = vcmp.ge.f32.partialorder %v1429_v28, 0.0  ;;  %v2143_v45 = vmul.f32 0.01, %v1429_v28 }
 0x374   : > { %vm1955_vm0 = vcmp.ge.f32.partialorder %v1770_v18, 0.0  ;;  %v2147_v0 = vmul.f32 0.01, %v1770_v18 }
 0x375   : > { %v2335_v9 = vsel %vm1951_vm15, %v1429_v28, %v2143_v45  ;;  %v1262_v40 = vpop.f32.mrf.mxu2 }
 0x376   : > { %2527 = vst [vmem:[%s3644_s25 + $0x470] sm:$0xff] %v2335_v9  ;;  %v2339_v17 = vsel %vm1955_vm0, %v1770_v18, %v2147_v0  ;;  %v1263_v20 = vadd.f32 %v1262_v40, %v3948_v48 }
 0x377   : > { %2531 = vst [vmem:[%s3644_s25 + $0x490] sm:$0xff] %v2339_v17  ;;  %v1602_v19 = vpop.f32.mrf.mxu0 }
 0x378   : > { %v1431_v6 = vpop.f32.mrf.mxu3  ;;  %v1603_v42 = vadd.f32 %v1602_v19, %v3940_v44  ;;  %v1771_v26 = vpop.f32.mrf.mxu1 }
 0x379   : > { %v1432_v30 = vadd.f32 %v1431_v6, %v1263_v20 }
 0x37a   : > { %v1772_v12 = vadd.f32 %v1771_v26, %v1603_v42 }
 0x37b   : > { %vm1954_vm1 = vcmp.ge.f32.partialorder %v1432_v30, 0.0  ;;  %v2146_v8 = vmul.f32 0.01, %v1432_v30 }
 0x37c   : > { %vm1958_vm2 = vcmp.ge.f32.partialorder %v1772_v12, 0.0  ;;  %v2150_v13 = vmul.f32 0.01, %v1772_v12 }
 0x37d   : > { %v2338_v55 = vsel %vm1954_vm1, %v1432_v30, %v2146_v8  ;;  %v1264_v41 = vpop.f32.mrf.mxu2 }
 0x37e   : > { %2530 = vst [vmem:[%s3644_s25 + $0x488] sm:$0xff] %v2338_v55  ;;  %v2342_v32 = vsel %vm1958_vm2, %v1772_v12, %v2150_v13  ;;  %v1265_v27 = vadd.f32 %v1264_v41, %v3948_v48 }
 0x37f   : > { %2534 = vst [vmem:[%s3644_s25 + $0x4a8] sm:$0xff] %v2342_v32  ;;  %v1605_v10 = vpop.f32.mrf.mxu0 }
 0x380   : > { %v1433_v43 = vpop.f32.mrf.mxu3  ;;  %v1606_v21 = vadd.f32 %v1605_v10, %v3940_v44  ;;  %v1774_v3 = vpop.f32.mrf.mxu1 }
 0x381   : > { %v1434_v47 = vadd.f32 %v1433_v43, %v1265_v27 }
 0x382   : > { %v1775_v14 = vadd.f32 %v1774_v3, %v1606_v21 }
 0x383   : > { %vm1957_vm3 = vcmp.ge.f32.partialorder %v1434_v47, 0.0  ;;  %v2149_v51 = vmul.f32 0.01, %v1434_v47 }
 0x384   : > { %vm1961_vm4 = vcmp.ge.f32.partialorder %v1775_v14, 0.0  ;;  %v2153_v53 = vmul.f32 0.01, %v1775_v14 }
 0x385   : > { %v2341_v5 = vsel %vm1957_vm3, %v1434_v47, %v2149_v51  ;;  %v1267_v36 = vpop.f32.mrf.mxu2 }
 0x386   : > { %2533 = vst [vmem:[%s3644_s25 + $0x4a0] sm:$0xff] %v2341_v5  ;;  %v2345_v37 = vsel %vm1961_vm4, %v1775_v14, %v2153_v53  ;;  %v1268_v49 = vadd.f32 %v1267_v36, %v3948_v48 }
 0x387   : > { %2537 = vst [vmem:[%s3644_s25 + $0x4c0] sm:$0xff] %v2345_v37  ;;  %v1607_v35 = vpop.f32.mrf.mxu0 }
 0x388   : > { %v1436_v60 = vpop.f32.mrf.mxu3  ;;  %v1608_v62 = vadd.f32 %v1607_v35, %v3940_v44  ;;  %v1776_v46 = vpop.f32.mrf.mxu1 }
 0x389   : > { %v1437_v57 = vadd.f32 %v1436_v60, %v1268_v49 }
 0x38a   : > { %v1777_v15 = vadd.f32 %v1776_v46, %v1608_v62 }
 0x38b   : > { %vm1960_vm5 = vcmp.ge.f32.partialorder %v1437_v57, 0.0  ;;  %v2152_v22 = vmul.f32 0.01, %v1437_v57 }
 0x38c   : > { %vm1964_vm6 = vcmp.ge.f32.partialorder %v1777_v15, 0.0  ;;  %v2156_v25 = vmul.f32 0.01, %v1777_v15 }
 0x38d   : > { %v2344_v24 = vsel %vm1960_vm5, %v1437_v57, %v2152_v22  ;;  %v1269_v23 = vpop.f32.mrf.mxu2 }
 0x38e   : > { %2536 = vst [vmem:[%s3644_s25 + $0x4b8] sm:$0xff] %v2344_v24  ;;  %v2348_v1 = vsel %vm1964_vm6, %v1777_v15, %v2156_v25  ;;  %v1270_v54 = vadd.f32 %v1269_v23, %v3948_v48 }
 0x38f   : > { %2540 = vst [vmem:[%s3644_s25 + $0x4d8] sm:$0xff] %v2348_v1  ;;  %v1610_v7 = vpop.f32.mrf.mxu0 }
 0x390   : > { %v1438_v2 = vpop.f32.mrf.mxu3  ;;  %v1611_v50 = vadd.f32 %v1610_v7, %v3940_v44  ;;  %v1779_v56 = vpop.f32.mrf.mxu1 }
 0x391   : > { %v1439_v63 = vadd.f32 %v1438_v2, %v1270_v54 }
 0x392   : > { %v1780_v39 = vadd.f32 %v1779_v56, %v1611_v50 }
 0x393   : > { %vm1963_vm7 = vcmp.ge.f32.partialorder %v1439_v63, 0.0  ;;  %v2155_v59 = vmul.f32 0.01, %v1439_v63 }
 0x394   : > { %vm1967_vm8 = vcmp.ge.f32.partialorder %v1780_v39, 0.0  ;;  %v2159_v52 = vmul.f32 0.01, %v1780_v39 }
 0x395   : > { %v2347_v4 = vsel %vm1963_vm7, %v1439_v63, %v2155_v59  ;;  %v1272_v29 = vpop.f32.mrf.mxu2 }
 0x396   : > { %2539 = vst [vmem:[%s3644_s25 + $0x4d0] sm:$0xff] %v2347_v4  ;;  %v2351_v34 = vsel %vm1967_vm8, %v1780_v39, %v2159_v52  ;;  %v1273_v16 = vadd.f32 %v1272_v29, %v3948_v48 }
 0x397   : > { %2543 = vst [vmem:[%s3644_s25 + $0x4f0] sm:$0xff] %v2351_v34  ;;  %v1612_v38 = vpop.f32.mrf.mxu0 }
 0x398   : > { %v1441_v31 = vpop.f32.mrf.mxu3  ;;  %v1613_v58 = vadd.f32 %v1612_v38, %v3940_v44  ;;  %v1781_v28 = vpop.f32.mrf.mxu1 }
 0x399   : > { %v1442_v11 = vadd.f32 %v1441_v31, %v1273_v16 }
 0x39a   : > { %v1782_v33 = vadd.f32 %v1781_v28, %v1613_v58 }
 0x39b   : > { %vm1966_vm9 = vcmp.ge.f32.partialorder %v1442_v11, 0.0  ;;  %v2158_v61 = vmul.f32 0.01, %v1442_v11 }
 0x39c   : > { %vm1970_vm10 = vcmp.ge.f32.partialorder %v1782_v33, 0.0  ;;  %v2162_v18 = vmul.f32 0.01, %v1782_v33 }
 0x39d   : > { %v2350_v45 = vsel %vm1966_vm9, %v1442_v11, %v2158_v61  ;;  %v1274_v9 = vpop.f32.mrf.mxu2 }
 0x39e   : > { %2542 = vst [vmem:[%s3644_s25 + $0x4e8] sm:$0xff] %v2350_v45  ;;  %v2354_v0 = vsel %vm1970_vm10, %v1782_v33, %v2162_v18  ;;  %v1275_v40 = vadd.f32 %v1274_v9, %v3948_v48 }
 0x39f   : > { %2546 = vst [vmem:[%s3644_s25 + $0x508] sm:$0xff] %v2354_v0  ;;  %v1615_v20 = vpop.f32.mrf.mxu0 }
 0x3a0   : > { %v1443_v17 = vpop.f32.mrf.mxu3  ;;  %v1616_v19 = vadd.f32 %v1615_v20, %v3940_v44  ;;  %v1784_v30 = vpop.f32.mrf.mxu1 }
 0x3a1   : > { %v1444_v6 = vadd.f32 %v1443_v17, %v1275_v40 }
 0x3a2   : > { %v1785_v26 = vadd.f32 %v1784_v30, %v1616_v19 }
 0x3a3   : > { %vm1969_vm11 = vcmp.ge.f32.partialorder %v1444_v6, 0.0  ;;  %v2161_v42 = vmul.f32 0.01, %v1444_v6 }
 0x3a4   : > { %vm1973_vm12 = vcmp.ge.f32.partialorder %v1785_v26, 0.0  ;;  %v2165_v12 = vmul.f32 0.01, %v1785_v26 }
 0x3a5   : > { %v2353_v8 = vsel %vm1969_vm11, %v1444_v6, %v2161_v42  ;;  %v1277_v55 = vpop.f32.mrf.mxu2 }
 0x3a6   : > { %2545 = vst [vmem:[%s3644_s25 + $0x500] sm:$0xff] %v2353_v8  ;;  %v2357_v13 = vsel %vm1973_vm12, %v1785_v26, %v2165_v12  ;;  %v1278_v41 = vadd.f32 %v1277_v55, %v3948_v48 }
 0x3a7   : > { %2549 = vst [vmem:[%s3644_s25 + $0x520] sm:$0xff] %v2357_v13  ;;  %v1617_v27 = vpop.f32.mrf.mxu0 }
 0x3a8   : > { %v1446_v32 = vpop.f32.mrf.mxu3  ;;  %v1618_v10 = vadd.f32 %v1617_v27, %v3940_v44  ;;  %v1786_v47 = vpop.f32.mrf.mxu1 }
 0x3a9   : > { %v1447_v43 = vadd.f32 %v1446_v32, %v1278_v41 }
 0x3aa   : > { %v1787_v3 = vadd.f32 %v1786_v47, %v1618_v10 }
 0x3ab   : > { %vm1972_vm13 = vcmp.ge.f32.partialorder %v1447_v43, 0.0  ;;  %v2164_v21 = vmul.f32 0.01, %v1447_v43 }
 0x3ac   : > { %vm1976_vm14 = vcmp.ge.f32.partialorder %v1787_v3, 0.0  ;;  %v2168_v14 = vmul.f32 0.01, %v1787_v3 }
 0x3ad   : > { %v2356_v51 = vsel %vm1972_vm13, %v1447_v43, %v2164_v21  ;;  %v1279_v5 = vpop.f32.mrf.mxu2 }
 0x3ae   : > { %2548 = vst [vmem:[%s3644_s25 + $0x518] sm:$0xff] %v2356_v51  ;;  %v2360_v53 = vsel %vm1976_vm14, %v1787_v3, %v2168_v14  ;;  %v1280_v36 = vadd.f32 %v1279_v5, %v3948_v48 }
 0x3af   : > { %2552 = vst [vmem:[%s3644_s25 + $0x538] sm:$0xff] %v2360_v53  ;;  %v1620_v49 = vpop.f32.mrf.mxu0 }
 0x3b0   : > { %v1448_v37 = vpop.f32.mrf.mxu3  ;;  %v1621_v35 = vadd.f32 %v1620_v49, %v3940_v44  ;;  %v1789_v57 = vpop.f32.mrf.mxu1 }
 0x3b1   : > { %v1449_v60 = vadd.f32 %v1448_v37, %v1280_v36 }
 0x3b2   : > { %v1790_v46 = vadd.f32 %v1789_v57, %v1621_v35 }
 0x3b3   : > { %vm1975_vm15 = vcmp.ge.f32.partialorder %v1449_v60, 0.0  ;;  %v2167_v62 = vmul.f32 0.01, %v1449_v60 }
 0x3b4   : > { %vm1979_vm0 = vcmp.ge.f32.partialorder %v1790_v46, 0.0  ;;  %v2171_v15 = vmul.f32 0.01, %v1790_v46 }
 0x3b5   : > { %v2359_v22 = vsel %vm1975_vm15, %v1449_v60, %v2167_v62  ;;  %v1282_v24 = vpop.f32.mrf.mxu2 }
 0x3b6   : > { %2551 = vst [vmem:[%s3644_s25 + $0x530] sm:$0xff] %v2359_v22  ;;  %v2363_v25 = vsel %vm1979_vm0, %v1790_v46, %v2171_v15  ;;  %v1283_v23 = vadd.f32 %v1282_v24, %v3948_v48 }
 0x3b7   : > { %2555 = vst [vmem:[%s3644_s25 + $0x550] sm:$0xff] %v2363_v25  ;;  %v1622_v54 = vpop.f32.mrf.mxu0 }
 0x3b8   : > { %v1451_v1 = vpop.f32.mrf.mxu3  ;;  %v1623_v7 = vadd.f32 %v1622_v54, %v3940_v44  ;;  %v1791_v63 = vpop.f32.mrf.mxu1 }
 0x3b9   : > { %v1452_v2 = vadd.f32 %v1451_v1, %v1283_v23 }
 0x3ba   : > { %v1792_v56 = vadd.f32 %v1791_v63, %v1623_v7 }
 0x3bb   : > { %vm1978_vm1 = vcmp.ge.f32.partialorder %v1452_v2, 0.0  ;;  %v2170_v50 = vmul.f32 0.01, %v1452_v2 }
 0x3bc   : > { %vm1982_vm2 = vcmp.ge.f32.partialorder %v1792_v56, 0.0  ;;  %v2174_v39 = vmul.f32 0.01, %v1792_v56 }
 0x3bd   : > { %v2362_v59 = vsel %vm1978_vm1, %v1452_v2, %v2170_v50  ;;  %v1284_v4 = vpop.f32.mrf.mxu2 }
 0x3be   : > { %2554 = vst [vmem:[%s3644_s25 + $0x548] sm:$0xff] %v2362_v59  ;;  %v2366_v52 = vsel %vm1982_vm2, %v1792_v56, %v2174_v39  ;;  %v1285_v29 = vadd.f32 %v1284_v4, %v3948_v48 }
 0x3bf   : > { %2558 = vst [vmem:[%s3644_s25 + $0x568] sm:$0xff] %v2366_v52  ;;  %v1625_v16 = vpop.f32.mrf.mxu0 }
 0x3c0   : > { %v1453_v34 = vpop.f32.mrf.mxu3  ;;  %v1626_v38 = vadd.f32 %v1625_v16, %v3940_v44  ;;  %v1794_v11 = vpop.f32.mrf.mxu1 }
 0x3c1   : > { %v1454_v31 = vadd.f32 %v1453_v34, %v1285_v29 }
 0x3c2   : > { %v1795_v28 = vadd.f32 %v1794_v11, %v1626_v38 }
 0x3c3   : > { %vm1981_vm3 = vcmp.ge.f32.partialorder %v1454_v31, 0.0  ;;  %v2173_v58 = vmul.f32 0.01, %v1454_v31 }
 0x3c4   : > { %vm1985_vm4 = vcmp.ge.f32.partialorder %v1795_v28, 0.0  ;;  %v2177_v33 = vmul.f32 0.01, %v1795_v28 }
 0x3c5   : > { %v2365_v61 = vsel %vm1981_vm3, %v1454_v31, %v2173_v58  ;;  %v1287_v45 = vpop.f32.mrf.mxu2 }
 0x3c6   : > { %2557 = vst [vmem:[%s3644_s25 + $0x560] sm:$0xff] %v2365_v61  ;;  %v2369_v18 = vsel %vm1985_vm4, %v1795_v28, %v2177_v33  ;;  %v1288_v9 = vadd.f32 %v1287_v45, %v3948_v48 }
 0x3c7   : > { %2561 = vst [vmem:[%s3644_s25 + $0x580] sm:$0xff] %v2369_v18  ;;  %v1627_v40 = vpop.f32.mrf.mxu0 }
 0x3c8   : > { %v1456_v0 = vpop.f32.mrf.mxu3  ;;  %v1628_v20 = vadd.f32 %v1627_v40, %v3940_v44  ;;  %v1796_v6 = vpop.f32.mrf.mxu1 }
 0x3c9   : > { %v1457_v17 = vadd.f32 %v1456_v0, %v1288_v9 }
 0x3ca   : > { %v1797_v30 = vadd.f32 %v1796_v6, %v1628_v20 }
 0x3cb   : > { %vm1984_vm5 = vcmp.ge.f32.partialorder %v1457_v17, 0.0  ;;  %v2176_v19 = vmul.f32 0.01, %v1457_v17 }
 0x3cc   : > { %vm1988_vm6 = vcmp.ge.f32.partialorder %v1797_v30, 0.0  ;;  %v2180_v26 = vmul.f32 0.01, %v1797_v30 }
 0x3cd   : > { %v2368_v42 = vsel %vm1984_vm5, %v1457_v17, %v2176_v19  ;;  %v1289_v8 = vpop.f32.mrf.mxu2 }
 0x3ce   : > { %2560 = vst [vmem:[%s3644_s25 + $0x578] sm:$0xff] %v2368_v42  ;;  %v2372_v12 = vsel %vm1988_vm6, %v1797_v30, %v2180_v26  ;;  %v1290_v55 = vadd.f32 %v1289_v8, %v3948_v48 }
 0x3cf   : > { %2564 = vst [vmem:[%s3644_s25 + $0x598] sm:$0xff] %v2372_v12  ;;  %v1630_v41 = vpop.f32.mrf.mxu0 }
 0x3d0   : > { %v1458_v13 = vpop.f32.mrf.mxu3  ;;  %v1631_v27 = vadd.f32 %v1630_v41, %v3940_v44  ;;  %v1799_v43 = vpop.f32.mrf.mxu1 }
 0x3d1   : > { %v1459_v32 = vadd.f32 %v1458_v13, %v1290_v55 }
 0x3d2   : > { %v1800_v47 = vadd.f32 %v1799_v43, %v1631_v27 }
 0x3d3   : > { %vm1987_vm7 = vcmp.ge.f32.partialorder %v1459_v32, 0.0  ;;  %v2179_v10 = vmul.f32 0.01, %v1459_v32 }
 0x3d4   : > { %vm1991_vm8 = vcmp.ge.f32.partialorder %v1800_v47, 0.0  ;;  %v2183_v3 = vmul.f32 0.01, %v1800_v47 }
 0x3d5   : > { %v2371_v21 = vsel %vm1987_vm7, %v1459_v32, %v2179_v10  ;;  %v1292_v51 = vpop.f32.mrf.mxu2 }
 0x3d6   : > { %2563 = vst [vmem:[%s3644_s25 + $0x590] sm:$0xff] %v2371_v21  ;;  %v2375_v14 = vsel %vm1991_vm8, %v1800_v47, %v2183_v3  ;;  %v1293_v5 = vadd.f32 %v1292_v51, %v3948_v48 }
 0x3d7   : > { %2567 = vst [vmem:[%s3644_s25 + $0x5b0] sm:$0xff] %v2375_v14  ;;  %v1632_v36 = vpop.f32.mrf.mxu0 }
 0x3d8   : > { %v1461_v53 = vpop.f32.mrf.mxu3  ;;  %v1633_v49 = vadd.f32 %v1632_v36, %v3940_v44  ;;  %v1801_v60 = vpop.f32.mrf.mxu1 }
 0x3d9   : > { %v1462_v37 = vadd.f32 %v1461_v53, %v1293_v5 }
 0x3da   : > { %v1802_v57 = vadd.f32 %v1801_v60, %v1633_v49 }
 0x3db   : > { %vm1990_vm9 = vcmp.ge.f32.partialorder %v1462_v37, 0.0  ;;  %v2182_v35 = vmul.f32 0.01, %v1462_v37 }
 0x3dc   : > { %vm1994_vm10 = vcmp.ge.f32.partialorder %v1802_v57, 0.0  ;;  %v2186_v46 = vmul.f32 0.01, %v1802_v57 }
 0x3dd   : > { %v2374_v62 = vsel %vm1990_vm9, %v1462_v37, %v2182_v35  ;;  %v1294_v22 = vpop.f32.mrf.mxu2 }
 0x3de   : > { %2566 = vst [vmem:[%s3644_s25 + $0x5a8] sm:$0xff] %v2374_v62  ;;  %v2378_v15 = vsel %vm1994_vm10, %v1802_v57, %v2186_v46  ;;  %v1295_v24 = vadd.f32 %v1294_v22, %v3948_v48 }
 0x3df   : > { %2570 = vst [vmem:[%s3644_s25 + $0x5c8] sm:$0xff] %v2378_v15  ;;  %v1635_v23 = vpop.f32.mrf.mxu0 }
 0x3e0   : > { %v1463_v25 = vpop.f32.mrf.mxu3  ;;  %v1636_v54 = vadd.f32 %v1635_v23, %v3940_v44  ;;  %v1804_v2 = vpop.f32.mrf.mxu1 }
 0x3e1   : > { %v1464_v1 = vadd.f32 %v1463_v25, %v1295_v24 }
 0x3e2   : > { %v1805_v63 = vadd.f32 %v1804_v2, %v1636_v54 }
 0x3e3   : > { %vm1993_vm11 = vcmp.ge.f32.partialorder %v1464_v1, 0.0  ;;  %v2185_v7 = vmul.f32 0.01, %v1464_v1 }
 0x3e4   : > { %vm1997_vm12 = vcmp.ge.f32.partialorder %v1805_v63, 0.0  ;;  %v2189_v56 = vmul.f32 0.01, %v1805_v63 }
 0x3e5   : > { %v2377_v50 = vsel %vm1993_vm11, %v1464_v1, %v2185_v7  ;;  %v1297_v59 = vpop.f32.mrf.mxu2 }
 0x3e6   : > { %2569 = vst [vmem:[%s3644_s25 + $0x5c0] sm:$0xff] %v2377_v50  ;;  %v2381_v39 = vsel %vm1997_vm12, %v1805_v63, %v2189_v56  ;;  %v1298_v4 = vadd.f32 %v1297_v59, %v3948_v48 }
 0x3e7   : > { %2573 = vst [vmem:[%s3644_s25 + $0x5e0] sm:$0xff] %v2381_v39  ;;  %v1637_v29 = vpop.f32.mrf.mxu0 }
 0x3e8   : > { %v1466_v52 = vpop.f32.mrf.mxu3  ;;  %v1638_v16 = vadd.f32 %v1637_v29, %v3940_v44  ;;  %v1806_v31 = vpop.f32.mrf.mxu1 }
 0x3e9   : > { %v1467_v34 = vadd.f32 %v1466_v52, %v1298_v4 }
 0x3ea   : > { %v1807_v11 = vadd.f32 %v1806_v31, %v1638_v16 }
 0x3eb   : > { %vm1996_vm13 = vcmp.ge.f32.partialorder %v1467_v34, 0.0  ;;  %v2188_v38 = vmul.f32 0.01, %v1467_v34 }
 0x3ec   : > { %vm2000_vm14 = vcmp.ge.f32.partialorder %v1807_v11, 0.0  ;;  %v2192_v28 = vmul.f32 0.01, %v1807_v11 }
 0x3ed   : > { %v2380_v58 = vsel %vm1996_vm13, %v1467_v34, %v2188_v38  ;;  %v1299_v61 = vpop.f32.mrf.mxu2 }
 0x3ee   : > { %2572 = vst [vmem:[%s3644_s25 + $0x5d8] sm:$0xff] %v2380_v58  ;;  %v2384_v33 = vsel %vm2000_vm14, %v1807_v11, %v2192_v28  ;;  %v1300_v45 = vadd.f32 %v1299_v61, %v3948_v48 }
 0x3ef   : > { %2576 = vst [vmem:[%s3644_s25 + $0x5f8] sm:$0xff] %v2384_v33 }
 0x3f0   : > { %v1468_v18 = vpop.f32.mrf.mxu3 }
 0x3f1   : > { %v1469_v9 = vadd.f32 %v1468_v18, %v1300_v45 }
 0x3f2   : > { %2584 = sbr.rel (!%p3368_p9) target bundleno = 1051 (0x41b), region = 48 }
 0x3f3   : > { %vm1999_vm15 = vcmp.ge.f32.partialorder %v1469_v9, 0.0  ;;  %v2191_v0 = vmul.f32 0.01, %v1469_v9 }
 0x3f5   : > { %v2383_v44 = vsel %vm1999_vm15, %v1469_v9, %v2191_v0 }
 0x3f6   : > { %2575 = vst [vmem:[%s3644_s25 + $0x5f0] sm:$0xff] %v2383_v44 }
 0x3f7   : > { %s4467_s9 = smov (!%p2588_p5, %s2587_s9), 64 }
 0x3f8   : > { %s2924_s22 = smul.u32 24, %s4467_s9 }
 0x3fa   : > { %s2592_s29 = ssub.s32 1536, %s2924_s22 }
 0x3fb   : > { %s2593_s24 = sshll.u32 %s2592_s29, 4 }
 0x3fc   : > { %2594 = vsyncadd %s2578_s5, %s2593_s24  ;;  %p4306_p8 = scmp.ne.s32.totalorder %s2924_s22, 0  ;;  %s2999_s7 = smul.u32 1536, %s3271_s15 }
 0x3fd   : > { %s2601_s26 = sshll.u32 %s3644_s25, 4  ;;  %s4312_s18 = smul.u32 384, %s4467_s9  ;;  %s4317_s26 = int_to_ptr.vmem [resolvable:$true] %s2601_s26 }
 0x3fe   : > { %s2599_s4 = scalar_lea.hbm %s4368_s3, %s2999_s7  ;;  %s3182_s19 = sshra.s32 %s4317_s26, 4  ;;  %s3183_s19 = int_to_ptr.vmem [resolvable:$true] %s3182_s19 }
 0x3ff   : > { %s2603_s10 = sshll.u32 %s2599_s4, 4  ;;  %s3184_s23 = sshrl.u32 %s4312_s18, 4  ;;  %s4319_s10 = int_to_ptr.hbm [resolvable:$true] %s2603_s10 }
 0x400   : > { %s3220_s15 = sshll.u32 %s3184_s23, 4  ;;  %s3187_s25 = sadd.s32 1, %s3184_s23 }
 0x401   : > { %p3186_p9 = scmp.ne.s32.totalorder %s3220_s15, %s4312_s18  ;;  %s3288_s9 = smov [#allocation8]  }
 0x402   : > { %s3193_s22 = scalar_lea.vmem %s3288_s9, 3072 }
 0x403   : > { %s4469_s25 = smov (!%p3186_p9, %s3187_s25), %s3184_s23 }
 0x404   : > { %s3189_s6 = scalar_lea.vmem %s3183_s19, %s4469_s25 }
 0x405   : > { %p3190_p0 = scmp.ne.s32.totalorder %s3183_s19, %s3189_s6  ;;  %p3195_p12 = scmp.lt.s32.totalorder %s3193_s22, %s3189_s6 }
 0x407   : > { %p3191_p3 = pnand %p3190_p0, %p4306_p8 }
 0x409   : > { %p3192_p4 = pneg %p3191_p3 }
 0x40b   : > { %p3197_p13 = pnand %p3195_p12, %p3192_p4 }
 0x40d   : > { %3200 = shalt.err (!%p3197_p13)
}
 0x40e   : > { %s3201_s29 = sshra.s32 %s4319_s10, 4  ;;  %s3212_s11 = scalar_lea.hbm %s4368_s3, 2352  ;;  %s3202_s29 = int_to_ptr.hbm [resolvable:$true] %s3201_s29 }
 0x40f   : > { %s3208_s24 = scalar_lea.hbm %s3202_s29, %s4469_s25  ;;  %p3213_p7 = scmp.lt.s32.totalorder %s3202_s29, %s4368_s3 }
 0x410   : > { %p3209_p1 = scmp.ne.s32.totalorder %s3202_s29, %s3208_s24  ;;  %p3214_p10 = scmp.lt.s32.totalorder %s3212_s11, %s3208_s24 }
 0x412   : > { %p3210_p2 = pnand %p3209_p1, %p4306_p8  ;;  %p3215_p5 = por %p3214_p10, %p3213_p7 }
 0x414   : > { %p3211_p6 = pneg %p3210_p2 }
 0x416   : > { %p3216_p9 = pnand %p3215_p5, %p3211_p6 }
 0x418   : > { %3219 = shalt.err (!%p3216_p9)
}
 0x419   : > { %s3289_s23 = smov 384   ;;  %s3290_s15 = smov 24  }
 0x41a   : > { %2609 = dma.vmem_to_hbm [thread:$0]  (%p4306_p8), %s4317_s26, %s4312_s18, %s4319_s10, %s2578_s5, %s3289_s23, %s3289_s23, %s3290_s15  }
 0x41b PF: > { %s2618_s25 = sand.u32 1, %s3259_s12   ;;  %p4456_p0 = scmp.ge.s32.totalorder %s3279_s17, 2 }
 0x41c   : > { %s2619_s6 = scalar_lea.sflag [#allocation4], %s2618_s25 }
 0x41d   : > { %p3018_p3 = pnand %p4456_p0, %p3375_p11 }
 0x41f   : > { %p3019_p4 = pneg %p3018_p3 }
 0x421   : > { %3254 = dma.done.wait (%p3019_p4), %s2619_s6, 24576  }
 0x422   : > { %3256 = vsyncadd (%p3019_p4), %s2619_s6, 4294942720  ;;  %s20_s17 = sadd.s32 1, %s3279_s17   ;;  %s4457_s12 = smov %s3263_s13 }
 0x423   : > { %p17_p12 = scmp.ge.s32.totalorder %s20_s17, 4   ;;  %s4458_s13 = smov %s3267_s14 }
 0x424   : > { %s4459_s14 = smov %s3373_s27  ;;  %s4460_s15 = smov %s3275_s16 }
 0x425   : > { %s4461_s16 = smov %s4463_s20  ;;  %19 = sbr.rel (!%p17_p12) target bundleno = 7 (0x7), region = 87 }
 0x42a   :  { %2625 = vsyncpa [#allocation3], 1 }
 0x42b   :  { %2627 = vsyncpa [#allocation3 + $0x1], 1 }
 0x42c   :  { %2628 = vsyncpa [#allocation6], 1 }
 0x42d   :  { %2629 = vsyncpa [#allocation4], 1 }
 0x42e   :  { %2631 = vsyncpa [#allocation4 + $0x1], 1 }

</bundles_post_ra>
